<compile_context>
chip_gen: v6e
topology: v6e:2x2x1
jax: 0.10.0
libtpu: 0.0.40
codegen_flags: <defaults>
</compile_context>

<pallas_src>
import functools
import math

import jax
import jax.numpy as jnp
from jax.experimental import pallas as pl
from jax.experimental.pallas import tpu as pltpu


# ----------------------------------------------------------------------------
# Fused decoder-stack kernel (one grid step == one batch element, all layers)
# ----------------------------------------------------------------------------

def _decoder_stack_kernel(x_ref, mem_ref, tmask_ref, smask_ref,
                          qkvw_ref, qkvb_ref, wo_ref, ln_ref,
                          w1_ref, b1_ref, w2_ref, ow_ref, ob_ref,
                          o_ref, *, n_layer, n_head):
    x = x_ref[0]            # (S,  D)   target activations (stay resident)
    mem = mem_ref[0]        # (Sk, D)   encoder memory
    tmask = tmask_ref[0]    # (S,  S)   additive mask (0 keep / -1e9 masked)
    smask = smask_ref[0]    # (S,  Sk)  additive mask
    D = x.shape[-1]
    nh = n_head
    dk = D // nh
    scale = 1.0 / math.sqrt(dk)

    def layer_norm(z, g, b):
        mean = jnp.mean(z, axis=-1, keepdims=True)
        zc = z - mean
        var = jnp.mean(zc * zc, axis=-1, keepdims=True)
        return zc * jax.lax.rsqrt(var + 1e-5) * g + b

    def attention(xq, xkv, add_mask, qkv_base, wo_base, bo, g, b):
        # qkv_base / wo_base are static Python ints (layer loop is unrolled).
        sq, sk = xq.shape[0], xkv.shape[0]
        wq = qkvw_ref[pl.ds((qkv_base + 0) * nh, nh)]      # (nh, D, dk)
        wk = qkvw_ref[pl.ds((qkv_base + 1) * nh, nh)]
        wv = qkvw_ref[pl.ds((qkv_base + 2) * nh, nh)]
        bq = qkvb_ref[qkv_base + 0]                        # (nh, 1, dk)
        bk = qkvb_ref[qkv_base + 1]
        bv = qkvb_ref[qkv_base + 2]
        wo = wo_ref[pl.ds(wo_base * nh, nh)]               # (nh, dk, D)

        xq_b = jnp.broadcast_to(xq[None], (nh, sq, D))     # (nh, Sq, D)
        xkv_b = jnp.broadcast_to(xkv[None], (nh, sk, D))   # (nh, Sk, D)

        # Head-batched projections (scale folded into Q after bias).
        qh = (jnp.einsum('hsd,hdf->hsf', xq_b, wq,
                         preferred_element_type=jnp.float32) + bq) * scale
        kh = jnp.einsum('hsd,hdf->hsf', xkv_b, wk,
                        preferred_element_type=jnp.float32) + bk
        vh = jnp.einsum('hsd,hdf->hsf', xkv_b, wv,
                        preferred_element_type=jnp.float32) + bv

        # One batched score matmul + ONE masked softmax over all heads.
        s = jnp.einsum('hqd,hkd->hqk', qh, kh,
                       preferred_element_type=jnp.float32) + add_mask[None]
        s = s - jnp.max(s, axis=-1, keepdims=True)
        p = jnp.exp(s)
        p = p * pl.reciprocal(jnp.sum(p, axis=-1, keepdims=True), approx=True)

        ctx = jnp.einsum('hqk,hkd->hqd', p, vh,
                         preferred_element_type=jnp.float32)   # (nh, Sq, dk)
        # Output projection: per-head partials, summed over heads (== ctx @ Wo).
        proj = jnp.einsum('hqd,hdf->hqf', ctx, wo,
                          preferred_element_type=jnp.float32)  # (nh, Sq, D)
        attn_out = jnp.sum(proj, axis=0) + bo                  # (Sq, D)

        return layer_norm(attn_out + xq, g, b)

    for l in range(n_layer):
        vec = ln_ref[l]     # (9, D): [bo_s, g1, b1, bo_c, g2, b2, ffn_b2, g3, b3]

        # --- self-attention sub-layer ---
        x = attention(x, x, tmask, qkv_base=l * 6, wo_base=l * 2,
                      bo=vec[0:1], g=vec[1:2], b=vec[2:3])
        # --- cross-attention sub-layer ---
        x = attention(x, mem, smask, qkv_base=l * 6 + 3, wo_base=l * 2 + 1,
                      bo=vec[3:4], g=vec[4:5], b=vec[5:6])
        # --- feed-forward sub-layer ---
        h = jnp.dot(x, w1_ref[l], preferred_element_type=jnp.float32) + b1_ref[l]
        h = jnp.maximum(h, 0.0)
        y = jnp.dot(h, w2_ref[l], preferred_element_type=jnp.float32) + vec[6:7]
        x = layer_norm(y + x, g=vec[7:8], b=vec[8:9])

    # Final vocab projection (lane-dense: Vp is a multiple of 128).
    o_ref[0] = (jnp.dot(x, ow_ref[...], preferred_element_type=jnp.float32)
                + ob_ref[...])


# ----------------------------------------------------------------------------
# pallas_call wrapper
# ----------------------------------------------------------------------------

def fused_decoder_stack(x, memory, tgt_add, src_add, params, *, n_head):
    B, S, D = x.shape
    Sk = memory.shape[1]
    L = params["ln_vec"].shape[0]
    H = params["ffn_w1"].shape[-1]
    Vp = params["out_w"].shape[-1]
    nh = n_head
    dk = D // nh

    kernel = functools.partial(_decoder_stack_kernel, n_layer=L, n_head=nh)

    def rep(shape):
        # Full-array block, constant index map (weights resident in VMEM).
        return pl.BlockSpec(shape, lambda i, n=len(shape): (0,) * n)

    return pl.pallas_call(
        kernel,
        out_shape=jax.ShapeDtypeStruct((B, S, Vp), jnp.float32),
        grid=(B,),
        in_specs=[
            pl.BlockSpec((1, S, D), lambda i: (i, 0, 0)),     # x (embedded tgt)
            pl.BlockSpec((1, Sk, D), lambda i: (i, 0, 0)),    # memory
            pl.BlockSpec((1, S, S), lambda i: (i, 0, 0)),     # tgt additive mask
            pl.BlockSpec((1, S, Sk), lambda i: (i, 0, 0)),    # src additive mask
            rep((L * 6 * nh, D, dk)),                         # per-head Wq/Wk/Wv
            rep((L * 6, nh, 1, dk)),                          # per-head bq/bk/bv
            rep((L * 2 * nh, dk, D)),                         # per-head Wo
            rep((L, 9, D)),                                   # bo / LN / ffn_b2
            rep((L, D, H)),                                   # ffn W1
            rep((L, 1, H)),                                   # ffn b1
            rep((L, H, D)),                                   # ffn W2
            rep((D, Vp)),                                     # vocab proj W (padded)
            rep((1, Vp)),                                     # vocab proj b (padded)
        ],
        out_specs=pl.BlockSpec((1, S, Vp), lambda i: (i, 0, 0)),
        compiler_params=pltpu.CompilerParams(
            dimension_semantics=("parallel",)),
    )(x, memory, tgt_add, src_add,
      params["qkv_w"], params["qkv_b"], params["wo_w"], params["ln_vec"],
      params["ffn_w1"], params["ffn_b1"], params["ffn_w2"],
      params["out_w"], params["out_b"])


# ----------------------------------------------------------------------------
# Model glue (plain JAX): embeddings, additive masks, output slice
# ----------------------------------------------------------------------------

def sinusoidal_pe(max_len, d_model):
    pos = jnp.arange(max_len, dtype=jnp.float32)[:, None]
    i = jnp.arange(0, d_model, 2, dtype=jnp.float32)[None, :]
    angle = pos / jnp.power(10000.0, i / d_model)
    pe = jnp.zeros((max_len, d_model), dtype=jnp.float32)
    pe = pe.at[:, 0::2].set(jnp.sin(angle))
    pe = pe.at[:, 1::2].set(jnp.cos(angle))
    return pe


def _expand_mask(mask, sq, sk):
    # (B, 1, 1, Sk) or (B, 1, Sq, Sk) -> (B, Sq, Sk) float32
    B = mask.shape[0]
    return jnp.broadcast_to(mask.astype(jnp.float32), (B, 1, sq, sk))[:, 0]


def decoder_forward(params, tgt_ids, memory, src_mask, tgt_mask, *, n_head):
    B, S = tgt_ids.shape
    S_src = memory.shape[1]
    vocab = params["emb_table"].shape[0]

    # Embedding lookup + sinusoidal positional encoding (tiny gather kept in
    # XLA glue; all heavy compute lives in the single fused Pallas kernel).
    x = jnp.take(params["emb_table"], tgt_ids, axis=0) + params["pos_enc"][:S]

    # Additive masks: 0.0 where keep, -1e9 where masked (single add in-kernel).
    tgt_add = (_expand_mask(tgt_mask, S, S) - 1.0) * 1e9
    src_add = (_expand_mask(src_mask, S, S_src) - 1.0) * 1e9

    out = fused_decoder_stack(x, memory, tgt_add, src_add, params, n_head=n_head)
    return out[:, :, :vocab]


# ----------------------------------------------------------------------------
# Deterministic parameter initialization (packed / per-head layouts)
# ----------------------------------------------------------------------------

def init_params(key, n_layer, d_model, n_head, d_hidden, vocab_size, max_len=64):
    dk = d_model // n_head

    def nrm(k, shape, scale=0.02):
        return scale * jax.random.normal(k, shape, dtype=jnp.float32)

    def split_heads_in(w):   # (D, D) -> (nh, D, dk): per-head output columns
        return jnp.transpose(w.reshape(d_model, n_head, dk), (1, 0, 2))

    def split_heads_out(w):  # (D, D) -> (nh, dk, D): per-head input rows
        return w.reshape(n_head, dk, d_model)

    keys = jax.random.split(key, 2 + n_layer)
    n_pad = int(pl.cdiv(vocab_size, 128)) * 128      # lane-dense vocab proj
    out_w = jnp.zeros((d_model, n_pad), jnp.float32)
    out_w = out_w.at[:, :vocab_size].set(nrm(keys[1], (d_model, vocab_size)))

    qkv_chunks, wo_chunks, ln_rows, w1_l, w2_l = [], [], [], [], []
    zero = jnp.zeros((d_model,), jnp.float32)
    one = jnp.ones((d_model,), jnp.float32)

    for li in range(n_layer):
        lk = jax.random.split(keys[2 + li], 10)
        for a in range(2):                           # 0 = self-attn, 1 = cross-attn
            for c in range(3):                       # q, k, v
                qkv_chunks.append(split_heads_in(nrm(lk[a * 4 + c],
                                                     (d_model, d_model))))
            wo_chunks.append(split_heads_out(nrm(lk[a * 4 + 3],
                                                 (d_model, d_model))))
        w1_l.append(nrm(lk[8], (d_model, d_hidden)))
        w2_l.append(nrm(lk[9], (d_hidden, d_model)))
        # rows: [bo_self, ln1_g, ln1_b, bo_cross, ln2_g, ln2_b, ffn_b2, ln3_g, ln3_b]
        ln_rows.append(jnp.stack([zero, one, zero, zero, one, zero,
                                  zero, one, zero]))

    return {
        "emb_table": nrm(keys[0], (vocab_size, d_model)),
        "pos_enc": sinusoidal_pe(max_len, d_model),
        "qkv_w": jnp.concatenate(qkv_chunks, axis=0),              # (L*6*nh, D, dk)
        "qkv_b": jnp.zeros((n_layer * 6, n_head, 1, dk), jnp.float32),
        "wo_w": jnp.concatenate(wo_chunks, axis=0),                # (L*2*nh, dk, D)
        "ln_vec": jnp.stack(ln_rows),                              # (L, 9, D)
        "ffn_w1": jnp.stack(w1_l),                                 # (L, D, H)
        "ffn_b1": jnp.zeros((n_layer, 1, d_hidden), jnp.float32),  # (L, 1, H)
        "ffn_w2": jnp.stack(w2_l),                                 # (L, H, D)
        "out_w": out_w,                                            # (D, Vpad)
        "out_b": jnp.zeros((1, n_pad), jnp.float32),               # (1, Vpad)
    }


# ----------------------------------------------------------------------------
# Main
# ----------------------------------------------------------------------------

if __name__ == "__main__":
    # Small config: n_layer=2, d_model=32, n_head=4, d_hidden=64, vocab=50
    B, S_TGT, S_SRC = 2, 8, 8
    N_LAYER, D_MODEL, N_HEAD, D_HIDDEN, VOCAB = 2, 32, 4, 64, 50
    # drop_rate ignored (eval mode -> dropout is identity)

    key = jax.random.PRNGKey(0)
    k_param, k_tgt, k_mem = jax.random.split(key, 3)

    params = init_params(k_param, N_LAYER, D_MODEL, N_HEAD, D_HIDDEN, VOCAB)

    tgt_ids = jax.random.randint(k_tgt, (B, S_TGT), 0, VOCAB, dtype=jnp.int32)
    memory = jax.random.normal(k_mem, (B, S_SRC, D_MODEL), dtype=jnp.float32)

    # src_mask: (B, 1, 1, S_src) all ones; tgt_mask: (B, 1, S_tgt, S_tgt) causal
    src_mask = jnp.ones((B, 1, 1, S_SRC), dtype=jnp.float32)
    tgt_mask = jnp.broadcast_to(
        jnp.tril(jnp.ones((S_TGT, S_TGT), dtype=jnp.float32)),
        (B, 1, S_TGT, S_TGT),
    )

    fwd = jax.jit(functools.partial(decoder_forward, n_head=N_HEAD))
    out = fwd(params, tgt_ids, memory, src_mask, tgt_mask)
    jax.block_until_ready(out)

    assert out.shape == (B, S_TGT, VOCAB), out.shape
    assert jnp.all(jnp.isfinite(out))
    print("KERNEL_OK")
</pallas_src>

<mosaic_0001>
module attributes {stable_mosaic.version = 11 : i64} {
  func.func @_decoder_stack_kernel(%arg0: i32, %arg1: memref<1x8x32xf32, #tpu.memory_space<vmem>>, %arg2: memref<1x8x32xf32, #tpu.memory_space<vmem>>, %arg3: memref<1x8x8xf32, #tpu.memory_space<vmem>>, %arg4: memref<1x8x8xf32, #tpu.memory_space<vmem>>, %arg5: memref<48x32x8xf32, #tpu.memory_space<vmem>>, %arg6: memref<12x4x1x8xf32, #tpu.memory_space<vmem>>, %arg7: memref<16x8x32xf32, #tpu.memory_space<vmem>>, %arg8: memref<2x9x32xf32, #tpu.memory_space<vmem>>, %arg9: memref<2x32x64xf32, #tpu.memory_space<vmem>>, %arg10: memref<2x1x64xf32, #tpu.memory_space<vmem>>, %arg11: memref<2x64x32xf32, #tpu.memory_space<vmem>>, %arg12: memref<32x128xf32, #tpu.memory_space<vmem>>, %arg13: memref<1x128xf32, #tpu.memory_space<vmem>>, %arg14: memref<1x8x128xf32, #tpu.memory_space<vmem>>) attributes {dimension_semantics = [#tpu.dimension_semantics<parallel>], iteration_bounds = array<i64: 2>, scalar_prefetch = 0 : i64, scratch_operands = 0 : i64, tpu.core_type = #tpu.core_type<tc>, window_params = [{transform_indices = @transform_0, window_bounds = array<i64: 1, 8, 32>}, {transform_indices = @transform_1, window_bounds = array<i64: 1, 8, 32>}, {transform_indices = @transform_2, window_bounds = array<i64: 1, 8, 8>}, {transform_indices = @transform_3, window_bounds = array<i64: 1, 8, 8>}, {pipeline_mode = #tpu.pipeline_mode<synchronous>, transform_indices = @transform_4, window_bounds = array<i64: 48, 32, 8>}, {pipeline_mode = #tpu.pipeline_mode<synchronous>, transform_indices = @transform_5, window_bounds = array<i64: 12, 4, 1, 8>}, {pipeline_mode = #tpu.pipeline_mode<synchronous>, transform_indices = @transform_6, window_bounds = array<i64: 16, 8, 32>}, {pipeline_mode = #tpu.pipeline_mode<synchronous>, transform_indices = @transform_7, window_bounds = array<i64: 2, 9, 32>}, {pipeline_mode = #tpu.pipeline_mode<synchronous>, transform_indices = @transform_8, window_bounds = array<i64: 2, 32, 64>}, {pipeline_mode = #tpu.pipeline_mode<synchronous>, transform_indices = @transform_9, window_bounds = array<i64: 2, 1, 64>}, {pipeline_mode = #tpu.pipeline_mode<synchronous>, transform_indices = @transform_10, window_bounds = array<i64: 2, 64, 32>}, {pipeline_mode = #tpu.pipeline_mode<synchronous>, transform_indices = @transform_11, window_bounds = array<i64: 32, 128>}, {pipeline_mode = #tpu.pipeline_mode<synchronous>, transform_indices = @transform_12, window_bounds = array<i64: 1, 128>}, {transform_indices = @transform_13, window_bounds = array<i64: 1, 8, 128>}]} {
    %c0 = arith.constant 0 : index
    %c0_0 = arith.constant 0 : index
    %c0_1 = arith.constant 0 : index
    %0 = vector.load %arg1[%c0, %c0_0, %c0_1] : memref<1x8x32xf32, #tpu.memory_space<vmem>>, vector<1x8x32xf32>
    %1 = vector.shape_cast %0 : vector<1x8x32xf32> to vector<8x32xf32>
    %c0_2 = arith.constant 0 : index
    %c0_3 = arith.constant 0 : index
    %c0_4 = arith.constant 0 : index
    %2 = vector.load %arg2[%c0_2, %c0_3, %c0_4] : memref<1x8x32xf32, #tpu.memory_space<vmem>>, vector<1x8x32xf32>
    %3 = vector.shape_cast %2 : vector<1x8x32xf32> to vector<8x32xf32>
    %c0_5 = arith.constant 0 : index
    %c0_6 = arith.constant 0 : index
    %c0_7 = arith.constant 0 : index
    %4 = vector.load %arg3[%c0_5, %c0_6, %c0_7] : memref<1x8x8xf32, #tpu.memory_space<vmem>>, vector<1x8x8xf32>
    %5 = vector.shape_cast %4 : vector<1x8x8xf32> to vector<8x8xf32>
    %c0_8 = arith.constant 0 : index
    %c0_9 = arith.constant 0 : index
    %c0_10 = arith.constant 0 : index
    %6 = vector.load %arg4[%c0_8, %c0_9, %c0_10] : memref<1x8x8xf32, #tpu.memory_space<vmem>>, vector<1x8x8xf32>
    %7 = vector.shape_cast %6 : vector<1x8x8xf32> to vector<8x8xf32>
    %c0_11 = arith.constant 0 : index
    %c0_12 = arith.constant 0 : index
    %c0_13 = arith.constant 0 : index
    %8 = vector.load %arg8[%c0_11, %c0_12, %c0_13] : memref<2x9x32xf32, #tpu.memory_space<vmem>>, vector<1x9x32xf32>
    %9 = vector.shape_cast %8 : vector<1x9x32xf32> to vector<9x32xf32>
    %10 = vector.extract_strided_slice %9 {offsets = [0, 0], sizes = [1, 32], strides = [1, 1]} : vector<9x32xf32> to vector<1x32xf32>
    %11 = vector.extract_strided_slice %9 {offsets = [1, 0], sizes = [1, 32], strides = [1, 1]} : vector<9x32xf32> to vector<1x32xf32>
    %12 = vector.extract_strided_slice %9 {offsets = [2, 0], sizes = [1, 32], strides = [1, 1]} : vector<9x32xf32> to vector<1x32xf32>
    %c0_14 = arith.constant 0 : index
    %c0_15 = arith.constant 0 : index
    %c0_16 = arith.constant 0 : index
    %13 = vector.load %arg5[%c0_14, %c0_15, %c0_16] : memref<48x32x8xf32, #tpu.memory_space<vmem>>, vector<4x32x8xf32>
    %c4 = arith.constant 4 : index
    %c0_17 = arith.constant 0 : index
    %c0_18 = arith.constant 0 : index
    %14 = vector.load %arg5[%c4, %c0_17, %c0_18] : memref<48x32x8xf32, #tpu.memory_space<vmem>>, vector<4x32x8xf32>
    %c8 = arith.constant 8 : index
    %c0_19 = arith.constant 0 : index
    %c0_20 = arith.constant 0 : index
    %15 = vector.load %arg5[%c8, %c0_19, %c0_20] : memref<48x32x8xf32, #tpu.memory_space<vmem>>, vector<4x32x8xf32>
    %c0_21 = arith.constant 0 : index
    %c0_22 = arith.constant 0 : index
    %c0_23 = arith.constant 0 : index
    %c0_24 = arith.constant 0 : index
    %16 = vector.load %arg6[%c0_21, %c0_22, %c0_23, %c0_24] : memref<12x4x1x8xf32, #tpu.memory_space<vmem>>, vector<1x4x1x8xf32>
    %17 = vector.shape_cast %16 : vector<1x4x1x8xf32> to vector<4x1x8xf32>
    %c1 = arith.constant 1 : index
    %c0_25 = arith.constant 0 : index
    %c0_26 = arith.constant 0 : index
    %c0_27 = arith.constant 0 : index
    %18 = vector.load %arg6[%c1, %c0_25, %c0_26, %c0_27] : memref<12x4x1x8xf32, #tpu.memory_space<vmem>>, vector<1x4x1x8xf32>
    %19 = vector.shape_cast %18 : vector<1x4x1x8xf32> to vector<4x1x8xf32>
    %c2 = arith.constant 2 : index
    %c0_28 = arith.constant 0 : index
    %c0_29 = arith.constant 0 : index
    %c0_30 = arith.constant 0 : index
    %20 = vector.load %arg6[%c2, %c0_28, %c0_29, %c0_30] : memref<12x4x1x8xf32, #tpu.memory_space<vmem>>, vector<1x4x1x8xf32>
    %21 = vector.shape_cast %20 : vector<1x4x1x8xf32> to vector<4x1x8xf32>
    %c0_31 = arith.constant 0 : index
    %c0_32 = arith.constant 0 : index
    %c0_33 = arith.constant 0 : index
    %22 = vector.load %arg7[%c0_31, %c0_32, %c0_33] : memref<16x8x32xf32, #tpu.memory_space<vmem>>, vector<4x8x32xf32>
    %23 = vector.shape_cast %1 : vector<8x32xf32> to vector<1x8x32xf32>
    %24 = vector.shape_cast %23 : vector<1x8x32xf32> to vector<1x8x32xf32>
    %25 = vector.broadcast %24 : vector<1x8x32xf32> to vector<4x8x32xf32>
    %26 = vector.shape_cast %1 : vector<8x32xf32> to vector<1x8x32xf32>
    %27 = vector.shape_cast %26 : vector<1x8x32xf32> to vector<1x8x32xf32>
    %28 = vector.broadcast %27 : vector<1x8x32xf32> to vector<4x8x32xf32>
    "tpu.trace_start"() <{level = 10 : i32, message = "hsd,hdf->hsf"}> : () -> ()
    %cst = arith.constant dense<0.000000e+00> : vector<4x8x8xf32>
    %29 = tpu.matmul %25, %13, %cst {dimension_numbers = #tpu.dot_dimension_numbers<[2], [1], [1], [2], [0, 0, 0, 1, 1, 2], [0], [0]>} : vector<4x8x32xf32>, vector<4x32x8xf32>, vector<4x8x8xf32> -> vector<4x8x8xf32>
    "tpu.trace_stop"() : () -> ()
    %30 = vector.broadcast %17 : vector<4x1x8xf32> to vector<4x8x8xf32>
    %31 = arith.addf %29, %30 : vector<4x8x8xf32>
    %cst_34 = arith.constant 0.353553385 : f32
    %32 = vector.broadcast %cst_34 : f32 to vector<4x8x8xf32>
    %33 = arith.mulf %31, %32 : vector<4x8x8xf32>
    "tpu.trace_start"() <{level = 10 : i32, message = "hsd,hdf->hsf"}> : () -> ()
    %cst_35 = arith.constant dense<0.000000e+00> : vector<4x8x8xf32>
    %34 = tpu.matmul %28, %14, %cst_35 {dimension_numbers = #tpu.dot_dimension_numbers<[2], [1], [1], [2], [0, 0, 0, 1, 1, 2], [0], [0]>} : vector<4x8x32xf32>, vector<4x32x8xf32>, vector<4x8x8xf32> -> vector<4x8x8xf32>
    "tpu.trace_stop"() : () -> ()
    %35 = vector.broadcast %19 : vector<4x1x8xf32> to vector<4x8x8xf32>
    %36 = arith.addf %34, %35 : vector<4x8x8xf32>
    "tpu.trace_start"() <{level = 10 : i32, message = "hsd,hdf->hsf"}> : () -> ()
    %cst_36 = arith.constant dense<0.000000e+00> : vector<4x8x8xf32>
    %37 = tpu.matmul %28, %15, %cst_36 {dimension_numbers = #tpu.dot_dimension_numbers<[2], [1], [1], [2], [0, 0, 0, 1, 1, 2], [0], [0]>} : vector<4x8x32xf32>, vector<4x32x8xf32>, vector<4x8x8xf32> -> vector<4x8x8xf32>
    "tpu.trace_stop"() : () -> ()
    %38 = vector.broadcast %21 : vector<4x1x8xf32> to vector<4x8x8xf32>
    %39 = arith.addf %37, %38 : vector<4x8x8xf32>
    "tpu.trace_start"() <{level = 10 : i32, message = "hqd,hkd->hqk"}> : () -> ()
    %cst_37 = arith.constant dense<0.000000e+00> : vector<4x8x8xf32>
    %40 = tpu.matmul %33, %36, %cst_37 {dimension_numbers = #tpu.dot_dimension_numbers<[2], [2], [1], [1], [0, 0, 0, 1, 1, 1], [0], [0]>} : vector<4x8x8xf32>, vector<4x8x8xf32>, vector<4x8x8xf32> -> vector<4x8x8xf32>
    "tpu.trace_stop"() : () -> ()
    %41 = vector.shape_cast %5 : vector<8x8xf32> to vector<1x8x8xf32>
    %42 = vector.broadcast %41 : vector<1x8x8xf32> to vector<4x8x8xf32>
    %43 = arith.addf %40, %42 : vector<4x8x8xf32>
    %cst_38 = arith.constant dense<0xFF800000> : vector<4x8xf32>
    %44 = vector.multi_reduction <maximumf>, %43, %cst_38 [2] : vector<4x8x8xf32> to vector<4x8xf32>
    %45 = vector.shape_cast %44 : vector<4x8xf32> to vector<4x8x1xf32>
    %46 = vector.broadcast %45 : vector<4x8x1xf32> to vector<4x8x8xf32>
    %47 = arith.subf %43, %46 : vector<4x8x8xf32>
    %48 = math.exp %47 : vector<4x8x8xf32>
    %cst_39 = arith.constant dense<0.000000e+00> : vector<4x8xf32>
    %49 = vector.multi_reduction <add>, %48, %cst_39 [2] : vector<4x8x8xf32> to vector<4x8xf32>
    %50 = vector.shape_cast %49 : vector<4x8xf32> to vector<4x8x1xf32>
    %51 = tpu.reciprocal %50 {approx = true} : vector<4x8x1xf32> -> vector<4x8x1xf32>
    %52 = vector.broadcast %51 : vector<4x8x1xf32> to vector<4x8x8xf32>
    %53 = arith.mulf %48, %52 : vector<4x8x8xf32>
    "tpu.trace_start"() <{level = 10 : i32, message = "hqk,hkd->hqd"}> : () -> ()
    %cst_40 = arith.constant dense<0.000000e+00> : vector<4x8x8xf32>
    %54 = tpu.matmul %53, %39, %cst_40 {dimension_numbers = #tpu.dot_dimension_numbers<[2], [1], [1], [2], [0, 0, 0, 1, 1, 2], [0], [0]>} : vector<4x8x8xf32>, vector<4x8x8xf32>, vector<4x8x8xf32> -> vector<4x8x8xf32>
    "tpu.trace_stop"() : () -> ()
    "tpu.trace_start"() <{level = 10 : i32, message = "hqd,hdf->hqf"}> : () -> ()
    %cst_41 = arith.constant dense<0.000000e+00> : vector<4x8x32xf32>
    %55 = tpu.matmul %54, %22, %cst_41 {dimension_numbers = #tpu.dot_dimension_numbers<[2], [1], [1], [2], [0, 0, 0, 1, 1, 2], [0], [0]>} : vector<4x8x8xf32>, vector<4x8x32xf32>, vector<4x8x32xf32> -> vector<4x8x32xf32>
    "tpu.trace_stop"() : () -> ()
    %cst_42 = arith.constant dense<0.000000e+00> : vector<8x32xf32>
    %56 = vector.multi_reduction <add>, %55, %cst_42 [0] : vector<4x8x32xf32> to vector<8x32xf32>
    %57 = vector.broadcast %10 : vector<1x32xf32> to vector<8x32xf32>
    %58 = arith.addf %56, %57 : vector<8x32xf32>
    %59 = arith.addf %58, %1 : vector<8x32xf32>
    %cst_43 = arith.constant dense<0.000000e+00> : vector<8xf32>
    %60 = vector.multi_reduction <add>, %59, %cst_43 [1] : vector<8x32xf32> to vector<8xf32>
    %61 = vector.shape_cast %60 : vector<8xf32> to vector<8x1xf32>
    %cst_44 = arith.constant 3.200000e+01 : f32
    %62 = vector.broadcast %cst_44 : f32 to vector<8x1xf32>
    %63 = arith.divf %61, %62 : vector<8x1xf32>
    %64 = vector.broadcast %63 : vector<8x1xf32> to vector<8x32xf32>
    %65 = arith.subf %59, %64 : vector<8x32xf32>
    %66 = arith.mulf %65, %65 : vector<8x32xf32>
    %cst_45 = arith.constant dense<0.000000e+00> : vector<8xf32>
    %67 = vector.multi_reduction <add>, %66, %cst_45 [1] : vector<8x32xf32> to vector<8xf32>
    %68 = vector.shape_cast %67 : vector<8xf32> to vector<8x1xf32>
    %cst_46 = arith.constant 3.200000e+01 : f32
    %69 = vector.broadcast %cst_46 : f32 to vector<8x1xf32>
    %70 = arith.divf %68, %69 : vector<8x1xf32>
    %cst_47 = arith.constant 9.99999974E-6 : f32
    %71 = vector.broadcast %cst_47 : f32 to vector<8x1xf32>
    %72 = arith.addf %70, %71 : vector<8x1xf32>
    %73 = math.rsqrt %72 : vector<8x1xf32>
    %74 = vector.broadcast %73 : vector<8x1xf32> to vector<8x32xf32>
    %75 = arith.mulf %65, %74 : vector<8x32xf32>
    %76 = vector.broadcast %11 : vector<1x32xf32> to vector<8x32xf32>
    %77 = arith.mulf %75, %76 : vector<8x32xf32>
    %78 = vector.broadcast %12 : vector<1x32xf32> to vector<8x32xf32>
    %79 = arith.addf %77, %78 : vector<8x32xf32>
    %80 = vector.extract_strided_slice %9 {offsets = [3, 0], sizes = [1, 32], strides = [1, 1]} : vector<9x32xf32> to vector<1x32xf32>
    %81 = vector.extract_strided_slice %9 {offsets = [4, 0], sizes = [1, 32], strides = [1, 1]} : vector<9x32xf32> to vector<1x32xf32>
    %82 = vector.extract_strided_slice %9 {offsets = [5, 0], sizes = [1, 32], strides = [1, 1]} : vector<9x32xf32> to vector<1x32xf32>
    %c12 = arith.constant 12 : index
    %c0_48 = arith.constant 0 : index
    %c0_49 = arith.constant 0 : index
    %83 = vector.load %arg5[%c12, %c0_48, %c0_49] : memref<48x32x8xf32, #tpu.memory_space<vmem>>, vector<4x32x8xf32>
    %c16 = arith.constant 16 : index
    %c0_50 = arith.constant 0 : index
    %c0_51 = arith.constant 0 : index
    %84 = vector.load %arg5[%c16, %c0_50, %c0_51] : memref<48x32x8xf32, #tpu.memory_space<vmem>>, vector<4x32x8xf32>
    %c20 = arith.constant 20 : index
    %c0_52 = arith.constant 0 : index
    %c0_53 = arith.constant 0 : index
    %85 = vector.load %arg5[%c20, %c0_52, %c0_53] : memref<48x32x8xf32, #tpu.memory_space<vmem>>, vector<4x32x8xf32>
    %c3 = arith.constant 3 : index
    %c0_54 = arith.constant 0 : index
    %c0_55 = arith.constant 0 : index
    %c0_56 = arith.constant 0 : index
    %86 = vector.load %arg6[%c3, %c0_54, %c0_55, %c0_56] : memref<12x4x1x8xf32, #tpu.memory_space<vmem>>, vector<1x4x1x8xf32>
    %87 = vector.shape_cast %86 : vector<1x4x1x8xf32> to vector<4x1x8xf32>
    %c4_57 = arith.constant 4 : index
    %c0_58 = arith.constant 0 : index
    %c0_59 = arith.constant 0 : index
    %c0_60 = arith.constant 0 : index
    %88 = vector.load %arg6[%c4_57, %c0_58, %c0_59, %c0_60] : memref<12x4x1x8xf32, #tpu.memory_space<vmem>>, vector<1x4x1x8xf32>
    %89 = vector.shape_cast %88 : vector<1x4x1x8xf32> to vector<4x1x8xf32>
    %c5 = arith.constant 5 : index
    %c0_61 = arith.constant 0 : index
    %c0_62 = arith.constant 0 : index
    %c0_63 = arith.constant 0 : index
    %90 = vector.load %arg6[%c5, %c0_61, %c0_62, %c0_63] : memref<12x4x1x8xf32, #tpu.memory_space<vmem>>, vector<1x4x1x8xf32>
    %91 = vector.shape_cast %90 : vector<1x4x1x8xf32> to vector<4x1x8xf32>
    %c4_64 = arith.constant 4 : index
    %c0_65 = arith.constant 0 : index
    %c0_66 = arith.constant 0 : index
    %92 = vector.load %arg7[%c4_64, %c0_65, %c0_66] : memref<16x8x32xf32, #tpu.memory_space<vmem>>, vector<4x8x32xf32>
    %93 = vector.shape_cast %79 : vector<8x32xf32> to vector<1x8x32xf32>
    %94 = vector.shape_cast %93 : vector<1x8x32xf32> to vector<1x8x32xf32>
    %95 = vector.broadcast %94 : vector<1x8x32xf32> to vector<4x8x32xf32>
    %96 = vector.shape_cast %3 : vector<8x32xf32> to vector<1x8x32xf32>
    %97 = vector.shape_cast %96 : vector<1x8x32xf32> to vector<1x8x32xf32>
    %98 = vector.broadcast %97 : vector<1x8x32xf32> to vector<4x8x32xf32>
    "tpu.trace_start"() <{level = 10 : i32, message = "hsd,hdf->hsf"}> : () -> ()
    %cst_67 = arith.constant dense<0.000000e+00> : vector<4x8x8xf32>
    %99 = tpu.matmul %95, %83, %cst_67 {dimension_numbers = #tpu.dot_dimension_numbers<[2], [1], [1], [2], [0, 0, 0, 1, 1, 2], [0], [0]>} : vector<4x8x32xf32>, vector<4x32x8xf32>, vector<4x8x8xf32> -> vector<4x8x8xf32>
    "tpu.trace_stop"() : () -> ()
    %100 = vector.broadcast %87 : vector<4x1x8xf32> to vector<4x8x8xf32>
    %101 = arith.addf %99, %100 : vector<4x8x8xf32>
    %cst_68 = arith.constant 0.353553385 : f32
    %102 = vector.broadcast %cst_68 : f32 to vector<4x8x8xf32>
    %103 = arith.mulf %101, %102 : vector<4x8x8xf32>
    "tpu.trace_start"() <{level = 10 : i32, message = "hsd,hdf->hsf"}> : () -> ()
    %cst_69 = arith.constant dense<0.000000e+00> : vector<4x8x8xf32>
    %104 = tpu.matmul %98, %84, %cst_69 {dimension_numbers = #tpu.dot_dimension_numbers<[2], [1], [1], [2], [0, 0, 0, 1, 1, 2], [0], [0]>} : vector<4x8x32xf32>, vector<4x32x8xf32>, vector<4x8x8xf32> -> vector<4x8x8xf32>
    "tpu.trace_stop"() : () -> ()
    %105 = vector.broadcast %89 : vector<4x1x8xf32> to vector<4x8x8xf32>
    %106 = arith.addf %104, %105 : vector<4x8x8xf32>
    "tpu.trace_start"() <{level = 10 : i32, message = "hsd,hdf->hsf"}> : () -> ()
    %cst_70 = arith.constant dense<0.000000e+00> : vector<4x8x8xf32>
    %107 = tpu.matmul %98, %85, %cst_70 {dimension_numbers = #tpu.dot_dimension_numbers<[2], [1], [1], [2], [0, 0, 0, 1, 1, 2], [0], [0]>} : vector<4x8x32xf32>, vector<4x32x8xf32>, vector<4x8x8xf32> -> vector<4x8x8xf32>
    "tpu.trace_stop"() : () -> ()
    %108 = vector.broadcast %91 : vector<4x1x8xf32> to vector<4x8x8xf32>
    %109 = arith.addf %107, %108 : vector<4x8x8xf32>
    "tpu.trace_start"() <{level = 10 : i32, message = "hqd,hkd->hqk"}> : () -> ()
    %cst_71 = arith.constant dense<0.000000e+00> : vector<4x8x8xf32>
    %110 = tpu.matmul %103, %106, %cst_71 {dimension_numbers = #tpu.dot_dimension_numbers<[2], [2], [1], [1], [0, 0, 0, 1, 1, 1], [0], [0]>} : vector<4x8x8xf32>, vector<4x8x8xf32>, vector<4x8x8xf32> -> vector<4x8x8xf32>
    "tpu.trace_stop"() : () -> ()
    %111 = vector.shape_cast %7 : vector<8x8xf32> to vector<1x8x8xf32>
    %112 = vector.broadcast %111 : vector<1x8x8xf32> to vector<4x8x8xf32>
    %113 = arith.addf %110, %112 : vector<4x8x8xf32>
    %cst_72 = arith.constant dense<0xFF800000> : vector<4x8xf32>
    %114 = vector.multi_reduction <maximumf>, %113, %cst_72 [2] : vector<4x8x8xf32> to vector<4x8xf32>
    %115 = vector.shape_cast %114 : vector<4x8xf32> to vector<4x8x1xf32>
    %116 = vector.broadcast %115 : vector<4x8x1xf32> to vector<4x8x8xf32>
    %117 = arith.subf %113, %116 : vector<4x8x8xf32>
    %118 = math.exp %117 : vector<4x8x8xf32>
    %cst_73 = arith.constant dense<0.000000e+00> : vector<4x8xf32>
    %119 = vector.multi_reduction <add>, %118, %cst_73 [2] : vector<4x8x8xf32> to vector<4x8xf32>
    %120 = vector.shape_cast %119 : vector<4x8xf32> to vector<4x8x1xf32>
    %121 = tpu.reciprocal %120 {approx = true} : vector<4x8x1xf32> -> vector<4x8x1xf32>
    %122 = vector.broadcast %121 : vector<4x8x1xf32> to vector<4x8x8xf32>
    %123 = arith.mulf %118, %122 : vector<4x8x8xf32>
    "tpu.trace_start"() <{level = 10 : i32, message = "hqk,hkd->hqd"}> : () -> ()
    %cst_74 = arith.constant dense<0.000000e+00> : vector<4x8x8xf32>
    %124 = tpu.matmul %123, %109, %cst_74 {dimension_numbers = #tpu.dot_dimension_numbers<[2], [1], [1], [2], [0, 0, 0, 1, 1, 2], [0], [0]>} : vector<4x8x8xf32>, vector<4x8x8xf32>, vector<4x8x8xf32> -> vector<4x8x8xf32>
    "tpu.trace_stop"() : () -> ()
    "tpu.trace_start"() <{level = 10 : i32, message = "hqd,hdf->hqf"}> : () -> ()
    %cst_75 = arith.constant dense<0.000000e+00> : vector<4x8x32xf32>
    %125 = tpu.matmul %124, %92, %cst_75 {dimension_numbers = #tpu.dot_dimension_numbers<[2], [1], [1], [2], [0, 0, 0, 1, 1, 2], [0], [0]>} : vector<4x8x8xf32>, vector<4x8x32xf32>, vector<4x8x32xf32> -> vector<4x8x32xf32>
    "tpu.trace_stop"() : () -> ()
    %cst_76 = arith.constant dense<0.000000e+00> : vector<8x32xf32>
    %126 = vector.multi_reduction <add>, %125, %cst_76 [0] : vector<4x8x32xf32> to vector<8x32xf32>
    %127 = vector.broadcast %80 : vector<1x32xf32> to vector<8x32xf32>
    %128 = arith.addf %126, %127 : vector<8x32xf32>
    %129 = arith.addf %128, %79 : vector<8x32xf32>
    %cst_77 = arith.constant dense<0.000000e+00> : vector<8xf32>
    %130 = vector.multi_reduction <add>, %129, %cst_77 [1] : vector<8x32xf32> to vector<8xf32>
    %131 = vector.shape_cast %130 : vector<8xf32> to vector<8x1xf32>
    %cst_78 = arith.constant 3.200000e+01 : f32
    %132 = vector.broadcast %cst_78 : f32 to vector<8x1xf32>
    %133 = arith.divf %131, %132 : vector<8x1xf32>
    %134 = vector.broadcast %133 : vector<8x1xf32> to vector<8x32xf32>
    %135 = arith.subf %129, %134 : vector<8x32xf32>
    %136 = arith.mulf %135, %135 : vector<8x32xf32>
    %cst_79 = arith.constant dense<0.000000e+00> : vector<8xf32>
    %137 = vector.multi_reduction <add>, %136, %cst_79 [1] : vector<8x32xf32> to vector<8xf32>
    %138 = vector.shape_cast %137 : vector<8xf32> to vector<8x1xf32>
    %cst_80 = arith.constant 3.200000e+01 : f32
    %139 = vector.broadcast %cst_80 : f32 to vector<8x1xf32>
    %140 = arith.divf %138, %139 : vector<8x1xf32>
    %cst_81 = arith.constant 9.99999974E-6 : f32
    %141 = vector.broadcast %cst_81 : f32 to vector<8x1xf32>
    %142 = arith.addf %140, %141 : vector<8x1xf32>
    %143 = math.rsqrt %142 : vector<8x1xf32>
    %144 = vector.broadcast %143 : vector<8x1xf32> to vector<8x32xf32>
    %145 = arith.mulf %135, %144 : vector<8x32xf32>
    %146 = vector.broadcast %81 : vector<1x32xf32> to vector<8x32xf32>
    %147 = arith.mulf %145, %146 : vector<8x32xf32>
    %148 = vector.broadcast %82 : vector<1x32xf32> to vector<8x32xf32>
    %149 = arith.addf %147, %148 : vector<8x32xf32>
    %c0_82 = arith.constant 0 : index
    %c0_83 = arith.constant 0 : index
    %c0_84 = arith.constant 0 : index
    %150 = vector.load %arg9[%c0_82, %c0_83, %c0_84] : memref<2x32x64xf32, #tpu.memory_space<vmem>>, vector<1x32x64xf32>
    %151 = vector.shape_cast %150 : vector<1x32x64xf32> to vector<32x64xf32>
    %cst_85 = arith.constant dense<0.000000e+00> : vector<8x64xf32>
    %152 = tpu.matmul %149, %151, %cst_85 {dimension_numbers = #tpu.dot_dimension_numbers<[1], [0], [0], [1], [0, 0, 1, 1], [], []>} : vector<8x32xf32>, vector<32x64xf32>, vector<8x64xf32> -> vector<8x64xf32>
    %c0_86 = arith.constant 0 : index
    %c0_87 = arith.constant 0 : index
    %c0_88 = arith.constant 0 : index
    %153 = vector.load %arg10[%c0_86, %c0_87, %c0_88] : memref<2x1x64xf32, #tpu.memory_space<vmem>>, vector<1x1x64xf32>
    %154 = vector.shape_cast %153 : vector<1x1x64xf32> to vector<1x64xf32>
    %155 = vector.broadcast %154 : vector<1x64xf32> to vector<8x64xf32>
    %156 = arith.addf %152, %155 : vector<8x64xf32>
    %cst_89 = arith.constant 0.000000e+00 : f32
    %157 = vector.broadcast %cst_89 : f32 to vector<8x64xf32>
    %158 = arith.maximumf %156, %157 : vector<8x64xf32>
    %c0_90 = arith.constant 0 : index
    %c0_91 = arith.constant 0 : index
    %c0_92 = arith.constant 0 : index
    %159 = vector.load %arg11[%c0_90, %c0_91, %c0_92] : memref<2x64x32xf32, #tpu.memory_space<vmem>>, vector<1x64x32xf32>
    %160 = vector.shape_cast %159 : vector<1x64x32xf32> to vector<64x32xf32>
    %cst_93 = arith.constant dense<0.000000e+00> : vector<8x32xf32>
    %161 = tpu.matmul %158, %160, %cst_93 {dimension_numbers = #tpu.dot_dimension_numbers<[1], [0], [0], [1], [0, 0, 1, 1], [], []>} : vector<8x64xf32>, vector<64x32xf32>, vector<8x32xf32> -> vector<8x32xf32>
    %162 = vector.extract_strided_slice %9 {offsets = [6, 0], sizes = [1, 32], strides = [1, 1]} : vector<9x32xf32> to vector<1x32xf32>
    %163 = vector.broadcast %162 : vector<1x32xf32> to vector<8x32xf32>
    %164 = arith.addf %161, %163 : vector<8x32xf32>
    %165 = arith.addf %164, %149 : vector<8x32xf32>
    %166 = vector.extract_strided_slice %9 {offsets = [7, 0], sizes = [1, 32], strides = [1, 1]} : vector<9x32xf32> to vector<1x32xf32>
    %167 = vector.extract_strided_slice %9 {offsets = [8, 0], sizes = [1, 32], strides = [1, 1]} : vector<9x32xf32> to vector<1x32xf32>
    %cst_94 = arith.constant dense<0.000000e+00> : vector<8xf32>
    %168 = vector.multi_reduction <add>, %165, %cst_94 [1] : vector<8x32xf32> to vector<8xf32>
    %169 = vector.shape_cast %168 : vector<8xf32> to vector<8x1xf32>
    %cst_95 = arith.constant 3.200000e+01 : f32
    %170 = vector.broadcast %cst_95 : f32 to vector<8x1xf32>
    %171 = arith.divf %169, %170 : vector<8x1xf32>
    %172 = vector.broadcast %171 : vector<8x1xf32> to vector<8x32xf32>
    %173 = arith.subf %165, %172 : vector<8x32xf32>
    %174 = arith.mulf %173, %173 : vector<8x32xf32>
    %cst_96 = arith.constant dense<0.000000e+00> : vector<8xf32>
    %175 = vector.multi_reduction <add>, %174, %cst_96 [1] : vector<8x32xf32> to vector<8xf32>
    %176 = vector.shape_cast %175 : vector<8xf32> to vector<8x1xf32>
    %cst_97 = arith.constant 3.200000e+01 : f32
    %177 = vector.broadcast %cst_97 : f32 to vector<8x1xf32>
    %178 = arith.divf %176, %177 : vector<8x1xf32>
    %cst_98 = arith.constant 9.99999974E-6 : f32
    %179 = vector.broadcast %cst_98 : f32 to vector<8x1xf32>
    %180 = arith.addf %178, %179 : vector<8x1xf32>
    %181 = math.rsqrt %180 : vector<8x1xf32>
    %182 = vector.broadcast %181 : vector<8x1xf32> to vector<8x32xf32>
    %183 = arith.mulf %173, %182 : vector<8x32xf32>
    %184 = vector.broadcast %166 : vector<1x32xf32> to vector<8x32xf32>
    %185 = arith.mulf %183, %184 : vector<8x32xf32>
    %186 = vector.broadcast %167 : vector<1x32xf32> to vector<8x32xf32>
    %187 = arith.addf %185, %186 : vector<8x32xf32>
    %c1_99 = arith.constant 1 : index
    %c0_100 = arith.constant 0 : index
    %c0_101 = arith.constant 0 : index
    %188 = vector.load %arg8[%c1_99, %c0_100, %c0_101] : memref<2x9x32xf32, #tpu.memory_space<vmem>>, vector<1x9x32xf32>
    %189 = vector.shape_cast %188 : vector<1x9x32xf32> to vector<9x32xf32>
    %190 = vector.extract_strided_slice %189 {offsets = [0, 0], sizes = [1, 32], strides = [1, 1]} : vector<9x32xf32> to vector<1x32xf32>
    %191 = vector.extract_strided_slice %189 {offsets = [1, 0], sizes = [1, 32], strides = [1, 1]} : vector<9x32xf32> to vector<1x32xf32>
    %192 = vector.extract_strided_slice %189 {offsets = [2, 0], sizes = [1, 32], strides = [1, 1]} : vector<9x32xf32> to vector<1x32xf32>
    %c24 = arith.constant 24 : index
    %c0_102 = arith.constant 0 : index
    %c0_103 = arith.constant 0 : index
    %193 = vector.load %arg5[%c24, %c0_102, %c0_103] : memref<48x32x8xf32, #tpu.memory_space<vmem>>, vector<4x32x8xf32>
    %c28 = arith.constant 28 : index
    %c0_104 = arith.constant 0 : index
    %c0_105 = arith.constant 0 : index
    %194 = vector.load %arg5[%c28, %c0_104, %c0_105] : memref<48x32x8xf32, #tpu.memory_space<vmem>>, vector<4x32x8xf32>
    %c32 = arith.constant 32 : index
    %c0_106 = arith.constant 0 : index
    %c0_107 = arith.constant 0 : index
    %195 = vector.load %arg5[%c32, %c0_106, %c0_107] : memref<48x32x8xf32, #tpu.memory_space<vmem>>, vector<4x32x8xf32>
    %c6 = arith.constant 6 : index
    %c0_108 = arith.constant 0 : index
    %c0_109 = arith.constant 0 : index
    %c0_110 = arith.constant 0 : index
    %196 = vector.load %arg6[%c6, %c0_108, %c0_109, %c0_110] : memref<12x4x1x8xf32, #tpu.memory_space<vmem>>, vector<1x4x1x8xf32>
    %197 = vector.shape_cast %196 : vector<1x4x1x8xf32> to vector<4x1x8xf32>
    %c7 = arith.constant 7 : index
    %c0_111 = arith.constant 0 : index
    %c0_112 = arith.constant 0 : index
    %c0_113 = arith.constant 0 : index
    %198 = vector.load %arg6[%c7, %c0_111, %c0_112, %c0_113] : memref<12x4x1x8xf32, #tpu.memory_space<vmem>>, vector<1x4x1x8xf32>
    %199 = vector.shape_cast %198 : vector<1x4x1x8xf32> to vector<4x1x8xf32>
    %c8_114 = arith.constant 8 : index
    %c0_115 = arith.constant 0 : index
    %c0_116 = arith.constant 0 : index
    %c0_117 = arith.constant 0 : index
    %200 = vector.load %arg6[%c8_114, %c0_115, %c0_116, %c0_117] : memref<12x4x1x8xf32, #tpu.memory_space<vmem>>, vector<1x4x1x8xf32>
    %201 = vector.shape_cast %200 : vector<1x4x1x8xf32> to vector<4x1x8xf32>
    %c8_118 = arith.constant 8 : index
    %c0_119 = arith.constant 0 : index
    %c0_120 = arith.constant 0 : index
    %202 = vector.load %arg7[%c8_118, %c0_119, %c0_120] : memref<16x8x32xf32, #tpu.memory_space<vmem>>, vector<4x8x32xf32>
    %203 = vector.shape_cast %187 : vector<8x32xf32> to vector<1x8x32xf32>
    %204 = vector.shape_cast %203 : vector<1x8x32xf32> to vector<1x8x32xf32>
    %205 = vector.broadcast %204 : vector<1x8x32xf32> to vector<4x8x32xf32>
    %206 = vector.shape_cast %187 : vector<8x32xf32> to vector<1x8x32xf32>
    %207 = vector.shape_cast %206 : vector<1x8x32xf32> to vector<1x8x32xf32>
    %208 = vector.broadcast %207 : vector<1x8x32xf32> to vector<4x8x32xf32>
    "tpu.trace_start"() <{level = 10 : i32, message = "hsd,hdf->hsf"}> : () -> ()
    %cst_121 = arith.constant dense<0.000000e+00> : vector<4x8x8xf32>
    %209 = tpu.matmul %205, %193, %cst_121 {dimension_numbers = #tpu.dot_dimension_numbers<[2], [1], [1], [2], [0, 0, 0, 1, 1, 2], [0], [0]>} : vector<4x8x32xf32>, vector<4x32x8xf32>, vector<4x8x8xf32> -> vector<4x8x8xf32>
    "tpu.trace_stop"() : () -> ()
    %210 = vector.broadcast %197 : vector<4x1x8xf32> to vector<4x8x8xf32>
    %211 = arith.addf %209, %210 : vector<4x8x8xf32>
    %cst_122 = arith.constant 0.353553385 : f32
    %212 = vector.broadcast %cst_122 : f32 to vector<4x8x8xf32>
    %213 = arith.mulf %211, %212 : vector<4x8x8xf32>
    "tpu.trace_start"() <{level = 10 : i32, message = "hsd,hdf->hsf"}> : () -> ()
    %cst_123 = arith.constant dense<0.000000e+00> : vector<4x8x8xf32>
    %214 = tpu.matmul %208, %194, %cst_123 {dimension_numbers = #tpu.dot_dimension_numbers<[2], [1], [1], [2], [0, 0, 0, 1, 1, 2], [0], [0]>} : vector<4x8x32xf32>, vector<4x32x8xf32>, vector<4x8x8xf32> -> vector<4x8x8xf32>
    "tpu.trace_stop"() : () -> ()
    %215 = vector.broadcast %199 : vector<4x1x8xf32> to vector<4x8x8xf32>
    %216 = arith.addf %214, %215 : vector<4x8x8xf32>
    "tpu.trace_start"() <{level = 10 : i32, message = "hsd,hdf->hsf"}> : () -> ()
    %cst_124 = arith.constant dense<0.000000e+00> : vector<4x8x8xf32>
    %217 = tpu.matmul %208, %195, %cst_124 {dimension_numbers = #tpu.dot_dimension_numbers<[2], [1], [1], [2], [0, 0, 0, 1, 1, 2], [0], [0]>} : vector<4x8x32xf32>, vector<4x32x8xf32>, vector<4x8x8xf32> -> vector<4x8x8xf32>
    "tpu.trace_stop"() : () -> ()
    %218 = vector.broadcast %201 : vector<4x1x8xf32> to vector<4x8x8xf32>
    %219 = arith.addf %217, %218 : vector<4x8x8xf32>
    "tpu.trace_start"() <{level = 10 : i32, message = "hqd,hkd->hqk"}> : () -> ()
    %cst_125 = arith.constant dense<0.000000e+00> : vector<4x8x8xf32>
    %220 = tpu.matmul %213, %216, %cst_125 {dimension_numbers = #tpu.dot_dimension_numbers<[2], [2], [1], [1], [0, 0, 0, 1, 1, 1], [0], [0]>} : vector<4x8x8xf32>, vector<4x8x8xf32>, vector<4x8x8xf32> -> vector<4x8x8xf32>
    "tpu.trace_stop"() : () -> ()
    %221 = vector.shape_cast %5 : vector<8x8xf32> to vector<1x8x8xf32>
    %222 = vector.broadcast %221 : vector<1x8x8xf32> to vector<4x8x8xf32>
    %223 = arith.addf %220, %222 : vector<4x8x8xf32>
    %cst_126 = arith.constant dense<0xFF800000> : vector<4x8xf32>
    %224 = vector.multi_reduction <maximumf>, %223, %cst_126 [2] : vector<4x8x8xf32> to vector<4x8xf32>
    %225 = vector.shape_cast %224 : vector<4x8xf32> to vector<4x8x1xf32>
    %226 = vector.broadcast %225 : vector<4x8x1xf32> to vector<4x8x8xf32>
    %227 = arith.subf %223, %226 : vector<4x8x8xf32>
    %228 = math.exp %227 : vector<4x8x8xf32>
    %cst_127 = arith.constant dense<0.000000e+00> : vector<4x8xf32>
    %229 = vector.multi_reduction <add>, %228, %cst_127 [2] : vector<4x8x8xf32> to vector<4x8xf32>
    %230 = vector.shape_cast %229 : vector<4x8xf32> to vector<4x8x1xf32>
    %231 = tpu.reciprocal %230 {approx = true} : vector<4x8x1xf32> -> vector<4x8x1xf32>
    %232 = vector.broadcast %231 : vector<4x8x1xf32> to vector<4x8x8xf32>
    %233 = arith.mulf %228, %232 : vector<4x8x8xf32>
    "tpu.trace_start"() <{level = 10 : i32, message = "hqk,hkd->hqd"}> : () -> ()
    %cst_128 = arith.constant dense<0.000000e+00> : vector<4x8x8xf32>
    %234 = tpu.matmul %233, %219, %cst_128 {dimension_numbers = #tpu.dot_dimension_numbers<[2], [1], [1], [2], [0, 0, 0, 1, 1, 2], [0], [0]>} : vector<4x8x8xf32>, vector<4x8x8xf32>, vector<4x8x8xf32> -> vector<4x8x8xf32>
    "tpu.trace_stop"() : () -> ()
    "tpu.trace_start"() <{level = 10 : i32, message = "hqd,hdf->hqf"}> : () -> ()
    %cst_129 = arith.constant dense<0.000000e+00> : vector<4x8x32xf32>
    %235 = tpu.matmul %234, %202, %cst_129 {dimension_numbers = #tpu.dot_dimension_numbers<[2], [1], [1], [2], [0, 0, 0, 1, 1, 2], [0], [0]>} : vector<4x8x8xf32>, vector<4x8x32xf32>, vector<4x8x32xf32> -> vector<4x8x32xf32>
    "tpu.trace_stop"() : () -> ()
    %cst_130 = arith.constant dense<0.000000e+00> : vector<8x32xf32>
    %236 = vector.multi_reduction <add>, %235, %cst_130 [0] : vector<4x8x32xf32> to vector<8x32xf32>
    %237 = vector.broadcast %190 : vector<1x32xf32> to vector<8x32xf32>
    %238 = arith.addf %236, %237 : vector<8x32xf32>
    %239 = arith.addf %238, %187 : vector<8x32xf32>
    %cst_131 = arith.constant dense<0.000000e+00> : vector<8xf32>
    %240 = vector.multi_reduction <add>, %239, %cst_131 [1] : vector<8x32xf32> to vector<8xf32>
    %241 = vector.shape_cast %240 : vector<8xf32> to vector<8x1xf32>
    %cst_132 = arith.constant 3.200000e+01 : f32
    %242 = vector.broadcast %cst_132 : f32 to vector<8x1xf32>
    %243 = arith.divf %241, %242 : vector<8x1xf32>
    %244 = vector.broadcast %243 : vector<8x1xf32> to vector<8x32xf32>
    %245 = arith.subf %239, %244 : vector<8x32xf32>
    %246 = arith.mulf %245, %245 : vector<8x32xf32>
    %cst_133 = arith.constant dense<0.000000e+00> : vector<8xf32>
    %247 = vector.multi_reduction <add>, %246, %cst_133 [1] : vector<8x32xf32> to vector<8xf32>
    %248 = vector.shape_cast %247 : vector<8xf32> to vector<8x1xf32>
    %cst_134 = arith.constant 3.200000e+01 : f32
    %249 = vector.broadcast %cst_134 : f32 to vector<8x1xf32>
    %250 = arith.divf %248, %249 : vector<8x1xf32>
    %cst_135 = arith.constant 9.99999974E-6 : f32
    %251 = vector.broadcast %cst_135 : f32 to vector<8x1xf32>
    %252 = arith.addf %250, %251 : vector<8x1xf32>
    %253 = math.rsqrt %252 : vector<8x1xf32>
    %254 = vector.broadcast %253 : vector<8x1xf32> to vector<8x32xf32>
    %255 = arith.mulf %245, %254 : vector<8x32xf32>
    %256 = vector.broadcast %191 : vector<1x32xf32> to vector<8x32xf32>
    %257 = arith.mulf %255, %256 : vector<8x32xf32>
    %258 = vector.broadcast %192 : vector<1x32xf32> to vector<8x32xf32>
    %259 = arith.addf %257, %258 : vector<8x32xf32>
    %260 = vector.extract_strided_slice %189 {offsets = [3, 0], sizes = [1, 32], strides = [1, 1]} : vector<9x32xf32> to vector<1x32xf32>
    %261 = vector.extract_strided_slice %189 {offsets = [4, 0], sizes = [1, 32], strides = [1, 1]} : vector<9x32xf32> to vector<1x32xf32>
    %262 = vector.extract_strided_slice %189 {offsets = [5, 0], sizes = [1, 32], strides = [1, 1]} : vector<9x32xf32> to vector<1x32xf32>
    %c36 = arith.constant 36 : index
    %c0_136 = arith.constant 0 : index
    %c0_137 = arith.constant 0 : index
    %263 = vector.load %arg5[%c36, %c0_136, %c0_137] : memref<48x32x8xf32, #tpu.memory_space<vmem>>, vector<4x32x8xf32>
    %c40 = arith.constant 40 : index
    %c0_138 = arith.constant 0 : index
    %c0_139 = arith.constant 0 : index
    %264 = vector.load %arg5[%c40, %c0_138, %c0_139] : memref<48x32x8xf32, #tpu.memory_space<vmem>>, vector<4x32x8xf32>
    %c44 = arith.constant 44 : index
    %c0_140 = arith.constant 0 : index
    %c0_141 = arith.constant 0 : index
    %265 = vector.load %arg5[%c44, %c0_140, %c0_141] : memref<48x32x8xf32, #tpu.memory_space<vmem>>, vector<4x32x8xf32>
    %c9 = arith.constant 9 : index
    %c0_142 = arith.constant 0 : index
    %c0_143 = arith.constant 0 : index
    %c0_144 = arith.constant 0 : index
    %266 = vector.load %arg6[%c9, %c0_142, %c0_143, %c0_144] : memref<12x4x1x8xf32, #tpu.memory_space<vmem>>, vector<1x4x1x8xf32>
    %267 = vector.shape_cast %266 : vector<1x4x1x8xf32> to vector<4x1x8xf32>
    %c10 = arith.constant 10 : index
    %c0_145 = arith.constant 0 : index
    %c0_146 = arith.constant 0 : index
    %c0_147 = arith.constant 0 : index
    %268 = vector.load %arg6[%c10, %c0_145, %c0_146, %c0_147] : memref<12x4x1x8xf32, #tpu.memory_space<vmem>>, vector<1x4x1x8xf32>
    %269 = vector.shape_cast %268 : vector<1x4x1x8xf32> to vector<4x1x8xf32>
    %c11 = arith.constant 11 : index
    %c0_148 = arith.constant 0 : index
    %c0_149 = arith.constant 0 : index
    %c0_150 = arith.constant 0 : index
    %270 = vector.load %arg6[%c11, %c0_148, %c0_149, %c0_150] : memref<12x4x1x8xf32, #tpu.memory_space<vmem>>, vector<1x4x1x8xf32>
    %271 = vector.shape_cast %270 : vector<1x4x1x8xf32> to vector<4x1x8xf32>
    %c12_151 = arith.constant 12 : index
    %c0_152 = arith.constant 0 : index
    %c0_153 = arith.constant 0 : index
    %272 = vector.load %arg7[%c12_151, %c0_152, %c0_153] : memref<16x8x32xf32, #tpu.memory_space<vmem>>, vector<4x8x32xf32>
    %273 = vector.shape_cast %259 : vector<8x32xf32> to vector<1x8x32xf32>
    %274 = vector.shape_cast %273 : vector<1x8x32xf32> to vector<1x8x32xf32>
    %275 = vector.broadcast %274 : vector<1x8x32xf32> to vector<4x8x32xf32>
    %276 = vector.shape_cast %3 : vector<8x32xf32> to vector<1x8x32xf32>
    %277 = vector.shape_cast %276 : vector<1x8x32xf32> to vector<1x8x32xf32>
    %278 = vector.broadcast %277 : vector<1x8x32xf32> to vector<4x8x32xf32>
    "tpu.trace_start"() <{level = 10 : i32, message = "hsd,hdf->hsf"}> : () -> ()
    %cst_154 = arith.constant dense<0.000000e+00> : vector<4x8x8xf32>
    %279 = tpu.matmul %275, %263, %cst_154 {dimension_numbers = #tpu.dot_dimension_numbers<[2], [1], [1], [2], [0, 0, 0, 1, 1, 2], [0], [0]>} : vector<4x8x32xf32>, vector<4x32x8xf32>, vector<4x8x8xf32> -> vector<4x8x8xf32>
    "tpu.trace_stop"() : () -> ()
    %280 = vector.broadcast %267 : vector<4x1x8xf32> to vector<4x8x8xf32>
    %281 = arith.addf %279, %280 : vector<4x8x8xf32>
    %cst_155 = arith.constant 0.353553385 : f32
    %282 = vector.broadcast %cst_155 : f32 to vector<4x8x8xf32>
    %283 = arith.mulf %281, %282 : vector<4x8x8xf32>
    "tpu.trace_start"() <{level = 10 : i32, message = "hsd,hdf->hsf"}> : () -> ()
    %cst_156 = arith.constant dense<0.000000e+00> : vector<4x8x8xf32>
    %284 = tpu.matmul %278, %264, %cst_156 {dimension_numbers = #tpu.dot_dimension_numbers<[2], [1], [1], [2], [0, 0, 0, 1, 1, 2], [0], [0]>} : vector<4x8x32xf32>, vector<4x32x8xf32>, vector<4x8x8xf32> -> vector<4x8x8xf32>
    "tpu.trace_stop"() : () -> ()
    %285 = vector.broadcast %269 : vector<4x1x8xf32> to vector<4x8x8xf32>
    %286 = arith.addf %284, %285 : vector<4x8x8xf32>
    "tpu.trace_start"() <{level = 10 : i32, message = "hsd,hdf->hsf"}> : () -> ()
    %cst_157 = arith.constant dense<0.000000e+00> : vector<4x8x8xf32>
    %287 = tpu.matmul %278, %265, %cst_157 {dimension_numbers = #tpu.dot_dimension_numbers<[2], [1], [1], [2], [0, 0, 0, 1, 1, 2], [0], [0]>} : vector<4x8x32xf32>, vector<4x32x8xf32>, vector<4x8x8xf32> -> vector<4x8x8xf32>
    "tpu.trace_stop"() : () -> ()
    %288 = vector.broadcast %271 : vector<4x1x8xf32> to vector<4x8x8xf32>
    %289 = arith.addf %287, %288 : vector<4x8x8xf32>
    "tpu.trace_start"() <{level = 10 : i32, message = "hqd,hkd->hqk"}> : () -> ()
    %cst_158 = arith.constant dense<0.000000e+00> : vector<4x8x8xf32>
    %290 = tpu.matmul %283, %286, %cst_158 {dimension_numbers = #tpu.dot_dimension_numbers<[2], [2], [1], [1], [0, 0, 0, 1, 1, 1], [0], [0]>} : vector<4x8x8xf32>, vector<4x8x8xf32>, vector<4x8x8xf32> -> vector<4x8x8xf32>
    "tpu.trace_stop"() : () -> ()
    %291 = vector.shape_cast %7 : vector<8x8xf32> to vector<1x8x8xf32>
    %292 = vector.broadcast %291 : vector<1x8x8xf32> to vector<4x8x8xf32>
    %293 = arith.addf %290, %292 : vector<4x8x8xf32>
    %cst_159 = arith.constant dense<0xFF800000> : vector<4x8xf32>
    %294 = vector.multi_reduction <maximumf>, %293, %cst_159 [2] : vector<4x8x8xf32> to vector<4x8xf32>
    %295 = vector.shape_cast %294 : vector<4x8xf32> to vector<4x8x1xf32>
    %296 = vector.broadcast %295 : vector<4x8x1xf32> to vector<4x8x8xf32>
    %297 = arith.subf %293, %296 : vector<4x8x8xf32>
    %298 = math.exp %297 : vector<4x8x8xf32>
    %cst_160 = arith.constant dense<0.000000e+00> : vector<4x8xf32>
    %299 = vector.multi_reduction <add>, %298, %cst_160 [2] : vector<4x8x8xf32> to vector<4x8xf32>
    %300 = vector.shape_cast %299 : vector<4x8xf32> to vector<4x8x1xf32>
    %301 = tpu.reciprocal %300 {approx = true} : vector<4x8x1xf32> -> vector<4x8x1xf32>
    %302 = vector.broadcast %301 : vector<4x8x1xf32> to vector<4x8x8xf32>
    %303 = arith.mulf %298, %302 : vector<4x8x8xf32>
    "tpu.trace_start"() <{level = 10 : i32, message = "hqk,hkd->hqd"}> : () -> ()
    %cst_161 = arith.constant dense<0.000000e+00> : vector<4x8x8xf32>
    %304 = tpu.matmul %303, %289, %cst_161 {dimension_numbers = #tpu.dot_dimension_numbers<[2], [1], [1], [2], [0, 0, 0, 1, 1, 2], [0], [0]>} : vector<4x8x8xf32>, vector<4x8x8xf32>, vector<4x8x8xf32> -> vector<4x8x8xf32>
    "tpu.trace_stop"() : () -> ()
    "tpu.trace_start"() <{level = 10 : i32, message = "hqd,hdf->hqf"}> : () -> ()
    %cst_162 = arith.constant dense<0.000000e+00> : vector<4x8x32xf32>
    %305 = tpu.matmul %304, %272, %cst_162 {dimension_numbers = #tpu.dot_dimension_numbers<[2], [1], [1], [2], [0, 0, 0, 1, 1, 2], [0], [0]>} : vector<4x8x8xf32>, vector<4x8x32xf32>, vector<4x8x32xf32> -> vector<4x8x32xf32>
    "tpu.trace_stop"() : () -> ()
    %cst_163 = arith.constant dense<0.000000e+00> : vector<8x32xf32>
    %306 = vector.multi_reduction <add>, %305, %cst_163 [0] : vector<4x8x32xf32> to vector<8x32xf32>
    %307 = vector.broadcast %260 : vector<1x32xf32> to vector<8x32xf32>
    %308 = arith.addf %306, %307 : vector<8x32xf32>
    %309 = arith.addf %308, %259 : vector<8x32xf32>
    %cst_164 = arith.constant dense<0.000000e+00> : vector<8xf32>
    %310 = vector.multi_reduction <add>, %309, %cst_164 [1] : vector<8x32xf32> to vector<8xf32>
    %311 = vector.shape_cast %310 : vector<8xf32> to vector<8x1xf32>
    %cst_165 = arith.constant 3.200000e+01 : f32
    %312 = vector.broadcast %cst_165 : f32 to vector<8x1xf32>
    %313 = arith.divf %311, %312 : vector<8x1xf32>
    %314 = vector.broadcast %313 : vector<8x1xf32> to vector<8x32xf32>
    %315 = arith.subf %309, %314 : vector<8x32xf32>
    %316 = arith.mulf %315, %315 : vector<8x32xf32>
    %cst_166 = arith.constant dense<0.000000e+00> : vector<8xf32>
    %317 = vector.multi_reduction <add>, %316, %cst_166 [1] : vector<8x32xf32> to vector<8xf32>
    %318 = vector.shape_cast %317 : vector<8xf32> to vector<8x1xf32>
    %cst_167 = arith.constant 3.200000e+01 : f32
    %319 = vector.broadcast %cst_167 : f32 to vector<8x1xf32>
    %320 = arith.divf %318, %319 : vector<8x1xf32>
    %cst_168 = arith.constant 9.99999974E-6 : f32
    %321 = vector.broadcast %cst_168 : f32 to vector<8x1xf32>
    %322 = arith.addf %320, %321 : vector<8x1xf32>
    %323 = math.rsqrt %322 : vector<8x1xf32>
    %324 = vector.broadcast %323 : vector<8x1xf32> to vector<8x32xf32>
    %325 = arith.mulf %315, %324 : vector<8x32xf32>
    %326 = vector.broadcast %261 : vector<1x32xf32> to vector<8x32xf32>
    %327 = arith.mulf %325, %326 : vector<8x32xf32>
    %328 = vector.broadcast %262 : vector<1x32xf32> to vector<8x32xf32>
    %329 = arith.addf %327, %328 : vector<8x32xf32>
    %c1_169 = arith.constant 1 : index
    %c0_170 = arith.constant 0 : index
    %c0_171 = arith.constant 0 : index
    %330 = vector.load %arg9[%c1_169, %c0_170, %c0_171] : memref<2x32x64xf32, #tpu.memory_space<vmem>>, vector<1x32x64xf32>
    %331 = vector.shape_cast %330 : vector<1x32x64xf32> to vector<32x64xf32>
    %cst_172 = arith.constant dense<0.000000e+00> : vector<8x64xf32>
    %332 = tpu.matmul %329, %331, %cst_172 {dimension_numbers = #tpu.dot_dimension_numbers<[1], [0], [0], [1], [0, 0, 1, 1], [], []>} : vector<8x32xf32>, vector<32x64xf32>, vector<8x64xf32> -> vector<8x64xf32>
    %c1_173 = arith.constant 1 : index
    %c0_174 = arith.constant 0 : index
    %c0_175 = arith.constant 0 : index
    %333 = vector.load %arg10[%c1_173, %c0_174, %c0_175] : memref<2x1x64xf32, #tpu.memory_space<vmem>>, vector<1x1x64xf32>
    %334 = vector.shape_cast %333 : vector<1x1x64xf32> to vector<1x64xf32>
    %335 = vector.broadcast %334 : vector<1x64xf32> to vector<8x64xf32>
    %336 = arith.addf %332, %335 : vector<8x64xf32>
    %cst_176 = arith.constant 0.000000e+00 : f32
    %337 = vector.broadcast %cst_176 : f32 to vector<8x64xf32>
    %338 = arith.maximumf %336, %337 : vector<8x64xf32>
    %c1_177 = arith.constant 1 : index
    %c0_178 = arith.constant 0 : index
    %c0_179 = arith.constant 0 : index
    %339 = vector.load %arg11[%c1_177, %c0_178, %c0_179] : memref<2x64x32xf32, #tpu.memory_space<vmem>>, vector<1x64x32xf32>
    %340 = vector.shape_cast %339 : vector<1x64x32xf32> to vector<64x32xf32>
    %cst_180 = arith.constant dense<0.000000e+00> : vector<8x32xf32>
    %341 = tpu.matmul %338, %340, %cst_180 {dimension_numbers = #tpu.dot_dimension_numbers<[1], [0], [0], [1], [0, 0, 1, 1], [], []>} : vector<8x64xf32>, vector<64x32xf32>, vector<8x32xf32> -> vector<8x32xf32>
    %342 = vector.extract_strided_slice %189 {offsets = [6, 0], sizes = [1, 32], strides = [1, 1]} : vector<9x32xf32> to vector<1x32xf32>
    %343 = vector.broadcast %342 : vector<1x32xf32> to vector<8x32xf32>
    %344 = arith.addf %341, %343 : vector<8x32xf32>
    %345 = arith.addf %344, %329 : vector<8x32xf32>
    %346 = vector.extract_strided_slice %189 {offsets = [7, 0], sizes = [1, 32], strides = [1, 1]} : vector<9x32xf32> to vector<1x32xf32>
    %347 = vector.extract_strided_slice %189 {offsets = [8, 0], sizes = [1, 32], strides = [1, 1]} : vector<9x32xf32> to vector<1x32xf32>
    %cst_181 = arith.constant dense<0.000000e+00> : vector<8xf32>
    %348 = vector.multi_reduction <add>, %345, %cst_181 [1] : vector<8x32xf32> to vector<8xf32>
    %349 = vector.shape_cast %348 : vector<8xf32> to vector<8x1xf32>
    %cst_182 = arith.constant 3.200000e+01 : f32
    %350 = vector.broadcast %cst_182 : f32 to vector<8x1xf32>
    %351 = arith.divf %349, %350 : vector<8x1xf32>
    %352 = vector.broadcast %351 : vector<8x1xf32> to vector<8x32xf32>
    %353 = arith.subf %345, %352 : vector<8x32xf32>
    %354 = arith.mulf %353, %353 : vector<8x32xf32>
    %cst_183 = arith.constant dense<0.000000e+00> : vector<8xf32>
    %355 = vector.multi_reduction <add>, %354, %cst_183 [1] : vector<8x32xf32> to vector<8xf32>
    %356 = vector.shape_cast %355 : vector<8xf32> to vector<8x1xf32>
    %cst_184 = arith.constant 3.200000e+01 : f32
    %357 = vector.broadcast %cst_184 : f32 to vector<8x1xf32>
    %358 = arith.divf %356, %357 : vector<8x1xf32>
    %cst_185 = arith.constant 9.99999974E-6 : f32
    %359 = vector.broadcast %cst_185 : f32 to vector<8x1xf32>
    %360 = arith.addf %358, %359 : vector<8x1xf32>
    %361 = math.rsqrt %360 : vector<8x1xf32>
    %362 = vector.broadcast %361 : vector<8x1xf32> to vector<8x32xf32>
    %363 = arith.mulf %353, %362 : vector<8x32xf32>
    %364 = vector.broadcast %346 : vector<1x32xf32> to vector<8x32xf32>
    %365 = arith.mulf %363, %364 : vector<8x32xf32>
    %366 = vector.broadcast %347 : vector<1x32xf32> to vector<8x32xf32>
    %367 = arith.addf %365, %366 : vector<8x32xf32>
    %c0_186 = arith.constant 0 : index
    %c0_187 = arith.constant 0 : index
    %368 = vector.load %arg12[%c0_186, %c0_187] : memref<32x128xf32, #tpu.memory_space<vmem>>, vector<32x128xf32>
    %cst_188 = arith.constant dense<0.000000e+00> : vector<8x128xf32>
    %369 = tpu.matmul %367, %368, %cst_188 {dimension_numbers = #tpu.dot_dimension_numbers<[1], [0], [0], [1], [0, 0, 1, 1], [], []>} : vector<8x32xf32>, vector<32x128xf32>, vector<8x128xf32> -> vector<8x128xf32>
    %c0_189 = arith.constant 0 : index
    %c0_190 = arith.constant 0 : index
    %370 = vector.load %arg13[%c0_189, %c0_190] : memref<1x128xf32, #tpu.memory_space<vmem>>, vector<1x128xf32>
    %371 = vector.broadcast %370 : vector<1x128xf32> to vector<8x128xf32>
    %372 = arith.addf %369, %371 : vector<8x128xf32>
    %c0_191 = arith.constant 0 : index
    %c0_192 = arith.constant 0 : index
    %c0_193 = arith.constant 0 : index
    %373 = vector.load %arg14[%c0_191, %c0_192, %c0_193] : memref<1x8x128xf32, #tpu.memory_space<vmem>>, vector<1x8x128xf32>
    %374 = vector.shape_cast %373 : vector<1x8x128xf32> to vector<8x128xf32>
    %375 = vector.shape_cast %372 : vector<8x128xf32> to vector<1x8x128xf32>
    tpu.vector_store %arg14[%c0_191, %c0_192, %c0_193], %375 {strides = array<i32>} : memref<1x8x128xf32, #tpu.memory_space<vmem>>, vector<1x8x128xf32>,
    return
  }
  func.func @transform_0(%arg0: i32) -> (i32, i32, i32) {
    %c0_i32 = arith.constant 0 : i32
    %c0_i32_0 = arith.constant 0 : i32
    %c0_i32_1 = arith.constant 0 : i32
    return %arg0, %c0_i32, %c0_i32_0 : i32, i32, i32
  }
  func.func @transform_1(%arg0: i32) -> (i32, i32, i32) {
    %c0_i32 = arith.constant 0 : i32
    %c0_i32_0 = arith.constant 0 : i32
    %c0_i32_1 = arith.constant 0 : i32
    return %arg0, %c0_i32, %c0_i32_0 : i32, i32, i32
  }
  func.func @transform_2(%arg0: i32) -> (i32, i32, i32) {
    %c0_i32 = arith.constant 0 : i32
    %c0_i32_0 = arith.constant 0 : i32
    %c0_i32_1 = arith.constant 0 : i32
    return %arg0, %c0_i32, %c0_i32_0 : i32, i32, i32
  }
  func.func @transform_3(%arg0: i32) -> (i32, i32, i32) {
    %c0_i32 = arith.constant 0 : i32
    %c0_i32_0 = arith.constant 0 : i32
    %c0_i32_1 = arith.constant 0 : i32
    return %arg0, %c0_i32, %c0_i32_0 : i32, i32, i32
  }
  func.func @transform_4(%arg0: i32) -> (i32, i32, i32) {
    %c0_i32 = arith.constant 0 : i32
    %c0_i32_0 = arith.constant 0 : i32
    %c0_i32_1 = arith.constant 0 : i32
    %c0_i32_2 = arith.constant 0 : i32
    return %c0_i32, %c0_i32_0, %c0_i32_1 : i32, i32, i32
  }
  func.func @transform_5(%arg0: i32) -> (i32, i32, i32, i32) {
    %c0_i32 = arith.constant 0 : i32
    %c0_i32_0 = arith.constant 0 : i32
    %c0_i32_1 = arith.constant 0 : i32
    %c0_i32_2 = arith.constant 0 : i32
    %c0_i32_3 = arith.constant 0 : i32
    return %c0_i32, %c0_i32_0, %c0_i32_1, %c0_i32_2 : i32, i32, i32, i32
  }
  func.func @transform_6(%arg0: i32) -> (i32, i32, i32) {
    %c0_i32 = arith.constant 0 : i32
    %c0_i32_0 = arith.constant 0 : i32
    %c0_i32_1 = arith.constant 0 : i32
    %c0_i32_2 = arith.constant 0 : i32
    return %c0_i32, %c0_i32_0, %c0_i32_1 : i32, i32, i32
  }
  func.func @transform_7(%arg0: i32) -> (i32, i32, i32) {
    %c0_i32 = arith.constant 0 : i32
    %c0_i32_0 = arith.constant 0 : i32
    %c0_i32_1 = arith.constant 0 : i32
    %c0_i32_2 = arith.constant 0 : i32
    return %c0_i32, %c0_i32_0, %c0_i32_1 : i32, i32, i32
  }
  func.func @transform_8(%arg0: i32) -> (i32, i32, i32) {
    %c0_i32 = arith.constant 0 : i32
    %c0_i32_0 = arith.constant 0 : i32
    %c0_i32_1 = arith.constant 0 : i32
    %c0_i32_2 = arith.constant 0 : i32
    return %c0_i32, %c0_i32_0, %c0_i32_1 : i32, i32, i32
  }
  func.func @transform_9(%arg0: i32) -> (i32, i32, i32) {
    %c0_i32 = arith.constant 0 : i32
    %c0_i32_0 = arith.constant 0 : i32
    %c0_i32_1 = arith.constant 0 : i32
    %c0_i32_2 = arith.constant 0 : i32
    return %c0_i32, %c0_i32_0, %c0_i32_1 : i32, i32, i32
  }
  func.func @transform_10(%arg0: i32) -> (i32, i32, i32) {
    %c0_i32 = arith.constant 0 : i32
    %c0_i32_0 = arith.constant 0 : i32
    %c0_i32_1 = arith.constant 0 : i32
    %c0_i32_2 = arith.constant 0 : i32
    return %c0_i32, %c0_i32_0, %c0_i32_1 : i32, i32, i32
  }
  func.func @transform_11(%arg0: i32) -> (i32, i32) {
    %c0_i32 = arith.constant 0 : i32
    %c0_i32_0 = arith.constant 0 : i32
    %c0_i32_1 = arith.constant 0 : i32
    return %c0_i32, %c0_i32_0 : i32, i32
  }
  func.func @transform_12(%arg0: i32) -> (i32, i32) {
    %c0_i32 = arith.constant 0 : i32
    %c0_i32_0 = arith.constant 0 : i32
    %c0_i32_1 = arith.constant 0 : i32
    return %c0_i32, %c0_i32_0 : i32, i32
  }
  func.func @transform_13(%arg0: i32) -> (i32, i32, i32) {
    %c0_i32 = arith.constant 0 : i32
    %c0_i32_0 = arith.constant 0 : i32
    %c0_i32_1 = arith.constant 0 : i32
    return %arg0, %c0_i32, %c0_i32_0 : i32, i32, i32
  }
}

</mosaic_0001>

<bundles_post_ra>
// kernel: decoder_forward.1
= control target key start
LH: loop header
LB: loop body
LE: loop exit
PB: predicated region body
PF: predicated region fallthrough
CT: control target
= control target key end

     0   :  { %s12600_s0 = inlined_call_operand.vmem [shape: f32[2,8,32], index: 0, kind: input, shape index: {}]   ;;  %s12601_s1 = inlined_call_operand.vmem [shape: f32[2,8,32], index: 1, kind: input, shape index: {}]   ;;  %s12602_s2 = inlined_call_operand.vmem [shape: f32[2,8,8], index: 2, kind: input, shape index: {}]   ;;  %s12603_s3 = inlined_call_operand.vmem [shape: f32[2,8,8], index: 3, kind: input, shape index: {}]   ;;  %s12604_s4 = inlined_call_operand.vmem [shape: f32[48,32,8], index: 4, kind: input, shape index: {}]   ;;  %s12605_s5 = inlined_call_operand.vmem [shape: f32[12,4,1,8], index: 5, kind: input, shape index: {}]   ;;  %s12606_s6 = inlined_call_operand.vmem [shape: f32[16,8,32], index: 6, kind: input, shape index: {}]   ;;  %s12607_s7 = inlined_call_operand.vmem [shape: f32[2,9,32], index: 7, kind: input, shape index: {}]   ;;  %s12608_s8 = inlined_call_operand.vmem [shape: f32[2,32,64], index: 8, kind: input, shape index: {}]   ;;  %s12609_s9 = inlined_call_operand.vmem [shape: f32[2,1,64], index: 9, kind: input, shape index: {}]   ;;  %s12610_s10 = inlined_call_operand.vmem [shape: f32[2,64,32], index: 10, kind: input, shape index: {}]   ;;  %s12611_s11 = inlined_call_operand.vmem [shape: f32[32,128], index: 11, kind: input, shape index: {}]   ;;  %s12612_s12 = inlined_call_operand.vmem [shape: f32[1,128], index: 12, kind: input, shape index: {}]   ;;  %s12613_s13 = inlined_call_operand.hbm [shape: f32[2,8,128], index: 13, kind: output, shape index: {}]  }
   0x1   :  { %12614 = sst [smem:[#allocation6_spill]] %s12600_s0 }
   0x2   :  { %12615 = sst [smem:[#allocation7_spill]] %s12601_s1 }
   0x3   :  { %12616 = sst [smem:[#allocation8_spill]] %s12602_s2 }
   0x4   :  { %18 = vsyncpa [#allocation3], 0 }
   0x5   :  { %20 = vsyncpa [#allocation3 + $0x1], 0  ;;  %s10810_s25 = smov 0   ;;  %s10812_s26 = smov 0  }
   0x6   :  { %s10814_s27 = smov 0   ;;  %s10816_s28 = smov 0  }
   0x7 LB: > { %s10831_s29 = sadd.s32 4294967295, %s10735_s28   ;;  %s8917_s30 = sadd.s32 4294967294, %s10735_s28   ;;  %s10735_s28 = sphi %s10816_s28, %s12627_s28   ;;  %s10731_s27 = sphi %s10814_s27, %s12626_s27   ;;  %s10727_s26 = sphi %s10812_s26, %s12625_s26   ;;  %s10723_s25 = sphi %s10810_s25, %s12624_s25  }
   0x8   : > { %s10835_s14 = sadd.s32 1, %s10735_s28   ;;  %s326_s15 = sadd.s32 1, %s10731_s27 }
   0x9   : > { %s323_s16 = ssub.s32 %s10735_s28, %s10835_s14  ;;  %p336_p0 = scmp.ne.s32.totalorder %s10731_s27, %s10727_s26 }
   0xa   : > { %p324_p1 = scmp.eq.s32.totalorder %s323_s16, 0  ;;  %p337_p2 = scmp.eq.s32.totalorder %s10831_s29, 1 }
   0xb   : > { %p342_p3 = scmp.ne.s32.totalorder %s10727_s26, %s10723_s25  ;;  %p343_p4 = scmp.eq.s32.totalorder %s8917_s30, 1 }
   0xc   : > { %s10846_s17 = scalar_select %p324_p1, %s10731_s27, %s326_s15  }
   0xd   : > { %p10848_p5 = por %p337_p2, %p336_p0  ;;  %p10852_p6 = por %p343_p4, %p342_p3 }
   0xe   : > { %12617 = sst [smem:[#allocation5_spill]] %s10846_s17  ;;  %p8920_p7 = scmp.ge.s32.totalorder %s10735_s28, 1 }
   0xf   : > { %p416_p8 = scmp.lt.s32.totalorder %s10735_s28, 3 }
  0x11   : > { %p417_p9 = pnand %p8920_p7, %p416_p8 }
  0x12   : > { %p471_p10 = scmp.lt.s32.totalorder (!%p417_p9), %s10831_s29, 1  ;;  %s12620_s0 = sld [smem:[#allocation6_spill]] (!%p417_p9) }
  0x13   : > { %420 = sbr.rel (%p417_p9) target bundleno = 7407 (0x1cef), region = 72  ;;  %s12621_s2 = sld [smem:[#allocation8_spill]] (!%p417_p9) }
  0x14   : > { %s12622_s1 = sld [smem:[#allocation7_spill]] (!%p417_p9)  ;;  %s10739_s21 = smov (!%p417_p9), [#allocation2]  }
  0x18   : > { %v496_v0 = vld [vmem:[%s12604_s4 + $0x18] sm:$0xff]  ;;  %v10737_v2 = vmov 0.0   ;;  %v495_v3 = vld [vmem:[%s12604_s4 + $0x10] sm:$0xff]  ;;  %s472_s20 = scalar_select %p471_p10, %s10831_s29, 1  ;;  %v494_v5 = vld [vmem:[%s12604_s4 + $0x8] sm:$0xff]  ;;  %vm585_vm0 = vcmask 261120  }
  0x19   : > { %v500_v1 = vld [vmem:[%s12604_s4 + $0x38] sm:$0xff]  ;;  %9716 = vmatprep.subr.mxu0 %v10737_v2  ;;  %9727 = vmatprep.subr.mxu1 %v10737_v2  ;;  %v499_v4 = vld [vmem:[%s12604_s4 + $0x30] sm:$0xff]  ;;  %v498_v6 = vld [vmem:[%s12604_s4 + $0x28] sm:$0xff]  ;;  %vm10738_vm1 = vmmov 0   ;;  %vm1481_vm2 = vcmask 64512   ;;  %vm4509_vm3 = vcmask 523264  }
  0x1a   : > { %9717 = vmatpush3.msra.mxu0 %v496_v0  ;;  %9728 = vmatpush3.msra.mxu1 %v500_v1  ;;  %s10882_s24 = sshll.u32 %s472_s20, 3  ;;  %v493_v7 = vld [vmem:[%s12604_s4] sm:$0xff]  ;;  %v504_v10 = vld [vmem:[%s12604_s4 + $0x58] sm:$0xff]  ;;  %v503_v12 = vld [vmem:[%s12604_s4 + $0x50] sm:$0xff] }
  0x1b   : > { %9718 = vmatprep.subr.mxu0 %v10737_v2  ;;  %9729 = vmatprep.subr.mxu1 %v10737_v2  ;;  %s474_s22 = scalar_lea.vmem %s12620_s0, %s10882_s24  ;;  %v497_v8 = vld [vmem:[%s12604_s4 + $0x20] sm:$0xff]  ;;  %v508_v11 = vld [vmem:[%s12604_s4 + $0x78] sm:$0xff]  ;;  %v507_v13 = vld [vmem:[%s12604_s4 + $0x70] sm:$0xff]  ;;  %s11174_s17 = scalar_lea.vmem %s12621_s2, %s10882_s24 }
  0x1c   : > { %9719 = vmatpush3.msra.mxu0 %v495_v3  ;;  %9730 = vmatpush3.msra.mxu1 %v499_v4  ;;  %v10896_v9 = vld [vmem:[%s474_s22] sm:$0xff]  ;;  %v502_v14 = vld [vmem:[%s12604_s4 + $0x48] sm:$0xff]  ;;  %v8929_v18 = vld [vmem:[%s12604_s4 + $0x98] sm:$0xff]  ;;  %s11363_s2 = scalar_lea.vmem %s12622_s1, %s10882_s24  ;;  %s11572_s23 = scalar_lea.vmem %s12603_s3, %s10882_s24 }
  0x1d   : > { %9720 = vmatprep.subr.mxu0 %v10737_v2  ;;  %9731 = vmatprep.subr.mxu1 %v10737_v2  ;;  %v506_v15 = vld [vmem:[%s12604_s4 + $0x68] sm:$0xff]  ;;  %v501_v16 = vld [vmem:[%s12604_s4 + $0x40] sm:$0xff]  ;;  %v8933_v19 = vld [vmem:[%s12604_s4 + $0xb8] sm:$0xff]  ;;  %s9344_s22 = sshll.u32 %s10831_s29, 7  ;;  %s10679_s29 = sshll.u32 %s10739_s21, 4  ;;  %s10680_s29 = int_to_ptr.vmem [resolvable:$false] %s10679_s29 }
  0x1e   : > { %9721 = vmatpush3.msra.mxu0 %v494_v5  ;;  %9732 = vmatpush3.msra.mxu1 %v498_v6  ;;  %v505_v17 = vld [vmem:[%s12604_s4 + $0x60] sm:$0xff]  ;;  %v8928_v20 = vld [vmem:[%s12604_s4 + $0x90] sm:$0xff]  ;;  %v8927_v22 = vld [vmem:[%s12604_s4 + $0x88] sm:$0xff]  ;;  %s12565_s30 = scalar_lea.hbm %s12613_s13, %s9344_s22 }
  0x1f   : > { %9722 = vmatprep.subr.mxu0 %v10737_v2  ;;  %9733 = vmatprep.subr.mxu1 %v10737_v2  ;;  %v8932_v21 = vld [vmem:[%s12604_s4 + $0xb0] sm:$0xff]  ;;  %v8931_v23 = vld [vmem:[%s12604_s4 + $0xa8] sm:$0xff]  ;;  %v8926_v24 = vld [vmem:[%s12604_s4 + $0x80] sm:$0xff] }
  0x20   : > { %9723 = vmatpush3.msra.mxu0 %v493_v7  ;;  %9724 = vmatprep.mubr.msk.f32.mxu0 %vm10738_vm1, %v10737_v2  ;;  %v8930_v25 = vld [vmem:[%s12604_s4 + $0xa0] sm:$0xff]  ;;  %v8937_v26 = vld [vmem:[%s12604_s4 + $0xd8] sm:$0xff]  ;;  %v8936_v28 = vld [vmem:[%s12604_s4 + $0xd0] sm:$0xff] }
  0x21   : > { %9734 = vmatpush3.msra.mxu1 %v497_v8  ;;  %9725 = vmatmul.mubr.msk.f32.vlgmr.msra.gmra.mxu0 %vm585_vm0, %v10896_v9  ;;  %v8941_v27 = vld [vmem:[%s12604_s4 + $0xf8] sm:$0xff]  ;;  %v8940_v29 = vld [vmem:[%s12604_s4 + $0xf0] sm:$0xff]  ;;  %v8935_v30 = vld [vmem:[%s12604_s4 + $0xc8] sm:$0xff] }
  0x22   : > { %9735 = vmatprep.mubr.msk.f32.mxu1 %vm10738_vm1, %v10737_v2  ;;  %9738 = vmatprep.subr.mxu0 %v10737_v2  ;;  %v8939_v31 = vld [vmem:[%s12604_s4 + $0xe8] sm:$0xff]  ;;  %v8934_v32 = vld [vmem:[%s12604_s4 + $0xc0] sm:$0xff]  ;;  %v8945_v34 = vld [vmem:[%s12604_s4 + $0x118] sm:$0xff] }
  0x23   : > { %9749 = vmatprep.subr.mxu1 %v10737_v2  ;;  %9736 = vmatmul.mubr.msk.f32.vlgmr.msra.gmra.mxu1 %vm585_vm0, %v10896_v9  ;;  %v8938_v33 = vld [vmem:[%s12604_s4 + $0xe0] sm:$0xff]  ;;  %v8949_v35 = vld [vmem:[%s12604_s4 + $0x138] sm:$0xff]  ;;  %v8944_v36 = vld [vmem:[%s12604_s4 + $0x110] sm:$0xff] }
  0x24   : > { %9739 = vmatpush3.msra.mxu0 %v504_v10  ;;  %9750 = vmatpush3.msra.mxu1 %v508_v11  ;;  %v8948_v37 = vld [vmem:[%s12604_s4 + $0x130] sm:$0xff]  ;;  %v8943_v38 = vld [vmem:[%s12604_s4 + $0x108] sm:$0xff]  ;;  %v8942_v40 = vld [vmem:[%s12604_s4 + $0x100] sm:$0xff] }
  0x25   : > { %9740 = vmatprep.subr.mxu0 %v10737_v2  ;;  %9751 = vmatprep.subr.mxu1 %v10737_v2  ;;  %v8947_v39 = vld [vmem:[%s12604_s4 + $0x128] sm:$0xff]  ;;  %v8946_v41 = vld [vmem:[%s12604_s4 + $0x120] sm:$0xff]  ;;  %v8953_v42 = vld [vmem:[%s12604_s4 + $0x158] sm:$0xff] }
  0x26   : > { %9741 = vmatpush3.msra.mxu0 %v503_v12  ;;  %9752 = vmatpush3.msra.mxu1 %v507_v13  ;;  %v8957_v43 = vld [vmem:[%s12604_s4 + $0x178] sm:$0xff]  ;;  %v8952_v44 = vld [vmem:[%s12604_s4 + $0x150] sm:$0xff]  ;;  %v8951_v46 = vld [vmem:[%s12604_s4 + $0x148] sm:$0xff] }
  0x27   : > { %9742 = vmatprep.subr.mxu0 %v10737_v2  ;;  %9753 = vmatprep.subr.mxu1 %v10737_v2  ;;  %v8956_v45 = vld [vmem:[%s12604_s4 + $0x170] sm:$0xff]  ;;  %v8955_v47 = vld [vmem:[%s12604_s4 + $0x168] sm:$0xff]  ;;  %v8950_v48 = vld [vmem:[%s12604_s4 + $0x140] sm:$0xff] }
  0x28   : > { %9743 = vmatpush3.msra.mxu0 %v502_v14  ;;  %9754 = vmatpush3.msra.mxu1 %v506_v15  ;;  %v8954_v49 = vld [vmem:[%s12604_s4 + $0x160] sm:$0xff] }
  0x29   : > { %9744 = vmatprep.subr.mxu0 %v10737_v2  ;;  %9755 = vmatprep.subr.mxu1 %v10737_v2  ;;  %v8966_v58 = vld [vmem:[%s12605_s5] ss:$0 sm:$0xff]  ;;  %v8967_v59 = vld [vmem:[%s12605_s5 + $0x1] ss:$0 sm:$0xff]  ;;  %v8974_v60 = vld [vmem:[%s12605_s5 + $0x4] ss:$0 sm:$0xff] }
  0x2a   : > { %9745 = vmatpush3.msra.mxu0 %v501_v16  ;;  %9746 = vmatprep.mubr.msk.f32.mxu0 %vm10738_vm1, %v10737_v2  ;;  %v8975_v61 = vld [vmem:[%s12605_s5 + $0x5] ss:$0 sm:$0xff]  ;;  %v8968_v10 = vld [vmem:[%s12605_s5 + $0x2] ss:$0 sm:$0xff]  ;;  %v8969_v11 = vld [vmem:[%s12605_s5 + $0x3] ss:$0 sm:$0xff] }
  0x2b   : > { %9756 = vmatpush3.msra.mxu1 %v505_v17  ;;  %9747 = vmatmul.mubr.msk.f32.vlgmr.msra.gmra.mxu0 %vm585_vm0, %v10896_v9  ;;  %v8976_v12 = vld [vmem:[%s12605_s5 + $0x6] ss:$0 sm:$0xff]  ;;  %v8977_v13 = vld [vmem:[%s12605_s5 + $0x7] ss:$0 sm:$0xff] }
  0x2c   : > { %9757 = vmatprep.mubr.msk.f32.mxu1 %vm10738_vm1, %v10737_v2  ;;  %9760 = vmatprep.subr.mxu0 %v10737_v2 }
  0x2d   : > { %9771 = vmatprep.subr.mxu1 %v10737_v2  ;;  %9758 = vmatmul.mubr.msk.f32.vlgmr.msra.gmra.mxu1 %vm585_vm0, %v10896_v9 }
  0x2e   : > { %9761 = vmatpush3.msra.mxu0 %v8929_v18  ;;  %9772 = vmatpush3.msra.mxu1 %v8933_v19 }
  0x2f   : > { %9762 = vmatprep.subr.mxu0 %v10737_v2  ;;  %9773 = vmatprep.subr.mxu1 %v10737_v2 }
  0x30   : > { %9763 = vmatpush3.msra.mxu0 %v8928_v20  ;;  %9774 = vmatpush3.msra.mxu1 %v8932_v21 }
  0x31   : > { %9764 = vmatprep.subr.mxu0 %v10737_v2  ;;  %9775 = vmatprep.subr.mxu1 %v10737_v2 }
  0x32   : > { %9765 = vmatpush3.msra.mxu0 %v8927_v22  ;;  %9776 = vmatpush3.msra.mxu1 %v8931_v23 }
  0x33   : > { %9766 = vmatprep.subr.mxu0 %v10737_v2  ;;  %9777 = vmatprep.subr.mxu1 %v10737_v2 }
  0x34   : > { %9767 = vmatpush3.msra.mxu0 %v8926_v24  ;;  %9768 = vmatprep.mubr.msk.f32.mxu0 %vm10738_vm1, %v10737_v2  ;;  %v8982_v24 = vld [vmem:[%s12605_s5 + $0x8] ss:$0 sm:$0xff] }
  0x35   : > { %9778 = vmatpush3.msra.mxu1 %v8930_v25  ;;  %9779 = vmatprep.mubr.msk.f32.mxu1 %vm10738_vm1, %v10737_v2  ;;  %v8983_v25 = vld [vmem:[%s12605_s5 + $0x9] ss:$0 sm:$0xff] }
  0x36   : > { %9769 = vmatmul.mubr.msk.f32.vlgmr.msra.gmra.mxu0 %vm585_vm0, %v10896_v9  ;;  %9780 = vmatmul.mubr.msk.f32.vlgmr.msra.gmra.mxu1 %vm585_vm0, %v10896_v9 }
  0x37   : > { %9782 = vmatprep.subr.mxu0 %v10737_v2  ;;  %9793 = vmatprep.subr.mxu1 %v10737_v2 }
  0x38   : > { %9783 = vmatpush3.msra.mxu0 %v8937_v26  ;;  %9794 = vmatpush3.msra.mxu1 %v8941_v27 }
  0x39   : > { %9784 = vmatprep.subr.mxu0 %v10737_v2  ;;  %9795 = vmatprep.subr.mxu1 %v10737_v2 }
  0x3a   : > { %9785 = vmatpush3.msra.mxu0 %v8936_v28  ;;  %9796 = vmatpush3.msra.mxu1 %v8940_v29 }
  0x3b   : > { %9786 = vmatprep.subr.mxu0 %v10737_v2  ;;  %9797 = vmatprep.subr.mxu1 %v10737_v2 }
  0x3c   : > { %9787 = vmatpush3.msra.mxu0 %v8935_v30  ;;  %9798 = vmatpush3.msra.mxu1 %v8939_v31 }
  0x3d   : > { %9788 = vmatprep.subr.mxu0 %v10737_v2  ;;  %9799 = vmatprep.subr.mxu1 %v10737_v2 }
  0x3e   : > { %9789 = vmatpush3.msra.mxu0 %v8934_v32  ;;  %9790 = vmatprep.mubr.msk.f32.mxu0 %vm10738_vm1, %v10737_v2 }
  0x3f   : > { %9800 = vmatpush3.msra.mxu1 %v8938_v33  ;;  %9801 = vmatprep.mubr.msk.f32.mxu1 %vm10738_vm1, %v10737_v2 }
  0x40   : > { %9791 = vmatmul.mubr.msk.f32.vlgmr.msra.gmra.mxu0 %vm585_vm0, %v10896_v9  ;;  %9802 = vmatmul.mubr.msk.f32.vlgmr.msra.gmra.mxu1 %vm585_vm0, %v10896_v9 }
  0x41   : > { %9804 = vmatprep.subr.mxu0 %v10737_v2  ;;  %9815 = vmatprep.subr.mxu1 %v10737_v2 }
  0x42   : > { %9812 = vmatprep.mubr.msk.f32.mxu0 %vm10738_vm1, %v10737_v2  ;;  %9823 = vmatprep.mubr.msk.f32.mxu1 %vm10738_vm1, %v10737_v2 }
  0x43   : > { %9805 = vmatpush3.msra.mxu0 %v8945_v34  ;;  %9816 = vmatpush3.msra.mxu1 %v8949_v35 }
  0x44   : > { %9806 = vmatprep.subr.mxu0 %v10737_v2  ;;  %9817 = vmatprep.subr.mxu1 %v10737_v2 }
  0x45   : > { %9807 = vmatpush3.msra.mxu0 %v8944_v36  ;;  %9818 = vmatpush3.msra.mxu1 %v8948_v37  ;;  %v489_v36 = vld [vmem:[%s11174_s17] sm:$0xff] }
  0x46   : > { %9808 = vmatprep.subr.mxu0 %v10737_v2  ;;  %9819 = vmatprep.subr.mxu1 %v10737_v2 }
  0x47   : > { %9809 = vmatpush3.msra.mxu0 %v8943_v38  ;;  %9820 = vmatpush3.msra.mxu1 %v8947_v39 }
  0x48   : > { %9810 = vmatprep.subr.mxu0 %v10737_v2  ;;  %9821 = vmatprep.subr.mxu1 %v10737_v2 }
  0x49   : > { %9811 = vmatpush3.msra.mxu0 %v8942_v40  ;;  %9822 = vmatpush3.msra.mxu1 %v8946_v41 }
  0x4a   : > { %9826 = vmatprep.subr.mxu0 %v10737_v2  ;;  %9837 = vmatprep.subr.mxu1 %v10737_v2 }
  0x4b   : > { %9813 = vmatmul.mubr.msk.f32.vlgmr.msra.gmra.mxu0 %vm585_vm0, %v10896_v9  ;;  %9824 = vmatmul.mubr.msk.f32.vlgmr.msra.gmra.mxu1 %vm585_vm0, %v10896_v9 }
  0x4c   : > { %9827 = vmatpush3.msra.mxu0 %v8953_v42  ;;  %9838 = vmatpush3.msra.mxu1 %v8957_v43 }
  0x4d   : > { %9828 = vmatprep.subr.mxu0 %v10737_v2  ;;  %9839 = vmatprep.subr.mxu1 %v10737_v2 }
  0x4e   : > { %9829 = vmatpush3.msra.mxu0 %v8952_v44  ;;  %9840 = vmatpush3.msra.mxu1 %v8956_v45 }
  0x4f   : > { %9830 = vmatprep.subr.mxu0 %v10737_v2  ;;  %9841 = vmatprep.subr.mxu1 %v10737_v2 }
  0x50   : > { %9831 = vmatpush3.msra.mxu0 %v8951_v46  ;;  %9842 = vmatpush3.msra.mxu1 %v8955_v47 }
  0x51   : > { %9832 = vmatprep.subr.mxu0 %v10737_v2  ;;  %9843 = vmatprep.subr.mxu1 %v10737_v2 }
  0x52   : > { %9833 = vmatpush3.msra.mxu0 %v8950_v48  ;;  %9834 = vmatprep.mubr.msk.f32.mxu0 %vm10738_vm1, %v10737_v2 }
  0x53   : > { %9844 = vmatpush3.msra.mxu1 %v8954_v49  ;;  %9845 = vmatprep.mubr.msk.f32.mxu1 %vm10738_vm1, %v10737_v2 }
  0x54   : > { %9835 = vmatmul.mubr.msk.f32.vlgmr.msra.gmra.mxu0 %vm585_vm0, %v10896_v9  ;;  %9846 = vmatmul.mubr.msk.f32.vlgmr.msra.gmra.mxu1 %vm585_vm0, %v10896_v9 }
  0x55   : > { %9848 = vmatprep.subr.mxu0 %v10737_v2  ;;  %9853 = vmatprep.subr.mxu1 %v10737_v2 }
  0x56   : > { %9850 = vmatprep.mubr.msk.f32.mxu0 %vm10738_vm1, %v10737_v2  ;;  %9855 = vmatprep.mubr.msk.f32.mxu1 %vm10738_vm1, %v10737_v2 }
  0xe1   : > { %v655_v50 = vpop.f32.mrf.mxu0 }
  0xe2   : > { %v656_v62 = vadd.f32 %v8966_v58, %v655_v50 }
  0xe3   : > { %v9726_v51 = vpop.f32.mrf.mxu0  ;;  %v725_v52 = vpop.f32.mrf.mxu1 }
  0xe4   : > { %v726_v63 = vadd.f32 %v8967_v59, %v725_v52  ;;  %v869_v7 = vmul.f32 0.35355338, %v656_v62 }
  0xe5   : > { %v9737_v53 = vpop.f32.mrf.mxu1 }
  0xe6   : > { %v870_v8 = vmul.f32 0.35355338, %v726_v63 }
  0xeb   : > { %v795_v54 = vpop.f32.mrf.mxu0 }
  0xec   : > { %v796_v14 = vadd.f32 %v8968_v10, %v795_v54 }
  0xed   : > { %v9748_v55 = vpop.f32.mrf.mxu0  ;;  %v865_v56 = vpop.f32.mrf.mxu1 }
  0xee   : > { %v866_v15 = vadd.f32 %v8969_v11, %v865_v56  ;;  %v871_v22 = vmul.f32 0.35355338, %v796_v14  ;;  %v8984_v14 = vld [vmem:[%s12605_s5 + $0xa] ss:$0 sm:$0xff] }
  0xef   : > { %v9759_v57 = vpop.f32.mrf.mxu1 }
  0xf0   : > { %v872_v23 = vmul.f32 0.35355338, %v866_v15 }
  0xf6   : > { %v963_v0 = vpop.f32.mrf.mxu0  ;;  %v1033_v1 = vpop.f32.mrf.mxu1 }
  0xf7   : > { %v964_v3 = vadd.f32 %v8974_v60, %v963_v0  ;;  %v1034_v4 = vadd.f32 %v8975_v61, %v1033_v1 }
  0xf8   : > { %v9770_v5 = vpop.f32.mrf.mxu0  ;;  %v9781_v6 = vpop.f32.mrf.mxu1 }
  0xf9   : > { %9849 = vmatpush3.xpose.msk.msra.mxu0 %vm1481_vm2, %v964_v3  ;;  %9854 = vmatpush3.xpose.msk.msra.mxu1 %vm1481_vm2, %v1034_v4 }
  0xfa   : > { %9858 = vmatprep.subr.mxu0 %v10737_v2  ;;  %9863 = vmatprep.subr.mxu1 %v10737_v2 }
  0xfc   : > { %9851 = vmatmul.mubr.msk.f32.vlgmr.msra.gmra.mxu0 %vm1481_vm2, %v869_v7  ;;  %9856 = vmatmul.mubr.msk.f32.vlgmr.msra.gmra.mxu1 %vm1481_vm2, %v870_v8 }
  0xfd   : > { %9860 = vmatprep.mubr.msk.f32.mxu0 %vm10738_vm1, %v10737_v2  ;;  %9865 = vmatprep.mubr.msk.f32.mxu1 %vm10738_vm1, %v10737_v2 }
 0x100   : > { %v1103_v16 = vpop.f32.mrf.mxu0  ;;  %v1173_v17 = vpop.f32.mrf.mxu1 }
 0x101   : > { %v1104_v18 = vadd.f32 %v8976_v12, %v1103_v16  ;;  %v1174_v19 = vadd.f32 %v8977_v13, %v1173_v17 }
 0x102   : > { %v9792_v20 = vpop.f32.mrf.mxu0  ;;  %v9803_v21 = vpop.f32.mrf.mxu1 }
 0x103   : > { %9859 = vmatpush3.xpose.msk.msra.mxu0 %vm1481_vm2, %v1104_v18  ;;  %9864 = vmatpush3.xpose.msk.msra.mxu1 %vm1481_vm2, %v1174_v19  ;;  %v8985_v19 = vld [vmem:[%s12605_s5 + $0xb] ss:$0 sm:$0xff] }
 0x104   : > { %9868 = vmatprep.subr.mxu0 %v10737_v2  ;;  %9873 = vmatprep.subr.mxu1 %v10737_v2 }
 0x106   : > { %9861 = vmatmul.mubr.msk.f32.vlgmr.msra.gmra.mxu0 %vm1481_vm2, %v871_v22  ;;  %9866 = vmatmul.mubr.msk.f32.vlgmr.msra.gmra.mxu1 %vm1481_vm2, %v872_v23 }
 0x107   : > { %9870 = vmatprep.mubr.msk.f32.mxu0 %vm10738_vm1, %v10737_v2  ;;  %9875 = vmatprep.mubr.msk.f32.mxu1 %vm10738_vm1, %v10737_v2 }
 0x10b   : > { %v1267_v26 = vpop.f32.mrf.mxu0  ;;  %v1337_v27 = vpop.f32.mrf.mxu1 }
 0x10c   : > { %v1268_v28 = vadd.f32 %v8982_v24, %v1267_v26  ;;  %v1338_v29 = vadd.f32 %v8983_v25, %v1337_v27  ;;  %v557_v27 = vld [vmem:[%s12606_s6] sm:$0xff] }
 0x10d   : > { %v9814_v30 = vpop.f32.mrf.mxu0  ;;  %v9825_v31 = vpop.f32.mrf.mxu1 }
 0x10e   : > { %9869 = vmatpush3.msra.mxu0 %v1268_v28  ;;  %9874 = vmatpush3.msra.mxu1 %v1338_v29  ;;  %v558_v28 = vld [vmem:[%s12606_s6 + $0x8] sm:$0xff]  ;;  %v559_v29 = vld [vmem:[%s12606_s6 + $0x10] sm:$0xff] }
 0x10f   : > { %9878 = vmatprep.subr.mxu0 %v10737_v2  ;;  %9883 = vmatprep.subr.mxu1 %v10737_v2 }
 0x114   : > { %v11166_v32 = vpop.f32.mrf.mxu0  ;;  %v11168_v33 = vpop.f32.mrf.mxu1 }
 0x115   : > { %v1408_v18 = vadd.f32 %v8984_v14, %v11166_v32  ;;  %v1478_v22 = vadd.f32 %v8985_v19, %v11168_v33  ;;  %v560_v32 = vld [vmem:[%s12606_s6 + $0x18] sm:$0xff] }
 0x116   : > { %v9836_v34 = vpop.f32.mrf.mxu0  ;;  %v9847_v35 = vpop.f32.mrf.mxu1 }
 0x1bc   : > { %v1554_v37 = vpop.f32.mrf.mxu0  ;;  %v1630_v38 = vpop.f32.mrf.mxu1 }
 0x1bd   : > { %v1555_v39 = vadd.f32 %v1554_v37, %v489_v36  ;;  %v1631_v42 = vadd.f32 %v1630_v38, %v489_v36 }
 0x1be   : > { %v9852_v40 = vpop.f32.mrf.mxu0  ;;  %v9857_v41 = vpop.f32.mrf.mxu1 }
 0x1bf   : > { %v1786_v43 = vsel %vm1481_vm2, %v1555_v39, -inf  ;;  %v1789_v44 = vsel %vm1481_vm2, %v1631_v42, -inf  ;;  %v2421_v41 = vlaneseq }
 0x1c0   : > { %1787 = vmax.xlane.f32.xlu0 %v1786_v43 }
 0x1c4   : > { %1790 = vmax.xlane.f32.xlu0 %v1789_v44  ;;  %v11235_v44 = vshrl.u32 %v2421_v41, 7  ;;  %v9037_v41 = vld [vmem:[%s12604_s4 + $0x278] sm:$0xff] }
 0x1c6   : > { %v1782_v45 = vpop.f32.mrf.mxu1  ;;  %v1706_v46 = vpop.f32.mrf.mxu0 }
 0x1c7   : > { %v1707_v47 = vadd.f32 %v1706_v46, %v489_v36  ;;  %v1783_v50 = vadd.f32 %v1782_v45, %v489_v36 }
 0x1c8   : > { %v9862_v48 = vpop.f32.mrf.mxu0  ;;  %v9867_v49 = vpop.f32.mrf.mxu1 }
 0x1c9   : > { %v1792_v51 = vsel %vm1481_vm2, %v1707_v47, -inf  ;;  %v1795_v52 = vsel %vm1481_vm2, %v1783_v50, -inf }
 0x1ca   : > { %1793 = vmax.xlane.f32.xlu1 %v1792_v51 }
 0x1ce   : > { %1796 = vmax.xlane.f32.xlu1 %v1795_v52 }
 0x249   : > { %v1788_v53 = vpop.xlane.xlu0 %1787 }
 0x24a   : > { %v1798_v54 = vsub.f32 %v1555_v39, %v1788_v53 }
 0x24c   : > { %v1802_v55 = vmul.f32 1.442695, %v1798_v54 }
 0x24d   : > { %v1791_v56 = vpop.xlane.xlu0 %1790 }
 0x24e   : > { %10596 = vpow2.f32 %v1802_v55  ;;  %v1799_v57 = vsub.f32 %v1631_v42, %v1791_v56 }
 0x250   : > { %v1804_v58 = vmul.f32 1.442695, %v1799_v57 }
 0x252   : > { %10598 = vpow2.f32 %v1804_v58 }
 0x253   : > { %v1794_v59 = vpop.xlane.xlu1 %1793 }
 0x254   : > { %v1800_v60 = vsub.f32 %v1707_v47, %v1794_v59  ;;  %v2423_v47 = vsub.s32 0, %v11235_v44 }
 0x256   : > { %v1806_v61 = vmul.f32 1.442695, %v1800_v60 }
 0x257   : > { %v1797_v62 = vpop.xlane.xlu1 %1796 }
 0x258   : > { %10600 = vpow2.f32 %v1806_v61  ;;  %v1801_v63 = vsub.f32 %v1783_v50, %v1797_v62  ;;  %v11244_v50 = vld [vmem:[%s12607_s7] sm:$0xff] }
 0x259   : > { %v2424_v55 = vrot.slane %v11244_v50, %v2423_v47 }
 0x25a   : > { %v1808_v0 = vmul.f32 1.442695, %v1801_v63 }
 0x25b   : > { %v10597_v1 = vpop.eup %10596 }
 0x25c   : > { %10602 = vpow2.f32 %v1808_v0  ;;  %v1810_v3 = vsel %vm1481_vm2, %v10597_v1, 0.0 }
 0x25d   : > { %1811 = vadd.xlane.f32.xlu0 %v1810_v3 }
 0x25f   : > { %v10599_v4 = vpop.eup %10598 }
 0x260   : > { %v1813_v5 = vsel %vm1481_vm2, %v10599_v4, 0.0 }
 0x261   : > { %1814 = vadd.xlane.f32.xlu1 %v1813_v5  ;;  %v9013_v5 = vld [vmem:[%s12604_s4 + $0x1b8] sm:$0xff] }
 0x265   : > { %v10601_v6 = vpop.eup %10600 }
 0x266   : > { %v1816_v7 = vsel %vm1481_vm2, %v10601_v6, 0.0 }
 0x267   : > { %1817 = vadd.xlane.f32.xlu0 %v1816_v7  ;;  %v9007_v7 = vld [vmem:[%s12604_s4 + $0x188] sm:$0xff] }
 0x269   : > { %v10603_v8 = vpop.eup %10602 }
 0x26a   : > { %v1819_v10 = vsel %vm1481_vm2, %v10603_v8, 0.0 }
 0x26b   : > { %1820 = vadd.xlane.f32.xlu1 %v1819_v10  ;;  %v9006_v10 = vld [vmem:[%s12604_s4 + $0x180] sm:$0xff] }
 0x2e6   : > { %v1812_v11 = vpop.xlane.xlu0 %1811 }
 0x2e7   : > { %10604 = vrcp.f32 %v1812_v11  ;;  %v9010_v11 = vld [vmem:[%s12604_s4 + $0x1a0] sm:$0xff] }
 0x2ea   : > { %v1815_v12 = vpop.xlane.xlu1 %1814 }
 0x2eb   : > { %10606 = vrcp.f32 %v1815_v12 }
 0x2f0   : > { %v1818_v13 = vpop.xlane.xlu0 %1817 }
 0x2f1   : > { %10608 = vrcp.f32 %v1818_v13 }
 0x2f4   : > { %v10605_v15 = vpop.eup %10604  ;;  %v1821_v16 = vpop.xlane.xlu1 %1820 }
 0x2f5   : > { %10610 = vrcp.f32 %v1821_v16  ;;  %v1826_v17 = vmul.f32 %v10605_v15, %v10597_v1  ;;  %v2443_v15 = vsub.s32 1, %v11235_v44  ;;  %v2448_v16 = vsub.s32 2, %v11235_v44 }
 0x2f7   : > { %9871 = vmatmul.mubr.msk.f32.vlgmr.msra.gmra.mxu0 %vm1481_vm2, %v1826_v17  ;;  %v2444_v17 = vrot.slane %v11244_v50, %v2443_v15 }
 0x2f8   : > { %v10607_v20 = vpop.eup %10606  ;;  %9879 = vmatpush3.msra.mxu0 %v1408_v18  ;;  %9880 = vmatprep.mubr.msk.f32.mxu0 %vm10738_vm1, %v10737_v2 }
 0x2f9   : > { %v1827_v21 = vmul.f32 %v10607_v20, %v10599_v4  ;;  %9888 = vmatprep.subr.mxu0 %v10737_v2  ;;  %v9009_v4 = vld [vmem:[%s12604_s4 + $0x198] sm:$0xff]  ;;  %v2449_v20 = vrot.slane %v11244_v50, %v2448_v16 }
 0x2fb   : > { %9876 = vmatmul.mubr.msk.f32.vlgmr.msra.gmra.mxu1 %vm1481_vm2, %v1827_v21 }
 0x2fc   : > { %9884 = vmatpush3.msra.mxu1 %v1478_v22  ;;  %9885 = vmatprep.mubr.msk.f32.mxu1 %vm10738_vm1, %v10737_v2 }
 0x2fd   : > { %9893 = vmatprep.subr.mxu1 %v10737_v2 }
 0x2fe   : > { %v10609_v23 = vpop.eup %10608 }
 0x2ff   : > { %v1828_v24 = vmul.f32 %v10609_v23, %v10601_v6  ;;  %v9012_v6 = vld [vmem:[%s12604_s4 + $0x1b0] sm:$0xff]  ;;  %v9017_v23 = vld [vmem:[%s12604_s4 + $0x1d8] sm:$0xff] }
 0x301   : > { %9881 = vmatmul.mubr.msk.f32.vlgmr.msra.gmra.mxu0 %vm1481_vm2, %v1828_v24  ;;  %v9021_v24 = vld [vmem:[%s12604_s4 + $0x1f8] sm:$0xff] }
 0x302   : > { %v10611_v25 = vpop.eup %10610  ;;  %9890 = vmatprep.mubr.msk.f32.mxu0 %vm10738_vm1, %v10737_v2  ;;  %9889 = vmatpush3.msra.mxu0 %v557_v27  ;;  %v9015_v27 = vld [vmem:[%s12604_s4 + $0x1c8] sm:$0xff] }
 0x303   : > { %v1829_v26 = vmul.f32 %v10611_v25, %v10603_v8  ;;  %9898 = vmatprep.subr.mxu0 %v10737_v2  ;;  %v9011_v8 = vld [vmem:[%s12604_s4 + $0x1a8] sm:$0xff]  ;;  %v9016_v25 = vld [vmem:[%s12604_s4 + $0x1d0] sm:$0xff] }
 0x305   : > { %9886 = vmatmul.mubr.msk.f32.vlgmr.msra.gmra.mxu1 %vm1481_vm2, %v1829_v26  ;;  %v9020_v26 = vld [vmem:[%s12604_s4 + $0x1f0] sm:$0xff] }
 0x306   : > { %9895 = vmatprep.mubr.msk.f32.mxu1 %vm10738_vm1, %v10737_v2  ;;  %9894 = vmatpush3.msra.mxu1 %v558_v28  ;;  %v9019_v28 = vld [vmem:[%s12604_s4 + $0x1e8] sm:$0xff] }
 0x307   : > { %9903 = vmatprep.subr.mxu1 %v10737_v2 }
 0x3b7   : > { %v1899_v30 = vpop.f32.mrf.mxu0 }
 0x3b8   : > { %9891 = vmatmul.mubr.msk.f32.vlgmr.msra.gmra.mxu0 %vm1481_vm2, %v1899_v30  ;;  %v9018_v30 = vld [vmem:[%s12604_s4 + $0x1e0] sm:$0xff] }
 0x3b9   : > { %v9872_v31 = vpop.f32.mrf.mxu0  ;;  %9899 = vmatpush3.msra.mxu0 %v559_v29  ;;  %9900 = vmatprep.mubr.msk.f32.mxu0 %vm10738_vm1, %v10737_v2  ;;  %v9014_v29 = vld [vmem:[%s12604_s4 + $0x1c0] sm:$0xff] }
 0x3ba   : > { %9908 = vmatprep.subr.mxu0 %v10737_v2  ;;  %v9025_v31 = vld [vmem:[%s12604_s4 + $0x218] sm:$0xff] }
 0x3bb   : > { %v1972_v33 = vpop.f32.mrf.mxu1 }
 0x3bc   : > { %9896 = vmatmul.mubr.msk.f32.vlgmr.msra.gmra.mxu1 %vm1481_vm2, %v1972_v33  ;;  %v9024_v33 = vld [vmem:[%s12604_s4 + $0x210] sm:$0xff] }
 0x3bd   : > { %v9877_v34 = vpop.f32.mrf.mxu1  ;;  %9904 = vmatpush3.msra.mxu1 %v560_v32  ;;  %9905 = vmatprep.mubr.msk.f32.mxu1 %vm10738_vm1, %v10737_v2  ;;  %v9029_v32 = vld [vmem:[%s12604_s4 + $0x238] sm:$0xff] }
 0x3be   : > { %9919 = vmatprep.subr.mxu1 %v10737_v2  ;;  %v9028_v34 = vld [vmem:[%s12604_s4 + $0x230] sm:$0xff] }
 0x3c1   : > { %v2045_v35 = vpop.f32.mrf.mxu0 }
 0x3c2   : > { %9901 = vmatmul.mubr.msk.f32.vlgmr.msra.gmra.mxu0 %vm1481_vm2, %v2045_v35  ;;  %v9023_v35 = vld [vmem:[%s12604_s4 + $0x208] sm:$0xff] }
 0x3c3   : > { %v9882_v36 = vpop.f32.mrf.mxu0  ;;  %9916 = vmatprep.mubr.msk.f32.mxu0 %vm10738_vm1, %v10737_v2  ;;  %9909 = vmatpush3.msra.mxu0 %v9009_v4 }
 0x3c4   : > { %9910 = vmatprep.subr.mxu0 %v10737_v2  ;;  %v9027_v36 = vld [vmem:[%s12604_s4 + $0x228] sm:$0xff] }
 0x3c5   : > { %v2118_v37 = vpop.f32.mrf.mxu1 }
 0x3c6   : > { %9906 = vmatmul.mubr.msk.f32.vlgmr.msra.gmra.mxu1 %vm1481_vm2, %v2118_v37  ;;  %v9022_v37 = vld [vmem:[%s12604_s4 + $0x200] sm:$0xff] }
 0x3c7   : > { %v9887_v38 = vpop.f32.mrf.mxu1  ;;  %9927 = vmatprep.mubr.msk.f32.mxu1 %vm10738_vm1, %v10737_v2  ;;  %9920 = vmatpush3.msra.mxu1 %v9013_v5 }
 0x3c8   : > { %9921 = vmatprep.subr.mxu1 %v10737_v2  ;;  %v9026_v38 = vld [vmem:[%s12604_s4 + $0x220] sm:$0xff] }
 0x3c9   : > { %9922 = vmatpush3.msra.mxu1 %v9012_v6 }
 0x3ca   : > { %9923 = vmatprep.subr.mxu1 %v10737_v2 }
 0x3cb   : > { %9924 = vmatpush3.msra.mxu1 %v9011_v8 }
 0x3cc   : > { %9925 = vmatprep.subr.mxu1 %v10737_v2 }
 0x3cd   : > { %9926 = vmatpush3.msra.mxu1 %v9010_v11 }
 0x3ce   : > { %9941 = vmatprep.subr.mxu1 %v10737_v2 }
 0x478   : > { %v2191_v39 = vpop.f32.mrf.mxu0 }
 0x479   : > { %v2414_v48 = vsel %vm585_vm0, %v2191_v39, 0.0  ;;  %v11374_v39 = vld [vmem:[%s11363_s2] sm:$0xff] }
 0x47a   : > { %v9892_v40 = vpop.f32.mrf.mxu0 }
 0x47b   : > { %v9033_v40 = vld [vmem:[%s12604_s4 + $0x258] sm:$0xff] }
 0x47c   : > { %v2264_v42 = vpop.f32.mrf.mxu1 }
 0x47d   : > { %v2415_v45 = vsel %vm585_vm0, %v2264_v42, 0.0  ;;  %v9032_v42 = vld [vmem:[%s12604_s4 + $0x250] sm:$0xff] }
 0x47e   : > { %v9897_v43 = vpop.f32.mrf.mxu1  ;;  %v2416_v51 = vadd.f32 %v2415_v45, %v2414_v48  ;;  %v9031_v45 = vld [vmem:[%s12604_s4 + $0x248] sm:$0xff]  ;;  %v9030_v48 = vld [vmem:[%s12604_s4 + $0x240] sm:$0xff] }
 0x47f   : > { %v9036_v43 = vld [vmem:[%s12604_s4 + $0x270] sm:$0xff] }
 0x482   : > { %v2337_v46 = vpop.f32.mrf.mxu0 }
 0x483   : > { %v2417_v49 = vsel %vm585_vm0, %v2337_v46, 0.0  ;;  %v9035_v46 = vld [vmem:[%s12604_s4 + $0x268] sm:$0xff] }
 0x484   : > { %v9902_v52 = vpop.f32.mrf.mxu0  ;;  %v2418_v53 = vadd.f32 %v2417_v49, %v2416_v51  ;;  %v9034_v49 = vld [vmem:[%s12604_s4 + $0x260] sm:$0xff]  ;;  %v9041_v51 = vld [vmem:[%s12604_s4 + $0x298] sm:$0xff] }
 0x485   : > { %v9045_v52 = vld [vmem:[%s12604_s4 + $0x2b8] sm:$0xff] }
 0x486   : > { %v2410_v54 = vpop.f32.mrf.mxu1 }
 0x487   : > { %v2419_v56 = vsel %vm585_vm0, %v2410_v54, 0.0  ;;  %v9044_v54 = vld [vmem:[%s12604_s4 + $0x2b0] sm:$0xff] }
 0x488   : > { %v2420_v57 = vadd.f32 %v2419_v56, %v2418_v53  ;;  %v9907_v58 = vpop.f32.mrf.mxu1  ;;  %v9040_v53 = vld [vmem:[%s12604_s4 + $0x290] sm:$0xff]  ;;  %v9043_v56 = vld [vmem:[%s12604_s4 + $0x2a8] sm:$0xff] }
 0x489   : > { %v9042_v58 = vld [vmem:[%s12604_s4 + $0x2a0] sm:$0xff] }
 0x48a   : > { %v2425_v59 = vadd.f32 %v2424_v55, %v2420_v57  ;;  %v9039_v55 = vld [vmem:[%s12604_s4 + $0x288] sm:$0xff]  ;;  %v9038_v57 = vld [vmem:[%s12604_s4 + $0x280] sm:$0xff] }
 0x48c   : > { %v2426_v60 = vadd.f32 %v2425_v59, %v10896_v9  ;;  %v9008_v9 = vld [vmem:[%s12604_s4 + $0x190] sm:$0xff]  ;;  %v9049_v59 = vld [vmem:[%s12604_s4 + $0x2d8] sm:$0xff] }
 0x48d   : > { %9911 = vmatpush3.msra.mxu0 %v9008_v9 }
 0x48e   : > { %v2427_v61 = vsel %vm585_vm0, %v2426_v60, 0.0  ;;  %9912 = vmatprep.subr.mxu0 %v10737_v2 }
 0x48f   : > { %2428 = vadd.xlane.f32.xlu0 %v2427_v61  ;;  %9913 = vmatpush3.msra.mxu0 %v9007_v7  ;;  %v9048_v61 = vld [vmem:[%s12604_s4 + $0x2d0] sm:$0xff] }
 0x490   : > { %9914 = vmatprep.subr.mxu0 %v10737_v2 }
 0x491   : > { %9915 = vmatpush3.msra.mxu0 %v9006_v10 }
 0x492   : > { %9930 = vmatprep.subr.mxu0 %v10737_v2 }
 0x518   : > { %v2429_v62 = vpop.xlane.xlu0 %2428 }
 0x519   : > { %v2431_v63 = vmul.f32 0.03125, %v2429_v62  ;;  %v9052_v62 = vld [vmem:[%s12604_s4 + $0x2f0] sm:$0xff] }
 0x51b   : > { %v2432_v0 = vsub.f32 %v2426_v60, %v2431_v63  ;;  %v9053_v60 = vld [vmem:[%s12604_s4 + $0x2f8] sm:$0xff]  ;;  %v9047_v63 = vld [vmem:[%s12604_s4 + $0x2c8] sm:$0xff] }
 0x51d   : > { %v2433_v1 = vmul.f32 %v2432_v0, %v2432_v0 }
 0x51f   : > { %v2434_v3 = vsel %vm585_vm0, %v2433_v1, 0.0  ;;  %v9046_v1 = vld [vmem:[%s12604_s4 + $0x2c0] sm:$0xff] }
 0x520   : > { %2435 = vadd.xlane.f32.xlu1 %v2434_v3  ;;  %v9050_v3 = vld [vmem:[%s12604_s4 + $0x2e0] sm:$0xff] }
 0x5a9   : > { %v2436_v12 = vpop.xlane.xlu1 %2435 }
 0x5aa   : > { %v2437_v13 = vmul.f32 0.03125, %v2436_v12  ;;  %v9070_v12 = vld [vmem:[%s12605_s5 + $0xc] ss:$0 sm:$0xff] }
 0x5ac   : > { %v2438_v14 = vadd.f32 1e-05, %v2437_v13  ;;  %v9071_v13 = vld [vmem:[%s12605_s5 + $0xd] ss:$0 sm:$0xff] }
 0x5ae   : > { %10612 = vrsqrt.f32 %v2438_v14  ;;  %v9078_v14 = vld [vmem:[%s12605_s5 + $0x10] ss:$0 sm:$0xff] }
 0x5bb   : > { %v10613_v18 = vpop.eup %10612 }
 0x5bc   : > { %v2440_v19 = vmul.f32 %v10613_v18, %v2432_v0  ;;  %v9051_v0 = vld [vmem:[%s12604_s4 + $0x2e8] sm:$0xff] }
 0x5be   : > { %v2445_v21 = vmul.f32 %v2444_v17, %v2440_v19  ;;  %v9079_v17 = vld [vmem:[%s12605_s5 + $0x11] ss:$0 sm:$0xff] }
 0x5c0   : > { %v11293_v22 = vadd.f32 %v2449_v20, %v2445_v21 }
 0x5c2   : > { %9917 = vmatmul.mubr.msk.f32.vlgmr.msra.gmra.mxu0 %vm585_vm0, %v11293_v22  ;;  %9928 = vmatmul.mubr.msk.f32.vlgmr.msra.gmra.mxu1 %vm585_vm0, %v11293_v22 }
 0x5c3   : > { %9931 = vmatpush3.msra.mxu0 %v9017_v23  ;;  %9942 = vmatpush3.msra.mxu1 %v9021_v24 }
 0x5c4   : > { %9932 = vmatprep.subr.mxu0 %v10737_v2  ;;  %9943 = vmatprep.subr.mxu1 %v10737_v2 }
 0x5c5   : > { %9933 = vmatpush3.msra.mxu0 %v9016_v25  ;;  %9944 = vmatpush3.msra.mxu1 %v9020_v26 }
 0x5c6   : > { %9934 = vmatprep.subr.mxu0 %v10737_v2  ;;  %9945 = vmatprep.subr.mxu1 %v10737_v2 }
 0x5c7   : > { %9935 = vmatpush3.msra.mxu0 %v9015_v27  ;;  %9946 = vmatpush3.msra.mxu1 %v9019_v28 }
 0x5c8   : > { %9936 = vmatprep.subr.mxu0 %v10737_v2  ;;  %9947 = vmatprep.subr.mxu1 %v10737_v2 }
 0x5c9   : > { %9937 = vmatpush3.msra.mxu0 %v9014_v29  ;;  %9938 = vmatprep.mubr.msk.f32.mxu0 %vm10738_vm1, %v10737_v2  ;;  %v9072_v29 = vld [vmem:[%s12605_s5 + $0xe] ss:$0 sm:$0xff] }
 0x5ca   : > { %9948 = vmatpush3.msra.mxu1 %v9018_v30  ;;  %9949 = vmatprep.mubr.msk.f32.mxu1 %vm10738_vm1, %v10737_v2  ;;  %v9073_v30 = vld [vmem:[%s12605_s5 + $0xf] ss:$0 sm:$0xff] }
 0x5cb   : > { %9939 = vmatmul.mubr.msk.f32.vlgmr.msra.gmra.mxu0 %vm585_vm0, %v11293_v22  ;;  %9950 = vmatmul.mubr.msk.f32.vlgmr.msra.gmra.mxu1 %vm585_vm0, %v11293_v22 }
 0x5cc   : > { %9952 = vmatprep.subr.mxu0 %v10737_v2  ;;  %9963 = vmatprep.subr.mxu1 %v10737_v2 }
 0x5cd   : > { %9953 = vmatpush3.msra.mxu0 %v9025_v31  ;;  %9964 = vmatpush3.msra.mxu1 %v9029_v32  ;;  %v9080_v31 = vld [vmem:[%s12605_s5 + $0x12] ss:$0 sm:$0xff]  ;;  %v9081_v32 = vld [vmem:[%s12605_s5 + $0x13] ss:$0 sm:$0xff] }
 0x5ce   : > { %9954 = vmatprep.subr.mxu0 %v10737_v2  ;;  %9965 = vmatprep.subr.mxu1 %v10737_v2 }
 0x5cf   : > { %9955 = vmatpush3.msra.mxu0 %v9024_v33  ;;  %9966 = vmatpush3.msra.mxu1 %v9028_v34 }
 0x5d0   : > { %9956 = vmatprep.subr.mxu0 %v10737_v2  ;;  %9967 = vmatprep.subr.mxu1 %v10737_v2 }
 0x5d1   : > { %9957 = vmatpush3.msra.mxu0 %v9023_v35  ;;  %9968 = vmatpush3.msra.mxu1 %v9027_v36 }
 0x5d2   : > { %9958 = vmatprep.subr.mxu0 %v10737_v2  ;;  %9969 = vmatprep.subr.mxu1 %v10737_v2 }
 0x5d3   : > { %9959 = vmatpush3.msra.mxu0 %v9022_v37  ;;  %9960 = vmatprep.mubr.msk.f32.mxu0 %vm10738_vm1, %v10737_v2 }
 0x5d4   : > { %9970 = vmatpush3.msra.mxu1 %v9026_v38  ;;  %9971 = vmatprep.mubr.msk.f32.mxu1 %vm10738_vm1, %v10737_v2 }
 0x5d5   : > { %9961 = vmatmul.mubr.msk.f32.vlgmr.msra.gmra.mxu0 %vm585_vm0, %v11374_v39  ;;  %9972 = vmatmul.mubr.msk.f32.vlgmr.msra.gmra.mxu1 %vm585_vm0, %v11374_v39 }
 0x5d6   : > { %9974 = vmatprep.subr.mxu0 %v10737_v2  ;;  %9985 = vmatprep.subr.mxu1 %v10737_v2 }
 0x5d7   : > { %9975 = vmatpush3.msra.mxu0 %v9033_v40  ;;  %9986 = vmatpush3.msra.mxu1 %v9037_v41 }
 0x5d8   : > { %9976 = vmatprep.subr.mxu0 %v10737_v2  ;;  %9987 = vmatprep.subr.mxu1 %v10737_v2 }
 0x5d9   : > { %9977 = vmatpush3.msra.mxu0 %v9032_v42  ;;  %9988 = vmatpush3.msra.mxu1 %v9036_v43  ;;  %v9086_v43 = vld [vmem:[%s12605_s5 + $0x14] ss:$0 sm:$0xff] }
 0x5da   : > { %9978 = vmatprep.subr.mxu0 %v10737_v2  ;;  %9989 = vmatprep.subr.mxu1 %v10737_v2 }
 0x5db   : > { %9979 = vmatpush3.msra.mxu0 %v9031_v45  ;;  %9990 = vmatpush3.msra.mxu1 %v9035_v46  ;;  %v9087_v45 = vld [vmem:[%s12605_s5 + $0x15] ss:$0 sm:$0xff] }
 0x5dc   : > { %9980 = vmatprep.subr.mxu0 %v10737_v2  ;;  %9991 = vmatprep.subr.mxu1 %v10737_v2 }
 0x5dd   : > { %9981 = vmatpush3.msra.mxu0 %v9030_v48  ;;  %9982 = vmatprep.mubr.msk.f32.mxu0 %vm10738_vm1, %v10737_v2 }
 0x5de   : > { %9992 = vmatpush3.msra.mxu1 %v9034_v49  ;;  %9993 = vmatprep.mubr.msk.f32.mxu1 %vm10738_vm1, %v10737_v2 }
 0x5df   : > { %9983 = vmatmul.mubr.msk.f32.vlgmr.msra.gmra.mxu0 %vm585_vm0, %v11374_v39  ;;  %9994 = vmatmul.mubr.msk.f32.vlgmr.msra.gmra.mxu1 %vm585_vm0, %v11374_v39 }
 0x5e0   : > { %9996 = vmatprep.subr.mxu0 %v10737_v2  ;;  %10007 = vmatprep.subr.mxu1 %v10737_v2 }
 0x5e1   : > { %10004 = vmatprep.mubr.msk.f32.mxu0 %vm10738_vm1, %v10737_v2  ;;  %10015 = vmatprep.mubr.msk.f32.mxu1 %vm10738_vm1, %v10737_v2 }
 0x5e2   : > { %9997 = vmatpush3.msra.mxu0 %v9041_v51  ;;  %10008 = vmatpush3.msra.mxu1 %v9045_v52 }
 0x5e3   : > { %9998 = vmatprep.subr.mxu0 %v10737_v2  ;;  %10009 = vmatprep.subr.mxu1 %v10737_v2 }
 0x5e4   : > { %9999 = vmatpush3.msra.mxu0 %v9040_v53  ;;  %10010 = vmatpush3.msra.mxu1 %v9044_v54 }
 0x5e5   : > { %10000 = vmatprep.subr.mxu0 %v10737_v2  ;;  %10011 = vmatprep.subr.mxu1 %v10737_v2 }
 0x5e6   : > { %10001 = vmatpush3.msra.mxu0 %v9039_v55  ;;  %10012 = vmatpush3.msra.mxu1 %v9043_v56 }
 0x5e7   : > { %10002 = vmatprep.subr.mxu0 %v10737_v2  ;;  %10013 = vmatprep.subr.mxu1 %v10737_v2 }
 0x5e8   : > { %10003 = vmatpush3.msra.mxu0 %v9038_v57  ;;  %10014 = vmatpush3.msra.mxu1 %v9042_v58  ;;  %v490_v58 = vld [vmem:[%s11572_s23] sm:$0xff] }
 0x5e9   : > { %10018 = vmatprep.subr.mxu0 %v10737_v2  ;;  %10029 = vmatprep.subr.mxu1 %v10737_v2 }
 0x5ea   : > { %10005 = vmatmul.mubr.msk.f32.vlgmr.msra.gmra.mxu0 %vm585_vm0, %v11374_v39  ;;  %10016 = vmatmul.mubr.msk.f32.vlgmr.msra.gmra.mxu1 %vm585_vm0, %v11374_v39 }
 0x5eb   : > { %10019 = vmatpush3.msra.mxu0 %v9049_v59  ;;  %10030 = vmatpush3.msra.mxu1 %v9053_v60 }
 0x5ec   : > { %10020 = vmatprep.subr.mxu0 %v10737_v2  ;;  %10031 = vmatprep.subr.mxu1 %v10737_v2 }
 0x5ed   : > { %10021 = vmatpush3.msra.mxu0 %v9048_v61  ;;  %10032 = vmatpush3.msra.mxu1 %v9052_v62 }
 0x5ee   : > { %10022 = vmatprep.subr.mxu0 %v10737_v2  ;;  %10033 = vmatprep.subr.mxu1 %v10737_v2 }
 0x5ef   : > { %10023 = vmatpush3.msra.mxu0 %v9047_v63  ;;  %10034 = vmatpush3.msra.mxu1 %v9051_v0 }
 0x5f0   : > { %10024 = vmatprep.subr.mxu0 %v10737_v2  ;;  %10035 = vmatprep.subr.mxu1 %v10737_v2 }
 0x5f1   : > { %10025 = vmatpush3.msra.mxu0 %v9046_v1  ;;  %10026 = vmatprep.mubr.msk.f32.mxu0 %vm10738_vm1, %v10737_v2 }
 0x5f2   : > { %10036 = vmatpush3.msra.mxu1 %v9050_v3  ;;  %10037 = vmatprep.mubr.msk.f32.mxu1 %vm10738_vm1, %v10737_v2 }
 0x5f3   : > { %10027 = vmatmul.mubr.msk.f32.vlgmr.msra.gmra.mxu0 %vm585_vm0, %v11374_v39  ;;  %10038 = vmatmul.mubr.msk.f32.vlgmr.msra.gmra.mxu1 %vm585_vm0, %v11374_v39 }
 0x5f4   : > { %10040 = vmatprep.subr.mxu0 %v10737_v2  ;;  %10045 = vmatprep.subr.mxu1 %v10737_v2 }
 0x5f5   : > { %10042 = vmatprep.mubr.msk.f32.mxu0 %vm10738_vm1, %v10737_v2  ;;  %10047 = vmatprep.mubr.msk.f32.mxu1 %vm10738_vm1, %v10737_v2 }
 0x682   : > { %v2615_v4 = vpop.f32.mrf.mxu0  ;;  %v2685_v5 = vpop.f32.mrf.mxu1 }
 0x683   : > { %v2616_v18 = vadd.f32 %v9070_v12, %v2615_v4  ;;  %v2686_v19 = vadd.f32 %v9071_v13, %v2685_v5 }
 0x684   : > { %v9918_v9 = vpop.f32.mrf.mxu0  ;;  %v9929_v6 = vpop.f32.mrf.mxu1 }
 0x685   : > { %v2829_v27 = vmul.f32 0.35355338, %v2616_v18  ;;  %v2830_v28 = vmul.f32 0.35355338, %v2686_v19 }
 0x68b   : > { %v2755_v7 = vpop.f32.mrf.mxu0  ;;  %v2825_v8 = vpop.f32.mrf.mxu1 }
 0x68c   : > { %v2756_v33 = vadd.f32 %v9072_v29, %v2755_v7  ;;  %v2826_v34 = vadd.f32 %v9073_v30, %v2825_v8 }
 0x68d   : > { %v9940_v10 = vpop.f32.mrf.mxu0  ;;  %v9951_v11 = vpop.f32.mrf.mxu1 }
 0x68e   : > { %v2831_v41 = vmul.f32 0.35355338, %v2756_v33  ;;  %v2832_v42 = vmul.f32 0.35355338, %v2826_v34 }
 0x695   : > { %v2926_v20 = vpop.f32.mrf.mxu0  ;;  %v2996_v21 = vpop.f32.mrf.mxu1 }
 0x696   : > { %v2927_v23 = vadd.f32 %v9078_v14, %v2926_v20  ;;  %v2997_v24 = vadd.f32 %v9079_v17, %v2996_v21 }
 0x697   : > { %v9962_v25 = vpop.f32.mrf.mxu0  ;;  %v9973_v26 = vpop.f32.mrf.mxu1 }
 0x698   : > { %10041 = vmatpush3.xpose.msk.msra.mxu0 %vm1481_vm2, %v2927_v23  ;;  %10046 = vmatpush3.xpose.msk.msra.mxu1 %vm1481_vm2, %v2997_v24 }
 0x699   : > { %10050 = vmatprep.subr.mxu0 %v10737_v2  ;;  %10055 = vmatprep.subr.mxu1 %v10737_v2 }
 0x69b   : > { %10043 = vmatmul.mubr.msk.f32.vlgmr.msra.gmra.mxu0 %vm1481_vm2, %v2829_v27  ;;  %10048 = vmatmul.mubr.msk.f32.vlgmr.msra.gmra.mxu1 %vm1481_vm2, %v2830_v28 }
 0x69c   : > { %10052 = vmatprep.mubr.msk.f32.mxu0 %vm10738_vm1, %v10737_v2  ;;  %10057 = vmatprep.mubr.msk.f32.mxu1 %vm10738_vm1, %v10737_v2 }
 0x69f   : > { %v3066_v35 = vpop.f32.mrf.mxu0  ;;  %v3136_v36 = vpop.f32.mrf.mxu1 }
 0x6a0   : > { %v3067_v37 = vadd.f32 %v9080_v31, %v3066_v35  ;;  %v3137_v38 = vadd.f32 %v9081_v32, %v3136_v36 }
 0x6a1   : > { %v9984_v39 = vpop.f32.mrf.mxu0  ;;  %v9995_v40 = vpop.f32.mrf.mxu1 }
 0x6a2   : > { %10051 = vmatpush3.xpose.msk.msra.mxu0 %vm1481_vm2, %v3067_v37  ;;  %10056 = vmatpush3.xpose.msk.msra.mxu1 %vm1481_vm2, %v3137_v38  ;;  %v9089_v39 = vld [vmem:[%s12605_s5 + $0x17] ss:$0 sm:$0xff] }
 0x6a3   : > { %10060 = vmatprep.subr.mxu0 %v10737_v2  ;;  %10065 = vmatprep.subr.mxu1 %v10737_v2 }
 0x6a5   : > { %10053 = vmatmul.mubr.msk.f32.vlgmr.msra.gmra.mxu0 %vm1481_vm2, %v2831_v41  ;;  %10058 = vmatmul.mubr.msk.f32.vlgmr.msra.gmra.mxu1 %vm1481_vm2, %v2832_v42  ;;  %v9088_v41 = vld [vmem:[%s12605_s5 + $0x16] ss:$0 sm:$0xff] }
 0x6a6   : > { %10062 = vmatprep.mubr.msk.f32.mxu0 %vm10738_vm1, %v10737_v2  ;;  %10067 = vmatprep.mubr.msk.f32.mxu1 %vm10738_vm1, %v10737_v2 }
 0x6aa   : > { %v3230_v46 = vpop.f32.mrf.mxu0  ;;  %v3300_v48 = vpop.f32.mrf.mxu1 }
 0x6ab   : > { %v3231_v49 = vadd.f32 %v9086_v43, %v3230_v46  ;;  %v3301_v51 = vadd.f32 %v9087_v45, %v3300_v48 }
 0x6ac   : > { %v10006_v52 = vpop.f32.mrf.mxu0  ;;  %v10017_v53 = vpop.f32.mrf.mxu1 }
 0x6ad   : > { %10061 = vmatpush3.msra.mxu0 %v3231_v49  ;;  %10066 = vmatpush3.msra.mxu1 %v3301_v51 }
 0x6ae   : > { %10070 = vmatprep.subr.mxu0 %v10737_v2  ;;  %10075 = vmatprep.subr.mxu1 %v10737_v2 }
 0x6b3   : > { %v11564_v54 = vpop.f32.mrf.mxu0  ;;  %v11566_v55 = vpop.f32.mrf.mxu1 }
 0x6b4   : > { %v3441_v45 = vadd.f32 %v9089_v39, %v11566_v55  ;;  %v3371_v48 = vadd.f32 %v9088_v41, %v11564_v54  ;;  %v9066_v54 = vld [vmem:[%s12606_s6 + $0x20] sm:$0xff]  ;;  %v9067_v55 = vld [vmem:[%s12606_s6 + $0x28] sm:$0xff] }
 0x6b5   : > { %v10028_v56 = vpop.f32.mrf.mxu0  ;;  %v10039_v57 = vpop.f32.mrf.mxu1 }
 0x6b6   : > { %v9069_v56 = vld [vmem:[%s12606_s6 + $0x38] sm:$0xff] }
 0x75b   : > { %v3516_v59 = vpop.f32.mrf.mxu0  ;;  %v3592_v60 = vpop.f32.mrf.mxu1 }
 0x75c   : > { %v3517_v61 = vadd.f32 %v3516_v59, %v490_v58  ;;  %v3593_v62 = vadd.f32 %v3592_v60, %v490_v58 }
 0x75d   : > { %v10044_v63 = vpop.f32.mrf.mxu0  ;;  %v10049_v0 = vpop.f32.mrf.mxu1 }
 0x75e   : > { %v3751_v1 = vsel %vm1481_vm2, %v3593_v62, -inf  ;;  %v3748_v3 = vsel %vm1481_vm2, %v3517_v61, -inf }
 0x75f   : > { %3752 = vmax.xlane.f32.xlu1 %v3751_v1  ;;  %3749 = vmax.xlane.f32.xlu0 %v3748_v3 }
 0x765   : > { %v3668_v4 = vpop.f32.mrf.mxu0  ;;  %v3744_v5 = vpop.f32.mrf.mxu1 }
 0x766   : > { %v3669_v9 = vadd.f32 %v3668_v4, %v490_v58  ;;  %v3745_v6 = vadd.f32 %v3744_v5, %v490_v58  ;;  %v9068_v58 = vld [vmem:[%s12606_s6 + $0x30] sm:$0xff] }
 0x767   : > { %v10054_v7 = vpop.f32.mrf.mxu0  ;;  %v10059_v8 = vpop.f32.mrf.mxu1 }
 0x768   : > { %v3757_v10 = vsel %vm1481_vm2, %v3745_v6, -inf  ;;  %v3754_v11 = vsel %vm1481_vm2, %v3669_v9, -inf  ;;  %v4385_v8 = vsub.s32 3, %v11235_v44 }
 0x769   : > { %3758 = vmax.xlane.f32.xlu1 %v3757_v10  ;;  %3755 = vmax.xlane.f32.xlu0 %v3754_v11 }
 0x7e8   : > { %v3753_v12 = vpop.xlane.xlu1 %3752  ;;  %v3750_v13 = vpop.xlane.xlu0 %3749 }
 0x7e9   : > { %v3761_v14 = vsub.f32 %v3593_v62, %v3753_v12  ;;  %v3760_v17 = vsub.f32 %v3517_v61, %v3750_v13 }
 0x7eb   : > { %v3766_v18 = vmul.f32 1.442695, %v3761_v14  ;;  %v3764_v19 = vmul.f32 1.442695, %v3760_v17 }
 0x7ed   : > { %10614 = vpow2.f32 %v3766_v18  ;;  %v4386_v18 = vrot.slane %v11244_v50, %v4385_v8 }
 0x7ee   : > { %10616 = vpow2.f32 %v3764_v19 }
 0x7f2   : > { %v3759_v20 = vpop.xlane.xlu1 %3758  ;;  %v3756_v21 = vpop.xlane.xlu0 %3755 }
 0x7f3   : > { %v3763_v23 = vsub.f32 %v3745_v6, %v3759_v20  ;;  %v3762_v24 = vsub.f32 %v3669_v9, %v3756_v21 }
 0x7f5   : > { %v3770_v25 = vmul.f32 1.442695, %v3763_v23  ;;  %v3768_v26 = vmul.f32 1.442695, %v3762_v24 }
 0x7f7   : > { %10618 = vpow2.f32 %v3770_v25 }
 0x7f8   : > { %10620 = vpow2.f32 %v3768_v26 }
 0x7fa   : > { %v10615_v27 = vpop.eup %10614 }
 0x7fb   : > { %v10617_v28 = vpop.eup %10616  ;;  %v3775_v29 = vsel %vm1481_vm2, %v10615_v27, 0.0 }
 0x7fc   : > { %3776 = vadd.xlane.f32.xlu1 %v3775_v29  ;;  %v3772_v30 = vsel %vm1481_vm2, %v10617_v28, 0.0 }
 0x7fd   : > { %3773 = vadd.xlane.f32.xlu0 %v3772_v30 }
 0x804   : > { %v10619_v31 = vpop.eup %10618 }
 0x805   : > { %v10621_v32 = vpop.eup %10620  ;;  %v3781_v33 = vsel %vm1481_vm2, %v10619_v31, 0.0 }
 0x806   : > { %3782 = vadd.xlane.f32.xlu1 %v3781_v33  ;;  %v3778_v34 = vsel %vm1481_vm2, %v10621_v32, 0.0  ;;  %v4412_v33 = vld [vmem:[%s12608_s8] sm:$0xff] }
 0x807   : > { %3779 = vadd.xlane.f32.xlu0 %v3778_v34  ;;  %v4504_v34 = vld [vmem:[%s12610_s10 + $0x38] sm:$0xff] }
 0x885   : > { %v3777_v35 = vpop.xlane.xlu1 %3776 }
 0x886   : > { %10622 = vrcp.f32 %v3777_v35  ;;  %v3774_v36 = vpop.xlane.xlu0 %3773  ;;  %v4503_v35 = vld [vmem:[%s12610_s10 + $0x30] sm:$0xff] }
 0x887   : > { %10624 = vrcp.f32 %v3774_v36  ;;  %v4502_v36 = vld [vmem:[%s12610_s10 + $0x28] sm:$0xff] }
 0x88f   : > { %v3783_v37 = vpop.xlane.xlu1 %3782 }
 0x890   : > { %10626 = vrcp.f32 %v3783_v37  ;;  %v3780_v38 = vpop.xlane.xlu0 %3779  ;;  %v4501_v37 = vld [vmem:[%s12610_s10 + $0x20] sm:$0xff] }
 0x891   : > { %10628 = vrcp.f32 %v3780_v38  ;;  %v4500_v38 = vld [vmem:[%s12610_s10 + $0x18] sm:$0xff] }
 0x893   : > { %v10623_v40 = vpop.eup %10622 }
 0x894   : > { %v10625_v42 = vpop.eup %10624  ;;  %v3789_v43 = vmul.f32 %v10623_v40, %v10615_v27 }
 0x895   : > { %v3788_v46 = vmul.f32 %v10625_v42, %v10617_v28  ;;  %v4404_v42 = vsub.s32 4, %v11235_v44 }
 0x896   : > { %10068 = vmatmul.mubr.msk.f32.vlgmr.msra.gmra.mxu1 %vm1481_vm2, %v3789_v43  ;;  %v4409_v43 = vsub.s32 5, %v11235_v44 }
 0x897   : > { %10063 = vmatmul.mubr.msk.f32.vlgmr.msra.gmra.mxu0 %vm1481_vm2, %v3788_v46  ;;  %10076 = vmatpush3.msra.mxu1 %v3441_v45  ;;  %v4405_v45 = vrot.slane %v11244_v50, %v4404_v42 }
 0x898   : > { %10071 = vmatpush3.msra.mxu0 %v3371_v48  ;;  %10072 = vmatprep.mubr.msk.f32.mxu0 %vm10738_vm1, %v10737_v2 }
 0x899   : > { %10077 = vmatprep.mubr.msk.f32.mxu1 %vm10738_vm1, %v10737_v2  ;;  %10080 = vmatprep.subr.mxu0 %v10737_v2 }
 0x89a   : > { %10085 = vmatprep.subr.mxu1 %v10737_v2 }
 0x89d   : > { %v10627_v49 = vpop.eup %10626 }
 0x89e   : > { %v10629_v51 = vpop.eup %10628  ;;  %v3791_v52 = vmul.f32 %v10627_v49, %v10619_v31  ;;  %v4415_v31 = vld [vmem:[%s12608_s8 + $0x18] sm:$0xff]  ;;  %v4410_v49 = vrot.slane %v11244_v50, %v4409_v43 }
 0x89f   : > { %v3790_v53 = vmul.f32 %v10629_v51, %v10621_v32  ;;  %v4413_v32 = vld [vmem:[%s12608_s8 + $0x8] sm:$0xff] }
 0x8a0   : > { %10078 = vmatmul.mubr.msk.f32.vlgmr.msra.gmra.mxu1 %vm1481_vm2, %v3791_v52 }
 0x8a1   : > { %10073 = vmatmul.mubr.msk.f32.vlgmr.msra.gmra.mxu0 %vm1481_vm2, %v3790_v53  ;;  %10087 = vmatprep.mubr.msk.f32.mxu1 %vm10738_vm1, %v10737_v2  ;;  %v4499_v53 = vld [vmem:[%s12610_s10 + $0x10] sm:$0xff] }
 0x8a2   : > { %10082 = vmatprep.mubr.msk.f32.mxu0 %vm10738_vm1, %v10737_v2  ;;  %10081 = vmatpush3.msra.mxu0 %v9066_v54  ;;  %v4498_v54 = vld [vmem:[%s12610_s10 + $0x8] sm:$0xff] }
 0x8a3   : > { %10086 = vmatpush3.msra.mxu1 %v9067_v55  ;;  %10090 = vmatprep.subr.mxu0 %v10737_v2  ;;  %v4497_v55 = vld [vmem:[%s12610_s10] sm:$0xff] }
 0x8a4   : > { %10095 = vmatprep.subr.mxu1 %v10737_v2 }
 0x956   : > { %v3934_v57 = vpop.f32.mrf.mxu1 }
 0x957   : > { %v3861_v59 = vpop.f32.mrf.mxu0  ;;  %10088 = vmatmul.mubr.msk.f32.vlgmr.msra.gmra.mxu1 %vm1481_vm2, %v3934_v57 }
 0x958   : > { %10083 = vmatmul.mubr.msk.f32.vlgmr.msra.gmra.mxu0 %vm1481_vm2, %v3861_v59  ;;  %v10069_v60 = vpop.f32.mrf.mxu1  ;;  %10096 = vmatpush3.msra.mxu1 %v9069_v56  ;;  %v9110_v56 = vld [vmem:[%s12609_s9] ss:$0 sm:$0xff] }
 0x959   : > { %v10064_v61 = vpop.f32.mrf.mxu0  ;;  %10091 = vmatpush3.msra.mxu0 %v9068_v58  ;;  %10092 = vmatprep.mubr.msk.f32.mxu0 %vm10738_vm1, %v10737_v2 }
 0x95a   : > { %10097 = vmatprep.mubr.msk.f32.mxu1 %vm10738_vm1, %v10737_v2  ;;  %10100 = vmatprep.subr.mxu0 %v10737_v2  ;;  %v4507_v61 = vsub.s32 6, %v11235_v44 }
 0x95b   : > { %10111 = vmatprep.subr.mxu1 %v10737_v2 }
 0x960   : > { %v4080_v62 = vpop.f32.mrf.mxu1 }
 0x961   : > { %v4007_v63 = vpop.f32.mrf.mxu0  ;;  %10098 = vmatmul.mubr.msk.f32.vlgmr.msra.gmra.mxu1 %vm1481_vm2, %v4080_v62  ;;  %v4508_v62 = vrot.slane %v11244_v50, %v4507_v61 }
 0x962   : > { %10093 = vmatmul.mubr.msk.f32.vlgmr.msra.gmra.mxu0 %vm1481_vm2, %v4007_v63  ;;  %v10079_v0 = vpop.f32.mrf.mxu1  ;;  %10127 = vmatprep.mubr.msk.f32.mxu1 %vm10738_vm1, %v10737_v2 }
 0x963   : > { %v10074_v1 = vpop.f32.mrf.mxu0  ;;  %10108 = vmatprep.mubr.msk.f32.mxu0 %vm10738_vm1, %v10737_v2  ;;  %10101 = vmatpush3.msra.mxu0 %v4415_v31 }
 0x964   : > { %10102 = vmatprep.subr.mxu0 %v10737_v2  ;;  %10112 = vmatpush3.msra.mxu1 %v4504_v34  ;;  %v9121_v34 = vld [vmem:[%s12604_s4 + $0x328] sm:$0xff] }
 0x965   : > { %10113 = vmatprep.subr.mxu1 %v10737_v2 }
 0x966   : > { %10114 = vmatpush3.msra.mxu1 %v4503_v35  ;;  %v9133_v35 = vld [vmem:[%s12604_s4 + $0x388] sm:$0xff] }
 0x967   : > { %10115 = vmatprep.subr.mxu1 %v10737_v2 }
 0x968   : > { %10116 = vmatpush3.msra.mxu1 %v4502_v36  ;;  %v9120_v36 = vld [vmem:[%s12604_s4 + $0x320] sm:$0xff] }
 0x969   : > { %10117 = vmatprep.subr.mxu1 %v10737_v2 }
 0x96a   : > { %10118 = vmatpush3.msra.mxu1 %v4501_v37  ;;  %v9132_v37 = vld [vmem:[%s12604_s4 + $0x380] sm:$0xff] }
 0x96b   : > { %10119 = vmatprep.subr.mxu1 %v10737_v2 }
 0x96c   : > { %10120 = vmatpush3.msra.mxu1 %v4500_v38  ;;  %v9131_v38 = vld [vmem:[%s12604_s4 + $0x378] sm:$0xff] }
 0x96d   : > { %10121 = vmatprep.subr.mxu1 %v10737_v2 }
 0x96e   : > { %10122 = vmatpush3.msra.mxu1 %v4499_v53  ;;  %v9138_v53 = vld [vmem:[%s12604_s4 + $0x3b0] sm:$0xff] }
 0x96f   : > { %10123 = vmatprep.subr.mxu1 %v10737_v2 }
 0x970   : > { %10124 = vmatpush3.msra.mxu1 %v4498_v54  ;;  %v9150_v54 = vld [vmem:[%s12604_s4 + $0x410] sm:$0xff] }
 0x971   : > { %10125 = vmatprep.subr.mxu1 %v10737_v2 }
 0x972   : > { %10126 = vmatpush3.msra.mxu1 %v4497_v55  ;;  %v9137_v55 = vld [vmem:[%s12604_s4 + $0x3a8] sm:$0xff] }
 0x973   : > { %10152 = vmatprep.subr.mxu1 %v10737_v2 }
 0xa17   : > { %v4226_v3 = vpop.f32.mrf.mxu1 }
 0xa18   : > { %v4153_v4 = vpop.f32.mrf.mxu0  ;;  %v4377_v7 = vsel %vm585_vm0, %v4226_v3, 0.0 }
 0xa19   : > { %v10089_v5 = vpop.f32.mrf.mxu1  ;;  %v4376_v6 = vsel %vm585_vm0, %v4153_v4, 0.0 }
 0xa1a   : > { %v10084_v9 = vpop.f32.mrf.mxu0  ;;  %v4378_v11 = vadd.f32 %v4377_v7, %v4376_v6 }
 0xa21   : > { %v4372_v10 = vpop.f32.mrf.mxu1 }
 0xa22   : > { %v4299_v12 = vpop.f32.mrf.mxu0  ;;  %v4381_v20 = vsel %vm585_vm0, %v4372_v10, 0.0 }
 0xa23   : > { %v4379_v13 = vsel %vm585_vm0, %v4299_v12, 0.0  ;;  %v10099_v14 = vpop.f32.mrf.mxu1  ;;  %v9127_v12 = vld [vmem:[%s12604_s4 + $0x358] sm:$0xff] }
 0xa24   : > { %v4380_v17 = vadd.f32 %v4379_v13, %v4378_v11  ;;  %v10094_v19 = vpop.f32.mrf.mxu0  ;;  %v9119_v11 = vld [vmem:[%s12604_s4 + $0x318] sm:$0xff]  ;;  %v9118_v13 = vld [vmem:[%s12604_s4 + $0x310] sm:$0xff] }
 0xa25   : > { %v9126_v14 = vld [vmem:[%s12604_s4 + $0x350] sm:$0xff]  ;;  %v9116_v19 = vld [vmem:[%s12604_s4 + $0x300] sm:$0xff] }
 0xa26   : > { %v4382_v21 = vadd.f32 %v4381_v20, %v4380_v17  ;;  %v9117_v17 = vld [vmem:[%s12604_s4 + $0x308] sm:$0xff]  ;;  %v9124_v20 = vld [vmem:[%s12604_s4 + $0x340] sm:$0xff] }
 0xa28   : > { %v4387_v23 = vadd.f32 %v4386_v18, %v4382_v21  ;;  %v9125_v18 = vld [vmem:[%s12604_s4 + $0x348] sm:$0xff] }
 0xa2a   : > { %v4388_v24 = vadd.f32 %v4387_v23, %v11293_v22  ;;  %v4414_v22 = vld [vmem:[%s12608_s8 + $0x10] sm:$0xff] }
 0xa2b   : > { %10103 = vmatpush3.msra.mxu0 %v4414_v22  ;;  %v9123_v22 = vld [vmem:[%s12604_s4 + $0x338] sm:$0xff] }
 0xa2c   : > { %v4389_v25 = vsel %vm585_vm0, %v4388_v24, 0.0  ;;  %10104 = vmatprep.subr.mxu0 %v10737_v2 }
 0xa2d   : > { %4390 = vadd.xlane.f32.xlu0 %v4389_v25  ;;  %10105 = vmatpush3.msra.mxu0 %v4413_v32  ;;  %v4599_v25 = vsub.s32 7, %v11235_v44  ;;  %v9135_v32 = vld [vmem:[%s12604_s4 + $0x398] sm:$0xff] }
 0xa2e   : > { %10106 = vmatprep.subr.mxu0 %v10737_v2 }
 0xa2f   : > { %10107 = vmatpush3.msra.mxu0 %v4412_v33  ;;  %v9134_v33 = vld [vmem:[%s12604_s4 + $0x390] sm:$0xff] }
 0xa30   : > { %10130 = vmatprep.subr.mxu0 %v10737_v2 }
 0xab6   : > { %v4391_v26 = vpop.xlane.xlu0 %4390 }
 0xab7   : > { %v4392_v27 = vmul.f32 0.03125, %v4391_v26  ;;  %v4600_v26 = vrot.slane %v11244_v50, %v4599_v25  ;;  %v9122_v50 = vld [vmem:[%s12604_s4 + $0x330] sm:$0xff] }
 0xab9   : > { %v4393_v28 = vsub.f32 %v4388_v24, %v4392_v27 }
 0xabb   : > { %v4394_v29 = vmul.f32 %v4393_v28, %v4393_v28 }
 0xabd   : > { %v4395_v30 = vsel %vm585_vm0, %v4394_v29, 0.0  ;;  %v9113_v29 = vld [vmem:[%s12607_s7 + $0x8] ss:$0 sm:$0xff] }
 0xabe   : > { %4396 = vadd.xlane.f32.xlu1 %v4395_v30 }
 0xb47   : > { %v4397_v39 = vpop.xlane.xlu1 %4396 }
 0xb48   : > { %v4398_v40 = vmul.f32 0.03125, %v4397_v39  ;;  %v9143_v39 = vld [vmem:[%s12604_s4 + $0x3d8] sm:$0xff] }
 0xb4a   : > { %v4399_v41 = vadd.f32 1e-05, %v4398_v40  ;;  %v9130_v40 = vld [vmem:[%s12604_s4 + $0x370] sm:$0xff] }
 0xb4c   : > { %10630 = vrsqrt.f32 %v4399_v41  ;;  %v9142_v41 = vld [vmem:[%s12604_s4 + $0x3d0] sm:$0xff] }
 0xb59   : > { %v10631_v46 = vpop.eup %10630 }
 0xb5a   : > { %v4401_v48 = vmul.f32 %v10631_v46, %v4393_v28  ;;  %v9141_v46 = vld [vmem:[%s12604_s4 + $0x3c8] sm:$0xff] }
 0xb5c   : > { %v4406_v51 = vmul.f32 %v4405_v45, %v4401_v48  ;;  %v9129_v45 = vld [vmem:[%s12604_s4 + $0x368] sm:$0xff]  ;;  %v9128_v48 = vld [vmem:[%s12604_s4 + $0x360] sm:$0xff] }
 0xb5e   : > { %v4411_v52 = vadd.f32 %v4410_v49, %v4406_v51  ;;  %v9140_v49 = vld [vmem:[%s12604_s4 + $0x3c0] sm:$0xff]  ;;  %v9139_v51 = vld [vmem:[%s12604_s4 + $0x3b8] sm:$0xff] }
 0xb60   : > { %10109 = vmatmul.mubr.msk.f32.vlgmr.msra.gmra.mxu0 %vm585_vm0, %v4411_v52 }
 0xb61   : > { %10138 = vmatprep.mubr.msk.f32.mxu0 %vm10738_vm1, %v10737_v2  ;;  %10131 = vmatpush3.msra.mxu0 %v9119_v11  ;;  %v9162_v11 = vld [vmem:[%s12604_s4 + $0x470] sm:$0xff] }
 0xb62   : > { %10132 = vmatprep.subr.mxu0 %v10737_v2 }
 0xb63   : > { %10133 = vmatpush3.msra.mxu0 %v9118_v13  ;;  %v9160_v13 = vld [vmem:[%s12604_s4 + $0x460] sm:$0xff] }
 0xb64   : > { %10134 = vmatprep.subr.mxu0 %v10737_v2 }
 0xb65   : > { %10135 = vmatpush3.msra.mxu0 %v9117_v17 }
 0xb66   : > { %10136 = vmatprep.subr.mxu0 %v10737_v2 }
 0xb67   : > { %10137 = vmatpush3.msra.mxu0 %v9116_v19 }
 0xb68   : > { %10141 = vmatprep.subr.mxu0 %v10737_v2 }
 0xc20   : > { %v4492_v57 = vpop.f32.mrf.mxu0 }
 0xc21   : > { %v4493_v58 = vadd.f32 %v9110_v56, %v4492_v57  ;;  %v9149_v56 = vld [vmem:[%s12604_s4 + $0x408] sm:$0xff]  ;;  %v9136_v57 = vld [vmem:[%s12604_s4 + $0x3a0] sm:$0xff] }
 0xc22   : > { %v10110_v59 = vpop.f32.mrf.mxu0 }
 0xc23   : > { %v4496_v60 = vmax.f32 %v4493_v58, 0.0  ;;  %v9148_v58 = vld [vmem:[%s12604_s4 + $0x400] sm:$0xff]  ;;  %v9147_v59 = vld [vmem:[%s12604_s4 + $0x3f8] sm:$0xff] }
 0xc25   : > { %10128 = vmatmul.mubr.msk.f32.vlgmr.msra.gmra.mxu1 %vm4509_vm3, %v4496_v60  ;;  %v9159_v60 = vld [vmem:[%s12604_s4 + $0x458] sm:$0xff] }
 0xc26   : > { %10160 = vmatprep.mubr.msk.f32.mxu1 %vm10738_vm1, %v10737_v2  ;;  %10153 = vmatpush3.msra.mxu1 %v9127_v12  ;;  %v9161_v12 = vld [vmem:[%s12604_s4 + $0x468] sm:$0xff] }
 0xc27   : > { %10154 = vmatprep.subr.mxu1 %v10737_v2 }
 0xc28   : > { %10155 = vmatpush3.msra.mxu1 %v9126_v14 }
 0xc29   : > { %10156 = vmatprep.subr.mxu1 %v10737_v2 }
 0xc2a   : > { %10157 = vmatpush3.msra.mxu1 %v9125_v18 }
 0xc2b   : > { %10158 = vmatprep.subr.mxu1 %v10737_v2 }
 0xc2c   : > { %10159 = vmatpush3.msra.mxu1 %v9124_v20  ;;  %v9180_v20 = vld [vmem:[%s12605_s5 + $0x18] ss:$0 sm:$0xff] }
 0xc2d   : > { %10174 = vmatprep.subr.mxu1 %v10737_v2 }
 0xce5   : > { %v4579_v63 = vpop.f32.mrf.mxu1 }
 0xce6   : > { %v4580_v0 = vadd.f32 %v4579_v63, %v4508_v62  ;;  %v9146_v62 = vld [vmem:[%s12604_s4 + $0x3f0] sm:$0xff] }
 0xce7   : > { %v10129_v1 = vpop.f32.mrf.mxu1  ;;  %v9158_v63 = vld [vmem:[%s12604_s4 + $0x450] sm:$0xff] }
 0xce8   : > { %v4583_v3 = vadd.f32 %v4580_v0, %v4411_v52  ;;  %v9151_v52 = vld [vmem:[%s12604_s4 + $0x418] sm:$0xff]  ;;  %v9145_v0 = vld [vmem:[%s12604_s4 + $0x3e8] sm:$0xff] }
 0xce9   : > { %v9157_v1 = vld [vmem:[%s12604_s4 + $0x448] sm:$0xff] }
 0xcea   : > { %v4584_v4 = vsel %vm585_vm0, %v4583_v3, 0.0 }
 0xceb   : > { %4585 = vadd.xlane.f32.xlu0 %v4584_v4  ;;  %v9156_v4 = vld [vmem:[%s12604_s4 + $0x440] sm:$0xff] }
 0xd74   : > { %v4586_v5 = vpop.xlane.xlu0 %4585 }
 0xd75   : > { %v4587_v9 = vmul.f32 0.03125, %v4586_v5  ;;  %v9155_v5 = vld [vmem:[%s12604_s4 + $0x438] sm:$0xff] }
 0xd77   : > { %v4588_v6 = vsub.f32 %v4583_v3, %v4587_v9  ;;  %v9144_v3 = vld [vmem:[%s12604_s4 + $0x3e0] sm:$0xff]  ;;  %v9154_v9 = vld [vmem:[%s12604_s4 + $0x430] sm:$0xff] }
 0xd79   : > { %v4589_v7 = vmul.f32 %v4588_v6, %v4588_v6 }
 0xd7b   : > { %v4590_v10 = vsel %vm585_vm0, %v4589_v7, 0.0  ;;  %v9152_v7 = vld [vmem:[%s12604_s4 + $0x420] sm:$0xff] }
 0xd7c   : > { %4591 = vadd.xlane.f32.xlu1 %v4590_v10  ;;  %v9163_v10 = vld [vmem:[%s12604_s4 + $0x478] sm:$0xff] }
 0xe05   : > { %v4592_v21 = vpop.xlane.xlu1 %4591 }
 0xe06   : > { %v4593_v23 = vmul.f32 0.03125, %v4592_v21  ;;  %v9188_v21 = vld [vmem:[%s12605_s5 + $0x1c] ss:$0 sm:$0xff] }
 0xe08   : > { %v4594_v24 = vadd.f32 1e-05, %v4593_v23 }
 0xe0a   : > { %10632 = vrsqrt.f32 %v4594_v24 }
 0xe17   : > { %v10633_v27 = vpop.eup %10632 }
 0xe18   : > { %v4596_v28 = vmul.f32 %v10633_v27, %v4588_v6  ;;  %v9153_v6 = vld [vmem:[%s12604_s4 + $0x428] sm:$0xff] }
 0xe1a   : > { %v4601_v30 = vmul.f32 %v4600_v26, %v4596_v28 }
 0xe1c   : > { %v11754_v31 = vadd.f32 %v9113_v29, %v4601_v30 }
 0xe1e   : > { %10139 = vmatmul.mubr.msk.f32.vlgmr.msra.gmra.mxu0 %vm585_vm0, %v11754_v31  ;;  %10161 = vmatmul.mubr.msk.f32.vlgmr.msra.gmra.mxu1 %vm585_vm0, %v11754_v31 }
 0xe1f   : > { %10142 = vmatpush3.msra.mxu0 %v9123_v22  ;;  %10175 = vmatpush3.msra.mxu1 %v9135_v32  ;;  %v9182_v22 = vld [vmem:[%s12605_s5 + $0x1a] ss:$0 sm:$0xff]  ;;  %v9190_v32 = vld [vmem:[%s12605_s5 + $0x1e] ss:$0 sm:$0xff] }
 0xe20   : > { %10143 = vmatprep.subr.mxu0 %v10737_v2  ;;  %10176 = vmatprep.subr.mxu1 %v10737_v2 }
 0xe21   : > { %10144 = vmatpush3.msra.mxu0 %v9122_v50  ;;  %10177 = vmatpush3.msra.mxu1 %v9134_v33 }
 0xe22   : > { %10145 = vmatprep.subr.mxu0 %v10737_v2  ;;  %10178 = vmatprep.subr.mxu1 %v10737_v2 }
 0xe23   : > { %10146 = vmatpush3.msra.mxu0 %v9121_v34  ;;  %10179 = vmatpush3.msra.mxu1 %v9133_v35 }
 0xe24   : > { %10147 = vmatprep.subr.mxu0 %v10737_v2  ;;  %10180 = vmatprep.subr.mxu1 %v10737_v2 }
 0xe25   : > { %10148 = vmatpush3.msra.mxu0 %v9120_v36  ;;  %10149 = vmatprep.mubr.msk.f32.mxu0 %vm10738_vm1, %v10737_v2 }
 0xe26   : > { %10181 = vmatpush3.msra.mxu1 %v9132_v37  ;;  %10182 = vmatprep.mubr.msk.f32.mxu1 %vm10738_vm1, %v10737_v2 }
 0xe27   : > { %10150 = vmatmul.mubr.msk.f32.vlgmr.msra.gmra.mxu0 %vm585_vm0, %v11754_v31  ;;  %10163 = vmatprep.subr.mxu0 %v10737_v2 }
 0xe28   : > { %10183 = vmatmul.mubr.msk.f32.vlgmr.msra.gmra.mxu1 %vm585_vm0, %v11754_v31  ;;  %10196 = vmatprep.subr.mxu1 %v10737_v2 }
 0xe29   : > { %10164 = vmatpush3.msra.mxu0 %v9131_v38  ;;  %10197 = vmatpush3.msra.mxu1 %v9143_v39  ;;  %v9181_v39 = vld [vmem:[%s12605_s5 + $0x19] ss:$0 sm:$0xff] }
 0xe2a   : > { %10165 = vmatprep.subr.mxu0 %v10737_v2  ;;  %10198 = vmatprep.subr.mxu1 %v10737_v2 }
 0xe2b   : > { %10166 = vmatpush3.msra.mxu0 %v9130_v40  ;;  %10199 = vmatpush3.msra.mxu1 %v9142_v41  ;;  %v9189_v40 = vld [vmem:[%s12605_s5 + $0x1d] ss:$0 sm:$0xff]  ;;  %v9196_v41 = vld [vmem:[%s12605_s5 + $0x20] ss:$0 sm:$0xff] }
 0xe2c   : > { %10167 = vmatprep.subr.mxu0 %v10737_v2  ;;  %10200 = vmatprep.subr.mxu1 %v10737_v2 }
 0xe2d   : > { %10168 = vmatpush3.msra.mxu0 %v9129_v45  ;;  %10201 = vmatpush3.msra.mxu1 %v9141_v46 }
 0xe2e   : > { %10169 = vmatprep.subr.mxu0 %v10737_v2  ;;  %10202 = vmatprep.subr.mxu1 %v10737_v2 }
 0xe2f   : > { %10170 = vmatpush3.msra.mxu0 %v9128_v48  ;;  %10171 = vmatprep.mubr.msk.f32.mxu0 %vm10738_vm1, %v10737_v2 }
 0xe30   : > { %10203 = vmatpush3.msra.mxu1 %v9140_v49  ;;  %10204 = vmatprep.mubr.msk.f32.mxu1 %vm10738_vm1, %v10737_v2 }
 0xe31   : > { %10172 = vmatmul.mubr.msk.f32.vlgmr.msra.gmra.mxu0 %vm585_vm0, %v11754_v31  ;;  %10185 = vmatprep.subr.mxu0 %v10737_v2 }
 0xe32   : > { %10205 = vmatmul.mubr.msk.f32.vlgmr.msra.gmra.mxu1 %vm585_vm0, %v11754_v31  ;;  %10218 = vmatprep.subr.mxu1 %v10737_v2 }
 0xe33   : > { %10186 = vmatpush3.msra.mxu0 %v9139_v51  ;;  %10219 = vmatpush3.msra.mxu1 %v9151_v52 }
 0xe34   : > { %10187 = vmatprep.subr.mxu0 %v10737_v2  ;;  %10220 = vmatprep.subr.mxu1 %v10737_v2 }
 0xe35   : > { %10188 = vmatpush3.msra.mxu0 %v9138_v53  ;;  %10221 = vmatpush3.msra.mxu1 %v9150_v54 }
 0xe36   : > { %10189 = vmatprep.subr.mxu0 %v10737_v2  ;;  %10222 = vmatprep.subr.mxu1 %v10737_v2 }
 0xe37   : > { %10190 = vmatpush3.msra.mxu0 %v9137_v55  ;;  %10223 = vmatpush3.msra.mxu1 %v9149_v56  ;;  %v9183_v55 = vld [vmem:[%s12605_s5 + $0x1b] ss:$0 sm:$0xff]  ;;  %v9191_v56 = vld [vmem:[%s12605_s5 + $0x1f] ss:$0 sm:$0xff] }
 0xe38   : > { %10191 = vmatprep.subr.mxu0 %v10737_v2  ;;  %10224 = vmatprep.subr.mxu1 %v10737_v2 }
 0xe39   : > { %10192 = vmatpush3.msra.mxu0 %v9136_v57  ;;  %10193 = vmatprep.mubr.msk.f32.mxu0 %vm10738_vm1, %v10737_v2 }
 0xe3a   : > { %10225 = vmatpush3.msra.mxu1 %v9148_v58  ;;  %10226 = vmatprep.mubr.msk.f32.mxu1 %vm10738_vm1, %v10737_v2 }
 0xe3b   : > { %10194 = vmatmul.mubr.msk.f32.vlgmr.msra.gmra.mxu0 %vm585_vm0, %v11754_v31  ;;  %10207 = vmatprep.subr.mxu0 %v10737_v2 }
 0xe3c   : > { %10227 = vmatmul.mubr.msk.f32.vlgmr.msra.gmra.mxu1 %vm585_vm0, %v11754_v31  ;;  %10240 = vmatprep.subr.mxu1 %v10737_v2 }
 0xe3d   : > { %10208 = vmatpush3.msra.mxu0 %v9147_v59  ;;  %10241 = vmatpush3.msra.mxu1 %v9159_v60 }
 0xe3e   : > { %10209 = vmatprep.subr.mxu0 %v10737_v2  ;;  %10242 = vmatprep.subr.mxu1 %v10737_v2 }
 0xe3f   : > { %10210 = vmatpush3.msra.mxu0 %v9146_v62  ;;  %10243 = vmatpush3.msra.mxu1 %v9158_v63 }
 0xe40   : > { %10211 = vmatprep.subr.mxu0 %v10737_v2  ;;  %10244 = vmatprep.subr.mxu1 %v10737_v2 }
 0xe41   : > { %10212 = vmatpush3.msra.mxu0 %v9145_v0  ;;  %10245 = vmatpush3.msra.mxu1 %v9157_v1  ;;  %v9197_v1 = vld [vmem:[%s12605_s5 + $0x21] ss:$0 sm:$0xff] }
 0xe42   : > { %10213 = vmatprep.subr.mxu0 %v10737_v2  ;;  %10246 = vmatprep.subr.mxu1 %v10737_v2 }
 0xe43   : > { %10214 = vmatpush3.msra.mxu0 %v9144_v3  ;;  %10215 = vmatprep.mubr.msk.f32.mxu0 %vm10738_vm1, %v10737_v2 }
 0xe44   : > { %10247 = vmatpush3.msra.mxu1 %v9156_v4  ;;  %10248 = vmatprep.mubr.msk.f32.mxu1 %vm10738_vm1, %v10737_v2 }
 0xe45   : > { %10216 = vmatmul.mubr.msk.f32.vlgmr.msra.gmra.mxu0 %vm585_vm0, %v11754_v31  ;;  %10229 = vmatprep.subr.mxu0 %v10737_v2 }
 0xe46   : > { %10249 = vmatmul.mubr.msk.f32.vlgmr.msra.gmra.mxu1 %vm585_vm0, %v11754_v31  ;;  %10230 = vmatpush3.msra.mxu0 %v9155_v5 }
 0xe47   : > { %10231 = vmatprep.subr.mxu0 %v10737_v2  ;;  %10237 = vmatprep.mubr.msk.f32.mxu0 %vm10738_vm1, %v10737_v2 }
 0xe48   : > { %10232 = vmatpush3.msra.mxu0 %v9154_v9  ;;  %10262 = vmatprep.subr.mxu1 %v10737_v2 }
 0xe49   : > { %10233 = vmatprep.subr.mxu0 %v10737_v2  ;;  %10264 = vmatprep.mubr.msk.f32.mxu1 %vm10738_vm1, %v10737_v2 }
 0xe4a   : > { %10234 = vmatpush3.msra.mxu0 %v9153_v6 }
 0xe4b   : > { %10235 = vmatprep.subr.mxu0 %v10737_v2 }
 0xe4c   : > { %10236 = vmatpush3.msra.mxu0 %v9152_v7 }
 0xe4d   : > { %10238 = vmatmul.mubr.msk.f32.vlgmr.msra.gmra.mxu0 %vm585_vm0, %v11754_v31  ;;  %10251 = vmatprep.subr.mxu0 %v10737_v2 }
 0xe4e   : > { %10252 = vmatpush3.msra.mxu0 %v9163_v10  ;;  %10259 = vmatprep.mubr.msk.f32.mxu0 %vm10738_vm1, %v10737_v2  ;;  %v10672_v10 = vld [vmem:[%s11174_s17] sm:$0xff]  ;;  %s468_s17 = sand.u32 1, %s10727_s26  }
 0xe4f   : > { %10253 = vmatprep.subr.mxu0 %v10737_v2  ;;  %s8921_s16 = sshll.u32 %s468_s17, 3  ;;  %s8809_s15 = scalar_lea.sflag [#allocation3], %s468_s17 }
 0xe50   : > { %10254 = vmatpush3.msra.mxu0 %v9162_v11  ;;  %s470_s24 = scalar_lea.vmem [#allocation2], %s8921_s16  ;;  %s10681_s16 = scalar_lea.vmem %s10680_s29, 256 }
 0xe51   : > { %10255 = vmatprep.subr.mxu0 %v10737_v2  ;;  %s8822_s20 = sshll.u32 %s470_s24, 4  ;;  %s8823_s20 = int_to_ptr.vmem [resolvable:$true] %s8822_s20 }
 0xe52   : > { %10256 = vmatpush3.msra.mxu0 %v9161_v12  ;;  %s10675_s1 = scalar_lea.vmem %s8823_s20, 128  ;;  %p10682_p0 = scmp.lt.s32.totalorder %s8823_s20, %s10680_s29 }
 0xe53   : > { %10257 = vmatprep.subr.mxu0 %v10737_v2  ;;  %p10676_p11 = scmp.ne.s32.totalorder %s8823_s20, %s10675_s1  ;;  %p10683_p1 = scmp.lt.s32.totalorder %s10681_s16, %s10675_s1 }
 0xe54   : > { %10258 = vmatpush3.msra.mxu0 %v9160_v13 }
 0xe55   : > { %10260 = vmatmul.mubr.msk.f32.vlgmr.msra.gmra.mxu0 %vm585_vm0, %v11754_v31  ;;  %10272 = vmatprep.subr.mxu0 %v10737_v2  ;;  %p10677_p12 = pnand %p10676_p11, %p10848_p5  ;;  %p10684_p2 = por %p10683_p1, %p10682_p0 }
 0xe56   : > { %10274 = vmatprep.mubr.msk.f32.mxu0 %vm10738_vm1, %v10737_v2 }
 0xe57   : > { %p10678_p13 = pneg %p10677_p12 }
 0xe59   : > { %p10685_p3 = pnand %p10684_p2, %p10678_p13 }
 0xede   : > { %v4774_v14 = vpop.f32.mrf.mxu0  ;;  %v4914_v17 = vpop.f32.mrf.mxu1 }
 0xedf   : > { %v4775_v24 = vadd.f32 %v9180_v20, %v4774_v14  ;;  %v4915_v33 = vadd.f32 %v9182_v22, %v4914_v17 }
 0xee0   : > { %v10140_v18 = vpop.f32.mrf.mxu0  ;;  %v10162_v19 = vpop.f32.mrf.mxu1 }
 0xee1   : > { %v4988_v30 = vmul.f32 0.35355338, %v4775_v24  ;;  %v4990_v38 = vmul.f32 0.35355338, %v4915_v33 }
 0xee7   : > { %v4844_v23 = vpop.f32.mrf.mxu0 }
 0xee8   : > { %v5082_v26 = vpop.f32.mrf.mxu1  ;;  %v4845_v45 = vadd.f32 %v9181_v39, %v4844_v23 }
 0xee9   : > { %v5083_v27 = vadd.f32 %v9188_v21, %v5082_v26  ;;  %v10151_v28 = vpop.f32.mrf.mxu0 }
 0xeea   : > { %v10184_v29 = vpop.f32.mrf.mxu1  ;;  %v4989_v54 = vmul.f32 0.35355338, %v4845_v45 }
 0xeeb   : > { %10263 = vmatpush3.xpose.msk.msra.mxu1 %vm1481_vm2, %v5083_v27 }
 0xeec   : > { %10267 = vmatprep.subr.mxu1 %v10737_v2 }
 0xeee   : > { %10265 = vmatmul.mubr.msk.f32.vlgmr.msra.gmra.mxu1 %vm1481_vm2, %v4988_v30 }
 0xeef   : > { %10269 = vmatprep.mubr.msk.f32.mxu1 %vm10738_vm1, %v10737_v2 }
 0xef1   : > { %v4984_v50 = vpop.f32.mrf.mxu0 }
 0xef2   : > { %v5222_v34 = vpop.f32.mrf.mxu1  ;;  %v4985_v57 = vadd.f32 %v9183_v55, %v4984_v50 }
 0xef3   : > { %v5223_v35 = vadd.f32 %v9190_v32, %v5222_v34  ;;  %v10173_v36 = vpop.f32.mrf.mxu0 }
 0xef4   : > { %v10206_v37 = vpop.f32.mrf.mxu1  ;;  %v4991_v0 = vmul.f32 0.35355338, %v4985_v57 }
 0xef5   : > { %10273 = vmatpush3.xpose.msk.msra.mxu0 %vm1481_vm2, %v5223_v35 }
 0xef6   : > { %10282 = vmatprep.subr.mxu0 %v10737_v2 }
 0xef8   : > { %10275 = vmatmul.mubr.msk.f32.vlgmr.msra.gmra.mxu0 %vm1481_vm2, %v4990_v38 }
 0xef9   : > { %10284 = vmatprep.mubr.msk.f32.mxu0 %vm10738_vm1, %v10737_v2 }
 0xefb   : > { %v5152_v46 = vpop.f32.mrf.mxu0 }
 0xefc   : > { %v5153_v48 = vadd.f32 %v9189_v40, %v5152_v46  ;;  %v5386_v49 = vpop.f32.mrf.mxu1 }
 0xefd   : > { %v5387_v51 = vadd.f32 %v9196_v41, %v5386_v49  ;;  %v10195_v52 = vpop.f32.mrf.mxu0 }
 0xefe   : > { %v10228_v53 = vpop.f32.mrf.mxu1  ;;  %10268 = vmatpush3.xpose.msk.msra.mxu1 %vm1481_vm2, %v5153_v48 }
 0xeff   : > { %10283 = vmatpush3.msra.mxu0 %v5387_v51  ;;  %10277 = vmatprep.subr.mxu1 %v10737_v2 }
 0xf00   : > { %10292 = vmatprep.subr.mxu0 %v10737_v2 }
 0xf01   : > { %10270 = vmatmul.mubr.msk.f32.vlgmr.msra.gmra.mxu1 %vm1481_vm2, %v4989_v54 }
 0xf02   : > { %10279 = vmatprep.mubr.msk.f32.mxu1 %vm10738_vm1, %v10737_v2 }
 0xf05   : > { %v5292_v58 = vpop.f32.mrf.mxu0 }
 0xf06   : > { %v5293_v59 = vadd.f32 %v9191_v56, %v5292_v58  ;;  %v12007_v60 = vpop.f32.mrf.mxu1  ;;  %v9198_v56 = vld [vmem:[%s12605_s5 + $0x22] ss:$0 sm:$0xff] }
 0xf07   : > { %v10217_v62 = vpop.f32.mrf.mxu0 }
 0xf08   : > { %v10250_v63 = vpop.f32.mrf.mxu1  ;;  %10278 = vmatpush3.xpose.msk.msra.mxu1 %vm1481_vm2, %v5293_v59  ;;  %v5527_v59 = vadd.f32 %v9198_v56, %v12007_v60  ;;  %v9199_v60 = vld [vmem:[%s12605_s5 + $0x23] ss:$0 sm:$0xff]  ;;  %v9221_v56 = vld [vmem:[%s12604_s4 + $0x488] sm:$0xff] }
 0xf09   : > { %10287 = vmatprep.subr.mxu1 %v10737_v2 }
 0xf0b   : > { %10280 = vmatmul.mubr.msk.f32.vlgmr.msra.gmra.mxu1 %vm1481_vm2, %v4991_v0 }
 0xf0c   : > { %10289 = vmatprep.mubr.msk.f32.mxu1 %vm10738_vm1, %v10737_v2 }
 0xf0d   : > { %v5456_v3 = vpop.f32.mrf.mxu0 }
 0xf0e   : > { %v5457_v4 = vadd.f32 %v9197_v1, %v5456_v3 }
 0xf0f   : > { %v10239_v5 = vpop.f32.mrf.mxu0 }
 0xf10   : > { %10288 = vmatpush3.msra.mxu1 %v5457_v4 }
 0xf11   : > { %10297 = vmatprep.subr.mxu1 %v10737_v2 }
 0xf15   : > { %v12018_v9 = vpop.f32.mrf.mxu0 }
 0xf16   : > { %v5597_v5 = vadd.f32 %v9199_v60, %v12018_v9  ;;  %v9177_v9 = vld [vmem:[%s12606_s6 + $0x48] sm:$0xff] }
 0xf17   : > { %v10261_v6 = vpop.f32.mrf.mxu0 }
 0xfae   : > { %v5672_v7 = vpop.f32.mrf.mxu1 }
 0xfaf   : > { %v5673_v11 = vadd.f32 %v10672_v10, %v5672_v7 }
 0xfb0   : > { %v10266_v12 = vpop.f32.mrf.mxu1 }
 0xfb1   : > { %v5904_v13 = vsel %vm1481_vm2, %v5673_v11, -inf }
 0xfb2   : > { %5905 = vmax.xlane.f32.xlu0 %v5904_v13 }
 0xfb8   : > { %v5824_v14 = vpop.f32.mrf.mxu0 }
 0xfb9   : > { %v5825_v17 = vadd.f32 %v10672_v10, %v5824_v14 }
 0xfba   : > { %v10276_v18 = vpop.f32.mrf.mxu0 }
 0xfbb   : > { %v5910_v19 = vsel %vm1481_vm2, %v5825_v17, -inf  ;;  %v9179_v18 = vld [vmem:[%s12606_s6 + $0x58] sm:$0xff] }
 0xfbc   : > { %5911 = vmax.xlane.f32.xlu0 %v5910_v19 }
 0xfc1   : > { %v5748_v20 = vpop.f32.mrf.mxu1 }
 0xfc2   : > { %v5749_v21 = vadd.f32 %v10672_v10, %v5748_v20 }
 0xfc3   : > { %v10271_v23 = vpop.f32.mrf.mxu1 }
 0xfc4   : > { %v5907_v24 = vsel %vm1481_vm2, %v5749_v21, -inf }
 0xfc5   : > { %5908 = vmax.xlane.f32.xlu1 %v5907_v24 }
 0xfcb   : > { %v5900_v26 = vpop.f32.mrf.mxu1 }
 0xfcc   : > { %v5901_v27 = vadd.f32 %v10672_v10, %v5900_v26  ;;  %v9176_v10 = vld [vmem:[%s12606_s6 + $0x40] sm:$0xff] }
 0xfcd   : > { %v10281_v28 = vpop.f32.mrf.mxu1 }
 0xfce   : > { %v5913_v29 = vsel %vm1481_vm2, %v5901_v27, -inf }
 0xfcf   : > { %5914 = vmax.xlane.f32.xlu1 %v5913_v29 }
0x103b   : > { %v5906_v30 = vpop.xlane.xlu0 %5905 }
0x103c   : > { %v5916_v22 = vsub.f32 %v5673_v11, %v5906_v30  ;;  %v9178_v11 = vld [vmem:[%s12606_s6 + $0x50] sm:$0xff] }
0x103e   : > { %v5920_v32 = vmul.f32 1.442695, %v5916_v22 }
0x1040   : > { %10634 = vpow2.f32 %v5920_v32 }
0x1045   : > { %v5912_v50 = vpop.xlane.xlu0 %5911 }
0x1046   : > { %v5918_v33 = vsub.f32 %v5825_v17, %v5912_v50 }
0x1048   : > { %v5924_v34 = vmul.f32 1.442695, %v5918_v33  ;;  %v12084_v33 = vld [vmem:[%s12607_s7 + $0x10] sm:$0xff] }
0x104a   : > { %10636 = vpow2.f32 %v5924_v34 }
0x104d   : > { %v10635_v35 = vpop.eup %10634 }
0x104e   : > { %v5909_v36 = vpop.xlane.xlu1 %5908  ;;  %v5928_v37 = vsel %vm1481_vm2, %v10635_v35, 0.0 }
0x104f   : > { %v5917_v38 = vsub.f32 %v5749_v21, %v5909_v36  ;;  %5929 = vadd.xlane.f32.xlu0 %v5928_v37  ;;  %v6542_v37 = vrot.slane %v12084_v33, %v2423_v47  ;;  %v9223_v47 = vld [vmem:[%s12604_s4 + $0x498] sm:$0xff] }
0x1051   : > { %v5922_v39 = vmul.f32 1.442695, %v5917_v38 }
0x1053   : > { %10638 = vpow2.f32 %v5922_v39 }
0x1057   : > { %v10637_v40 = vpop.eup %10636 }
0x1058   : > { %v5915_v41 = vpop.xlane.xlu1 %5914  ;;  %v5934_v45 = vsel %vm1481_vm2, %v10637_v40, 0.0 }
0x1059   : > { %v5919_v46 = vsub.f32 %v5901_v27, %v5915_v41  ;;  %5935 = vadd.xlane.f32.xlu0 %v5934_v45 }
0x105b   : > { %v5926_v48 = vmul.f32 1.442695, %v5919_v46 }
0x105d   : > { %10640 = vpow2.f32 %v5926_v48 }
0x1060   : > { %v10639_v49 = vpop.eup %10638 }
0x1061   : > { %v5931_v51 = vsel %vm1481_vm2, %v10639_v49, 0.0 }
0x1062   : > { %5932 = vadd.xlane.f32.xlu1 %v5931_v51 }
0x106a   : > { %v10641_v52 = vpop.eup %10640 }
0x106b   : > { %v5937_v53 = vsel %vm1481_vm2, %v10641_v52, 0.0 }
0x106c   : > { %5938 = vadd.xlane.f32.xlu1 %v5937_v53 }
0x10d8   : > { %v5930_v54 = vpop.xlane.xlu0 %5929 }
0x10d9   : > { %10642 = vrcp.f32 %v5930_v54  ;;  %v9227_v54 = vld [vmem:[%s12604_s4 + $0x4b8] sm:$0xff] }
0x10e2   : > { %v5936_v55 = vpop.xlane.xlu0 %5935 }
0x10e3   : > { %10644 = vrcp.f32 %v5936_v55  ;;  %v9226_v55 = vld [vmem:[%s12604_s4 + $0x4b0] sm:$0xff] }
0x10e6   : > { %v10643_v57 = vpop.eup %10642 }
0x10e7   : > { %v5944_v58 = vmul.f32 %v10643_v57, %v10635_v35  ;;  %v9225_v57 = vld [vmem:[%s12604_s4 + $0x4a8] sm:$0xff] }
0x10e9   : > { %10285 = vmatmul.mubr.msk.f32.vlgmr.msra.gmra.mxu0 %vm1481_vm2, %v5944_v58  ;;  %v9220_v58 = vld [vmem:[%s12604_s4 + $0x480] sm:$0xff] }
0x10ea   : > { %10293 = vmatpush3.msra.mxu0 %v5527_v59  ;;  %10294 = vmatprep.mubr.msk.f32.mxu0 %vm10738_vm1, %v10737_v2  ;;  %v9224_v59 = vld [vmem:[%s12604_s4 + $0x4a0] sm:$0xff] }
0x10eb   : > { %v5933_v62 = vpop.xlane.xlu1 %5932  ;;  %10302 = vmatprep.subr.mxu0 %v10737_v2 }
0x10ec   : > { %10646 = vrcp.f32 %v5933_v62 }
0x10f0   : > { %v10645_v63 = vpop.eup %10644 }
0x10f1   : > { %v5946_v0 = vmul.f32 %v10645_v63, %v10637_v40 }
0x10f3   : > { %10295 = vmatmul.mubr.msk.f32.vlgmr.msra.gmra.mxu0 %vm1481_vm2, %v5946_v0 }
0x10f4   : > { %10304 = vmatprep.mubr.msk.f32.mxu0 %vm10738_vm1, %v10737_v2  ;;  %10303 = vmatpush3.msra.mxu0 %v9176_v10  ;;  %v9235_v10 = vld [vmem:[%s12604_s4 + $0x4f8] sm:$0xff] }
0x10f5   : > { %v5939_v1 = vpop.xlane.xlu1 %5938  ;;  %10312 = vmatprep.subr.mxu0 %v10737_v2 }
0x10f6   : > { %10648 = vrcp.f32 %v5939_v1  ;;  %v6561_v1 = vrot.slane %v12084_v33, %v2443_v15  ;;  %v9230_v15 = vld [vmem:[%s12604_s4 + $0x4d0] sm:$0xff] }
0x10f9   : > { %v10647_v3 = vpop.eup %10646 }
0x10fa   : > { %v5945_v4 = vmul.f32 %v10647_v3, %v10639_v49 }
0x10fc   : > { %10290 = vmatmul.mubr.msk.f32.vlgmr.msra.gmra.mxu1 %vm1481_vm2, %v5945_v4  ;;  %v6566_v4 = vrot.slane %v12084_v33, %v2448_v16  ;;  %v9234_v16 = vld [vmem:[%s12604_s4 + $0x4f0] sm:$0xff] }
0x10fd   : > { %10298 = vmatpush3.msra.mxu1 %v5597_v5  ;;  %10299 = vmatprep.mubr.msk.f32.mxu1 %vm10738_vm1, %v10737_v2 }
0x10fe   : > { %10307 = vmatprep.subr.mxu1 %v10737_v2 }
0x1103   : > { %v10649_v6 = vpop.eup %10648 }
0x1104   : > { %v5947_v7 = vmul.f32 %v10649_v6, %v10641_v52 }
0x1106   : > { %10300 = vmatmul.mubr.msk.f32.vlgmr.msra.gmra.mxu1 %vm1481_vm2, %v5947_v7  ;;  %v9231_v7 = vld [vmem:[%s12604_s4 + $0x4d8] sm:$0xff] }
0x1107   : > { %10309 = vmatprep.mubr.msk.f32.mxu1 %vm10738_vm1, %v10737_v2  ;;  %10308 = vmatpush3.msra.mxu1 %v9177_v9  ;;  %v9229_v9 = vld [vmem:[%s12604_s4 + $0x4c8] sm:$0xff] }
0x1108   : > { %10317 = vmatprep.subr.mxu1 %v10737_v2 }
0x11a9   : > { %v6017_v12 = vpop.f32.mrf.mxu0 }
0x11aa   : > { %10305 = vmatmul.mubr.msk.f32.vlgmr.msra.gmra.mxu0 %vm1481_vm2, %v6017_v12  ;;  %v9228_v12 = vld [vmem:[%s12604_s4 + $0x4c0] sm:$0xff] }
0x11ab   : > { %v10286_v13 = vpop.f32.mrf.mxu0  ;;  %10313 = vmatpush3.msra.mxu0 %v9178_v11  ;;  %10314 = vmatprep.mubr.msk.f32.mxu0 %vm10738_vm1, %v10737_v2  ;;  %v9233_v11 = vld [vmem:[%s12604_s4 + $0x4e8] sm:$0xff] }
0x11ac   : > { %10322 = vmatprep.subr.mxu0 %v10737_v2  ;;  %v9232_v13 = vld [vmem:[%s12604_s4 + $0x4e0] sm:$0xff] }
0x11b3   : > { %v6163_v14 = vpop.f32.mrf.mxu0 }
0x11b4   : > { %10315 = vmatmul.mubr.msk.f32.vlgmr.msra.gmra.mxu0 %vm1481_vm2, %v6163_v14  ;;  %v9239_v14 = vld [vmem:[%s12604_s4 + $0x518] sm:$0xff] }
0x11b5   : > { %v10296_v17 = vpop.f32.mrf.mxu0  ;;  %10330 = vmatprep.mubr.msk.f32.mxu0 %vm10738_vm1, %v10737_v2  ;;  %10323 = vmatpush3.msra.mxu0 %v9223_v47  ;;  %v9260_v47 = vld [vmem:[%s12604_s4 + $0x5c0] sm:$0xff] }
0x11b6   : > { %10324 = vmatprep.subr.mxu0 %v10737_v2  ;;  %v9243_v17 = vld [vmem:[%s12604_s4 + $0x538] sm:$0xff] }
0x11bc   : > { %v6090_v19 = vpop.f32.mrf.mxu1 }
0x11bd   : > { %10310 = vmatmul.mubr.msk.f32.vlgmr.msra.gmra.mxu1 %vm1481_vm2, %v6090_v19  ;;  %v9242_v19 = vld [vmem:[%s12604_s4 + $0x530] sm:$0xff] }
0x11be   : > { %v10291_v20 = vpop.f32.mrf.mxu1  ;;  %10318 = vmatpush3.msra.mxu1 %v9179_v18  ;;  %10319 = vmatprep.mubr.msk.f32.mxu1 %vm10738_vm1, %v10737_v2  ;;  %v9238_v18 = vld [vmem:[%s12604_s4 + $0x510] sm:$0xff] }
0x11bf   : > { %10333 = vmatprep.subr.mxu1 %v10737_v2  ;;  %v9237_v20 = vld [vmem:[%s12604_s4 + $0x508] sm:$0xff] }
0x11c6   : > { %v6236_v21 = vpop.f32.mrf.mxu1 }
0x11c7   : > { %10320 = vmatmul.mubr.msk.f32.vlgmr.msra.gmra.mxu1 %vm1481_vm2, %v6236_v21  ;;  %v9241_v21 = vld [vmem:[%s12604_s4 + $0x528] sm:$0xff] }
0x11c8   : > { %v10301_v23 = vpop.f32.mrf.mxu1  ;;  %10341 = vmatprep.mubr.msk.f32.mxu1 %vm10738_vm1, %v10737_v2  ;;  %10334 = vmatpush3.msra.mxu1 %v9227_v54  ;;  %v9264_v54 = vld [vmem:[%s12604_s4 + $0x5e0] sm:$0xff] }
0x11c9   : > { %10335 = vmatprep.subr.mxu1 %v10737_v2  ;;  %v9236_v23 = vld [vmem:[%s12604_s4 + $0x500] sm:$0xff] }
0x11ca   : > { %10336 = vmatpush3.msra.mxu1 %v9226_v55 }
0x11cb   : > { %10337 = vmatprep.subr.mxu1 %v10737_v2 }
0x11cc   : > { %10338 = vmatpush3.msra.mxu1 %v9225_v57 }
0x11cd   : > { %10339 = vmatprep.subr.mxu1 %v10737_v2 }
0x11ce   : > { %10340 = vmatpush3.msra.mxu1 %v9224_v59 }
0x11cf   : > { %10355 = vmatprep.subr.mxu1 %v10737_v2 }
0x126a   : > { %v6309_v24 = vpop.f32.mrf.mxu0 }
0x126b   : > { %v6532_v32 = vsel %vm585_vm0, %v6309_v24, 0.0  ;;  %v9240_v24 = vld [vmem:[%s12604_s4 + $0x520] sm:$0xff] }
0x126c   : > { %v10306_v26 = vpop.f32.mrf.mxu0 }
0x126d   : > { %v9247_v26 = vld [vmem:[%s12604_s4 + $0x558] sm:$0xff] }
0x1274   : > { %v6455_v27 = vpop.f32.mrf.mxu0 }
0x1275   : > { %v6535_v34 = vsel %vm585_vm0, %v6455_v27, 0.0  ;;  %v9251_v27 = vld [vmem:[%s12604_s4 + $0x578] sm:$0xff] }
0x1276   : > { %v10316_v28 = vpop.f32.mrf.mxu0 }
0x1277   : > { %v12219_v28 = vld [vmem:[%s11363_s2] sm:$0xff] }
0x127d   : > { %v6382_v29 = vpop.f32.mrf.mxu1 }
0x127e   : > { %v6533_v22 = vsel %vm585_vm0, %v6382_v29, 0.0  ;;  %v9246_v29 = vld [vmem:[%s12604_s4 + $0x550] sm:$0xff] }
0x127f   : > { %v10311_v30 = vpop.f32.mrf.mxu1  ;;  %v6534_v50 = vadd.f32 %v6533_v22, %v6532_v32  ;;  %v9245_v22 = vld [vmem:[%s12604_s4 + $0x548] sm:$0xff] }
0x1280   : > { %v9250_v30 = vld [vmem:[%s12604_s4 + $0x570] sm:$0xff]  ;;  %v9249_v32 = vld [vmem:[%s12604_s4 + $0x568] sm:$0xff] }
0x1281   : > { %v6536_v36 = vadd.f32 %v6535_v34, %v6534_v50  ;;  %v9244_v50 = vld [vmem:[%s12604_s4 + $0x540] sm:$0xff] }
0x1282   : > { %v9248_v34 = vld [vmem:[%s12604_s4 + $0x560] sm:$0xff] }
0x1287   : > { %v6528_v35 = vpop.f32.mrf.mxu1 }
0x1288   : > { %v6537_v38 = vsel %vm585_vm0, %v6528_v35, 0.0  ;;  %v9255_v35 = vld [vmem:[%s12604_s4 + $0x598] sm:$0xff] }
0x1289   : > { %v6538_v39 = vadd.f32 %v6537_v38, %v6536_v36  ;;  %v10321_v40 = vpop.f32.mrf.mxu1  ;;  %v9259_v36 = vld [vmem:[%s12604_s4 + $0x5b8] sm:$0xff]  ;;  %v9258_v38 = vld [vmem:[%s12604_s4 + $0x5b0] sm:$0xff] }
0x128a   : > { %v9257_v40 = vld [vmem:[%s12604_s4 + $0x5a8] sm:$0xff] }
0x128b   : > { %v6543_v41 = vadd.f32 %v6542_v37, %v6538_v39  ;;  %v9254_v37 = vld [vmem:[%s12604_s4 + $0x590] sm:$0xff]  ;;  %v9253_v39 = vld [vmem:[%s12604_s4 + $0x588] sm:$0xff] }
0x128d   : > { %v6544_v45 = vadd.f32 %v6543_v41, %v11754_v31  ;;  %v9222_v31 = vld [vmem:[%s12604_s4 + $0x490] sm:$0xff]  ;;  %v9252_v41 = vld [vmem:[%s12604_s4 + $0x580] sm:$0xff] }
0x128e   : > { %10325 = vmatpush3.msra.mxu0 %v9222_v31 }
0x128f   : > { %v6545_v46 = vsel %vm585_vm0, %v6544_v45, 0.0  ;;  %10326 = vmatprep.subr.mxu0 %v10737_v2 }
0x1290   : > { %6546 = vadd.xlane.f32.xlu0 %v6545_v46  ;;  %10327 = vmatpush3.msra.mxu0 %v9221_v56  ;;  %v9263_v46 = vld [vmem:[%s12604_s4 + $0x5d8] sm:$0xff] }
0x1291   : > { %10328 = vmatprep.subr.mxu0 %v10737_v2 }
0x1292   : > { %10329 = vmatpush3.msra.mxu0 %v9220_v58 }
0x1293   : > { %10344 = vmatprep.subr.mxu0 %v10737_v2 }
0x1319   : > { %v6547_v48 = vpop.xlane.xlu0 %6546 }
0x131a   : > { %v6548_v49 = vmul.f32 0.03125, %v6547_v48  ;;  %v9267_v48 = vld [vmem:[%s12604_s4 + $0x5f8] sm:$0xff] }
0x131c   : > { %v6549_v51 = vsub.f32 %v6544_v45, %v6548_v49  ;;  %v9256_v45 = vld [vmem:[%s12604_s4 + $0x5a0] sm:$0xff]  ;;  %v9262_v49 = vld [vmem:[%s12604_s4 + $0x5d0] sm:$0xff] }
0x131e   : > { %v6550_v52 = vmul.f32 %v6549_v51, %v6549_v51 }
0x1320   : > { %v6551_v53 = vsel %vm585_vm0, %v6550_v52, 0.0  ;;  %v9261_v52 = vld [vmem:[%s12604_s4 + $0x5c8] sm:$0xff] }
0x1321   : > { %6552 = vadd.xlane.f32.xlu1 %v6551_v53  ;;  %v9265_v53 = vld [vmem:[%s12604_s4 + $0x5e8] sm:$0xff] }
0x13aa   : > { %v6553_v62 = vpop.xlane.xlu1 %6552 }
0x13ab   : > { %v6554_v63 = vmul.f32 0.03125, %v6553_v62 }
0x13ad   : > { %v6555_v0 = vadd.f32 1e-05, %v6554_v63 }
0x13af   : > { %10650 = vrsqrt.f32 %v6555_v0  ;;  %v9284_v0 = vld [vmem:[%s12605_s5 + $0x24] ss:$0 sm:$0xff] }
0x13bc   : > { %v10651_v60 = vpop.eup %10650 }
0x13bd   : > { %v6557_v3 = vmul.f32 %v10651_v60, %v6549_v51  ;;  %v9266_v51 = vld [vmem:[%s12604_s4 + $0x5f0] sm:$0xff]  ;;  %v9292_v60 = vld [vmem:[%s12605_s5 + $0x28] ss:$0 sm:$0xff] }
0x13bf   : > { %v6562_v5 = vmul.f32 %v6561_v1, %v6557_v3  ;;  %v9285_v1 = vld [vmem:[%s12605_s5 + $0x25] ss:$0 sm:$0xff]  ;;  %v9293_v3 = vld [vmem:[%s12605_s5 + $0x29] ss:$0 sm:$0xff] }
0x13c1   : > { %v12132_v6 = vadd.f32 %v6566_v4, %v6562_v5 }
0x13c3   : > { %10331 = vmatmul.mubr.msk.f32.vlgmr.msra.gmra.mxu0 %vm585_vm0, %v12132_v6  ;;  %10342 = vmatmul.mubr.msk.f32.vlgmr.msra.gmra.mxu1 %vm585_vm0, %v12132_v6 }
0x13c4   : > { %10345 = vmatpush3.msra.mxu0 %v9231_v7  ;;  %10356 = vmatpush3.msra.mxu1 %v9235_v10 }
0x13c5   : > { %10346 = vmatprep.subr.mxu0 %v10737_v2  ;;  %10357 = vmatprep.subr.mxu1 %v10737_v2 }
0x13c6   : > { %10347 = vmatpush3.msra.mxu0 %v9230_v15  ;;  %10358 = vmatpush3.msra.mxu1 %v9234_v16 }
0x13c7   : > { %10348 = vmatprep.subr.mxu0 %v10737_v2  ;;  %10359 = vmatprep.subr.mxu1 %v10737_v2 }
0x13c8   : > { %10349 = vmatpush3.msra.mxu0 %v9229_v9  ;;  %10360 = vmatpush3.msra.mxu1 %v9233_v11 }
0x13c9   : > { %10350 = vmatprep.subr.mxu0 %v10737_v2  ;;  %10361 = vmatprep.subr.mxu1 %v10737_v2 }
0x13ca   : > { %10351 = vmatpush3.msra.mxu0 %v9228_v12  ;;  %10352 = vmatprep.mubr.msk.f32.mxu0 %vm10738_vm1, %v10737_v2 }
0x13cb   : > { %10362 = vmatpush3.msra.mxu1 %v9232_v13  ;;  %10363 = vmatprep.mubr.msk.f32.mxu1 %vm10738_vm1, %v10737_v2 }
0x13cc   : > { %10353 = vmatmul.mubr.msk.f32.vlgmr.msra.gmra.mxu0 %vm585_vm0, %v12132_v6  ;;  %10364 = vmatmul.mubr.msk.f32.vlgmr.msra.gmra.mxu1 %vm585_vm0, %v12132_v6 }
0x13cd   : > { %10366 = vmatprep.subr.mxu0 %v10737_v2  ;;  %10377 = vmatprep.subr.mxu1 %v10737_v2 }
0x13ce   : > { %10367 = vmatpush3.msra.mxu0 %v9239_v14  ;;  %10378 = vmatpush3.msra.mxu1 %v9243_v17  ;;  %v9286_v14 = vld [vmem:[%s12605_s5 + $0x26] ss:$0 sm:$0xff]  ;;  %v9287_v17 = vld [vmem:[%s12605_s5 + $0x27] ss:$0 sm:$0xff] }
0x13cf   : > { %10368 = vmatprep.subr.mxu0 %v10737_v2  ;;  %10379 = vmatprep.subr.mxu1 %v10737_v2 }
0x13d0   : > { %10369 = vmatpush3.msra.mxu0 %v9238_v18  ;;  %10380 = vmatpush3.msra.mxu1 %v9242_v19  ;;  %v9294_v18 = vld [vmem:[%s12605_s5 + $0x2a] ss:$0 sm:$0xff]  ;;  %v9295_v19 = vld [vmem:[%s12605_s5 + $0x2b] ss:$0 sm:$0xff] }
0x13d1   : > { %10370 = vmatprep.subr.mxu0 %v10737_v2  ;;  %10381 = vmatprep.subr.mxu1 %v10737_v2 }
0x13d2   : > { %10371 = vmatpush3.msra.mxu0 %v9237_v20  ;;  %10382 = vmatpush3.msra.mxu1 %v9241_v21 }
0x13d3   : > { %10372 = vmatprep.subr.mxu0 %v10737_v2  ;;  %10383 = vmatprep.subr.mxu1 %v10737_v2 }
0x13d4   : > { %10373 = vmatpush3.msra.mxu0 %v9236_v23  ;;  %10374 = vmatprep.mubr.msk.f32.mxu0 %vm10738_vm1, %v10737_v2 }
0x13d5   : > { %10384 = vmatpush3.msra.mxu1 %v9240_v24  ;;  %10385 = vmatprep.mubr.msk.f32.mxu1 %vm10738_vm1, %v10737_v2 }
0x13d6   : > { %10375 = vmatmul.mubr.msk.f32.vlgmr.msra.gmra.mxu0 %vm585_vm0, %v12219_v28  ;;  %10386 = vmatmul.mubr.msk.f32.vlgmr.msra.gmra.mxu1 %vm585_vm0, %v12219_v28 }
0x13d7   : > { %10388 = vmatprep.subr.mxu0 %v10737_v2  ;;  %10399 = vmatprep.subr.mxu1 %v10737_v2 }
0x13d8   : > { %10389 = vmatpush3.msra.mxu0 %v9247_v26  ;;  %10400 = vmatpush3.msra.mxu1 %v9251_v27 }
0x13d9   : > { %10390 = vmatprep.subr.mxu0 %v10737_v2  ;;  %10401 = vmatprep.subr.mxu1 %v10737_v2 }
0x13da   : > { %10391 = vmatpush3.msra.mxu0 %v9246_v29  ;;  %10402 = vmatpush3.msra.mxu1 %v9250_v30 }
0x13db   : > { %10392 = vmatprep.subr.mxu0 %v10737_v2  ;;  %10403 = vmatprep.subr.mxu1 %v10737_v2 }
0x13dc   : > { %10393 = vmatpush3.msra.mxu0 %v9245_v22  ;;  %10404 = vmatpush3.msra.mxu1 %v9249_v32  ;;  %v9300_v32 = vld [vmem:[%s12605_s5 + $0x2c] ss:$0 sm:$0xff] }
0x13dd   : > { %10394 = vmatprep.subr.mxu0 %v10737_v2  ;;  %10405 = vmatprep.subr.mxu1 %v10737_v2 }
0x13de   : > { %10395 = vmatpush3.msra.mxu0 %v9244_v50  ;;  %10396 = vmatprep.mubr.msk.f32.mxu0 %vm10738_vm1, %v10737_v2  ;;  %v9301_v50 = vld [vmem:[%s12605_s5 + $0x2d] ss:$0 sm:$0xff] }
0x13df   : > { %10406 = vmatpush3.msra.mxu1 %v9248_v34  ;;  %10407 = vmatprep.mubr.msk.f32.mxu1 %vm10738_vm1, %v10737_v2 }
0x13e0   : > { %10397 = vmatmul.mubr.msk.f32.vlgmr.msra.gmra.mxu0 %vm585_vm0, %v12219_v28  ;;  %10408 = vmatmul.mubr.msk.f32.vlgmr.msra.gmra.mxu1 %vm585_vm0, %v12219_v28 }
0x13e1   : > { %10410 = vmatprep.subr.mxu0 %v10737_v2  ;;  %10421 = vmatprep.subr.mxu1 %v10737_v2 }
0x13e2   : > { %10418 = vmatprep.mubr.msk.f32.mxu0 %vm10738_vm1, %v10737_v2  ;;  %10429 = vmatprep.mubr.msk.f32.mxu1 %vm10738_vm1, %v10737_v2 }
0x13e3   : > { %10411 = vmatpush3.msra.mxu0 %v9255_v35  ;;  %10422 = vmatpush3.msra.mxu1 %v9259_v36 }
0x13e4   : > { %10412 = vmatprep.subr.mxu0 %v10737_v2  ;;  %10423 = vmatprep.subr.mxu1 %v10737_v2 }
0x13e5   : > { %10413 = vmatpush3.msra.mxu0 %v9254_v37  ;;  %10424 = vmatpush3.msra.mxu1 %v9258_v38 }
0x13e6   : > { %10414 = vmatprep.subr.mxu0 %v10737_v2  ;;  %10425 = vmatprep.subr.mxu1 %v10737_v2 }
0x13e7   : > { %10415 = vmatpush3.msra.mxu0 %v9253_v39  ;;  %10426 = vmatpush3.msra.mxu1 %v9257_v40 }
0x13e8   : > { %10416 = vmatprep.subr.mxu0 %v10737_v2  ;;  %10427 = vmatprep.subr.mxu1 %v10737_v2 }
0x13e9   : > { %10417 = vmatpush3.msra.mxu0 %v9252_v41  ;;  %10428 = vmatpush3.msra.mxu1 %v9256_v45 }
0x13ea   : > { %10432 = vmatprep.subr.mxu0 %v10737_v2  ;;  %10443 = vmatprep.subr.mxu1 %v10737_v2 }
0x13eb   : > { %10419 = vmatmul.mubr.msk.f32.vlgmr.msra.gmra.mxu0 %vm585_vm0, %v12219_v28  ;;  %10430 = vmatmul.mubr.msk.f32.vlgmr.msra.gmra.mxu1 %vm585_vm0, %v12219_v28 }
0x13ec   : > { %10433 = vmatpush3.msra.mxu0 %v9263_v46  ;;  %10444 = vmatpush3.msra.mxu1 %v9267_v48 }
0x13ed   : > { %10434 = vmatprep.subr.mxu0 %v10737_v2  ;;  %10445 = vmatprep.subr.mxu1 %v10737_v2 }
0x13ee   : > { %10435 = vmatpush3.msra.mxu0 %v9262_v49  ;;  %10446 = vmatpush3.msra.mxu1 %v9266_v51  ;;  %v10674_v51 = vld [vmem:[%s11572_s23] sm:$0xff] }
0x13ef   : > { %10436 = vmatprep.subr.mxu0 %v10737_v2  ;;  %10447 = vmatprep.subr.mxu1 %v10737_v2 }
0x13f0   : > { %10437 = vmatpush3.msra.mxu0 %v9261_v52  ;;  %10448 = vmatpush3.msra.mxu1 %v9265_v53 }
0x13f1   : > { %10438 = vmatprep.subr.mxu0 %v10737_v2  ;;  %10449 = vmatprep.subr.mxu1 %v10737_v2 }
0x13f2   : > { %10439 = vmatpush3.msra.mxu0 %v9260_v47  ;;  %10440 = vmatprep.mubr.msk.f32.mxu0 %vm10738_vm1, %v10737_v2 }
0x13f3   : > { %10450 = vmatpush3.msra.mxu1 %v9264_v54  ;;  %10451 = vmatprep.mubr.msk.f32.mxu1 %vm10738_vm1, %v10737_v2 }
0x13f4   : > { %10441 = vmatmul.mubr.msk.f32.vlgmr.msra.gmra.mxu0 %vm585_vm0, %v12219_v28  ;;  %10452 = vmatmul.mubr.msk.f32.vlgmr.msra.gmra.mxu1 %vm585_vm0, %v12219_v28 }
0x13f5   : > { %10454 = vmatprep.subr.mxu0 %v10737_v2  ;;  %10459 = vmatprep.subr.mxu1 %v10737_v2 }
0x13f6   : > { %10456 = vmatprep.mubr.msk.f32.mxu0 %vm10738_vm1, %v10737_v2  ;;  %10461 = vmatprep.mubr.msk.f32.mxu1 %vm10738_vm1, %v10737_v2 }
0x1483   : > { %v6732_v31 = vpop.f32.mrf.mxu0  ;;  %v6802_v55 = vpop.f32.mrf.mxu1 }
0x1484   : > { %v6733_v4 = vadd.f32 %v9284_v0, %v6732_v31  ;;  %v6803_v5 = vadd.f32 %v9285_v1, %v6802_v55 }
0x1485   : > { %v10332_v56 = vpop.f32.mrf.mxu0  ;;  %v10343_v57 = vpop.f32.mrf.mxu1 }
0x1486   : > { %v6946_v12 = vmul.f32 0.35355338, %v6733_v4  ;;  %v6947_v13 = vmul.f32 0.35355338, %v6803_v5 }
0x148c   : > { %v6872_v58 = vpop.f32.mrf.mxu0  ;;  %v6942_v59 = vpop.f32.mrf.mxu1 }
0x148d   : > { %v6873_v20 = vadd.f32 %v9286_v14, %v6872_v58  ;;  %v6943_v21 = vadd.f32 %v9287_v17, %v6942_v59 }
0x148e   : > { %v10354_v62 = vpop.f32.mrf.mxu0  ;;  %v10365_v63 = vpop.f32.mrf.mxu1 }
0x148f   : > { %v6948_v30 = vmul.f32 0.35355338, %v6873_v20  ;;  %v6949_v22 = vmul.f32 0.35355338, %v6943_v21 }
0x1496   : > { %v7040_v7 = vpop.f32.mrf.mxu0  ;;  %v7110_v10 = vpop.f32.mrf.mxu1 }
0x1497   : > { %v7041_v15 = vadd.f32 %v9292_v60, %v7040_v7  ;;  %v7111_v16 = vadd.f32 %v9293_v3, %v7110_v10 }
0x1498   : > { %v10376_v9 = vpop.f32.mrf.mxu0  ;;  %v10387_v11 = vpop.f32.mrf.mxu1 }
0x1499   : > { %10455 = vmatpush3.xpose.msk.msra.mxu0 %vm1481_vm2, %v7041_v15  ;;  %10460 = vmatpush3.xpose.msk.msra.mxu1 %vm1481_vm2, %v7111_v16 }
0x149a   : > { %10464 = vmatprep.subr.mxu0 %v10737_v2  ;;  %10469 = vmatprep.subr.mxu1 %v10737_v2 }
0x149c   : > { %10457 = vmatmul.mubr.msk.f32.vlgmr.msra.gmra.mxu0 %vm1481_vm2, %v6946_v12  ;;  %10462 = vmatmul.mubr.msk.f32.vlgmr.msra.gmra.mxu1 %vm1481_vm2, %v6947_v13 }
0x149d   : > { %10466 = vmatprep.mubr.msk.f32.mxu0 %vm10738_vm1, %v10737_v2  ;;  %10471 = vmatprep.mubr.msk.f32.mxu1 %vm10738_vm1, %v10737_v2 }
0x14a0   : > { %v7180_v23 = vpop.f32.mrf.mxu0  ;;  %v7250_v24 = vpop.f32.mrf.mxu1 }
0x14a1   : > { %v7181_v26 = vadd.f32 %v9294_v18, %v7180_v23  ;;  %v7251_v27 = vadd.f32 %v9295_v19, %v7250_v24 }
0x14a2   : > { %v10398_v28 = vpop.f32.mrf.mxu0  ;;  %v10409_v29 = vpop.f32.mrf.mxu1 }
0x14a3   : > { %10465 = vmatpush3.xpose.msk.msra.mxu0 %vm1481_vm2, %v7181_v26  ;;  %10470 = vmatpush3.xpose.msk.msra.mxu1 %vm1481_vm2, %v7251_v27 }
0x14a4   : > { %10474 = vmatprep.subr.mxu0 %v10737_v2  ;;  %10479 = vmatprep.subr.mxu1 %v10737_v2 }
0x14a6   : > { %10467 = vmatmul.mubr.msk.f32.vlgmr.msra.gmra.mxu0 %vm1481_vm2, %v6948_v30  ;;  %10472 = vmatmul.mubr.msk.f32.vlgmr.msra.gmra.mxu1 %vm1481_vm2, %v6949_v22  ;;  %v9303_v30 = vld [vmem:[%s12605_s5 + $0x2f] ss:$0 sm:$0xff] }
0x14a7   : > { %10476 = vmatprep.mubr.msk.f32.mxu0 %vm10738_vm1, %v10737_v2  ;;  %10481 = vmatprep.mubr.msk.f32.mxu1 %vm10738_vm1, %v10737_v2 }
0x14ab   : > { %v7344_v34 = vpop.f32.mrf.mxu0  ;;  %v7414_v35 = vpop.f32.mrf.mxu1 }
0x14ac   : > { %v7345_v36 = vadd.f32 %v9300_v32, %v7344_v34  ;;  %v7415_v37 = vadd.f32 %v9301_v50, %v7414_v35  ;;  %v9302_v32 = vld [vmem:[%s12605_s5 + $0x2e] ss:$0 sm:$0xff] }
0x14ad   : > { %v10420_v38 = vpop.f32.mrf.mxu0  ;;  %v10431_v39 = vpop.f32.mrf.mxu1 }
0x14ae   : > { %10475 = vmatpush3.msra.mxu0 %v7345_v36  ;;  %10480 = vmatpush3.msra.mxu1 %v7415_v37 }
0x14af   : > { %10484 = vmatprep.subr.mxu0 %v10737_v2  ;;  %10489 = vmatprep.subr.mxu1 %v10737_v2 }
0x14b4   : > { %v12397_v40 = vpop.f32.mrf.mxu0  ;;  %v12399_v41 = vpop.f32.mrf.mxu1 }
0x14b5   : > { %v7555_v35 = vadd.f32 %v9303_v30, %v12399_v41  ;;  %v7485_v37 = vadd.f32 %v9302_v32, %v12397_v40 }
0x14b6   : > { %v10442_v45 = vpop.f32.mrf.mxu0  ;;  %v10453_v46 = vpop.f32.mrf.mxu1 }
0x14b7   : > { %v9280_v45 = vld [vmem:[%s12606_s6 + $0x60] sm:$0xff]  ;;  %v9281_v46 = vld [vmem:[%s12606_s6 + $0x68] sm:$0xff] }
0x155c   : > { %v7630_v48 = vpop.f32.mrf.mxu0  ;;  %v7706_v49 = vpop.f32.mrf.mxu1 }
0x155d   : > { %v7631_v52 = vadd.f32 %v10674_v51, %v7630_v48  ;;  %v7707_v53 = vadd.f32 %v10674_v51, %v7706_v49  ;;  %v9283_v48 = vld [vmem:[%s12606_s6 + $0x78] sm:$0xff] }
0x155e   : > { %v10458_v47 = vpop.f32.mrf.mxu0  ;;  %v10463_v54 = vpop.f32.mrf.mxu1 }
0x155f   : > { %v7865_v31 = vsel %vm1481_vm2, %v7707_v53, -inf  ;;  %v7862_v55 = vsel %vm1481_vm2, %v7631_v52, -inf }
0x1560   : > { %7866 = vmax.xlane.f32.xlu1 %v7865_v31  ;;  %7863 = vmax.xlane.f32.xlu0 %v7862_v55 }
0x1566   : > { %v7782_v56 = vpop.f32.mrf.mxu0  ;;  %v7858_v57 = vpop.f32.mrf.mxu1 }
0x1567   : > { %v7783_v58 = vadd.f32 %v10674_v51, %v7782_v56  ;;  %v7859_v59 = vadd.f32 %v10674_v51, %v7858_v57  ;;  %v9282_v51 = vld [vmem:[%s12606_s6 + $0x70] sm:$0xff] }
0x1568   : > { %v10468_v62 = vpop.f32.mrf.mxu0  ;;  %v10473_v63 = vpop.f32.mrf.mxu1 }
0x1569   : > { %v7871_v0 = vsel %vm1481_vm2, %v7859_v59, -inf  ;;  %v7868_v1 = vsel %vm1481_vm2, %v7783_v58, -inf }
0x156a   : > { %7872 = vmax.xlane.f32.xlu1 %v7871_v0  ;;  %7869 = vmax.xlane.f32.xlu0 %v7868_v1 }
0x15e9   : > { %v7867_v60 = vpop.xlane.xlu1 %7866  ;;  %v7864_v3 = vpop.xlane.xlu0 %7863 }
0x15ea   : > { %v7875_v4 = vsub.f32 %v7707_v53, %v7867_v60  ;;  %v7874_v5 = vsub.f32 %v7631_v52, %v7864_v3 }
0x15ec   : > { %v7880_v7 = vmul.f32 1.442695, %v7875_v4  ;;  %v7878_v10 = vmul.f32 1.442695, %v7874_v5 }
0x15ee   : > { %10652 = vpow2.f32 %v7880_v7 }
0x15ef   : > { %10654 = vpow2.f32 %v7878_v10  ;;  %v8500_v10 = vrot.slane %v12084_v33, %v4385_v8  ;;  %v9327_v8 = vld [vmem:[%s12608_s8 + $0x38] sm:$0xff] }
0x15f3   : > { %v7873_v15 = vpop.xlane.xlu1 %7872  ;;  %v7870_v16 = vpop.xlane.xlu0 %7869 }
0x15f4   : > { %v7877_v9 = vsub.f32 %v7859_v59, %v7873_v15  ;;  %v7876_v11 = vsub.f32 %v7783_v58, %v7870_v16 }
0x15f6   : > { %v7884_v12 = vmul.f32 1.442695, %v7877_v9  ;;  %v7882_v13 = vmul.f32 1.442695, %v7876_v11 }
0x15f8   : > { %10656 = vpow2.f32 %v7884_v12 }
0x15f9   : > { %10658 = vpow2.f32 %v7882_v13 }
0x15fb   : > { %v10653_v14 = vpop.eup %10652 }
0x15fc   : > { %v10655_v17 = vpop.eup %10654  ;;  %v7889_v18 = vsel %vm1481_vm2, %v10653_v14, 0.0 }
0x15fd   : > { %7890 = vadd.xlane.f32.xlu1 %v7889_v18  ;;  %v7886_v19 = vsel %vm1481_vm2, %v10655_v17, 0.0 }
0x15fe   : > { %7887 = vadd.xlane.f32.xlu0 %v7886_v19 }
0x1605   : > { %v10657_v20 = vpop.eup %10656 }
0x1606   : > { %v10659_v21 = vpop.eup %10658  ;;  %v7895_v23 = vsel %vm1481_vm2, %v10657_v20, 0.0 }
0x1607   : > { %7896 = vadd.xlane.f32.xlu1 %v7895_v23  ;;  %v7892_v24 = vsel %vm1481_vm2, %v10659_v21, 0.0  ;;  %v9324_v23 = vld [vmem:[%s12608_s8 + $0x20] sm:$0xff] }
0x1608   : > { %7893 = vadd.xlane.f32.xlu0 %v7892_v24  ;;  %v9338_v24 = vld [vmem:[%s12610_s10 + $0x78] sm:$0xff] }
0x1686   : > { %v7891_v26 = vpop.xlane.xlu1 %7890 }
0x1687   : > { %10660 = vrcp.f32 %v7891_v26  ;;  %v7888_v27 = vpop.xlane.xlu0 %7887  ;;  %v9337_v26 = vld [vmem:[%s12610_s10 + $0x70] sm:$0xff] }
0x1688   : > { %10662 = vrcp.f32 %v7888_v27  ;;  %v9336_v27 = vld [vmem:[%s12610_s10 + $0x68] sm:$0xff] }
0x1690   : > { %v7897_v28 = vpop.xlane.xlu1 %7896 }
0x1691   : > { %10664 = vrcp.f32 %v7897_v28  ;;  %v7894_v29 = vpop.xlane.xlu0 %7893  ;;  %v9335_v28 = vld [vmem:[%s12610_s10 + $0x60] sm:$0xff] }
0x1692   : > { %10666 = vrcp.f32 %v7894_v29  ;;  %v9334_v29 = vld [vmem:[%s12610_s10 + $0x58] sm:$0xff] }
0x1694   : > { %v10661_v22 = vpop.eup %10660 }
0x1695   : > { %v10663_v50 = vpop.eup %10662  ;;  %v7903_v34 = vmul.f32 %v10661_v22, %v10653_v14 }
0x1696   : > { %v7902_v36 = vmul.f32 %v10663_v50, %v10655_v17  ;;  %v8519_v50 = vrot.slane %v12084_v33, %v4404_v42  ;;  %v9332_v42 = vld [vmem:[%s12610_s10 + $0x48] sm:$0xff] }
0x1697   : > { %10482 = vmatmul.mubr.msk.f32.vlgmr.msra.gmra.mxu1 %vm1481_vm2, %v7903_v34 }
0x1698   : > { %10477 = vmatmul.mubr.msk.f32.vlgmr.msra.gmra.mxu0 %vm1481_vm2, %v7902_v36  ;;  %10490 = vmatpush3.msra.mxu1 %v7555_v35  ;;  %v8524_v36 = vrot.slane %v12084_v33, %v4409_v43  ;;  %v9331_v43 = vld [vmem:[%s12610_s10 + $0x40] sm:$0xff] }
0x1699   : > { %10485 = vmatpush3.msra.mxu0 %v7485_v37  ;;  %10486 = vmatprep.mubr.msk.f32.mxu0 %vm10738_vm1, %v10737_v2 }
0x169a   : > { %10491 = vmatprep.mubr.msk.f32.mxu1 %vm10738_vm1, %v10737_v2  ;;  %10494 = vmatprep.subr.mxu0 %v10737_v2 }
0x169b   : > { %10499 = vmatprep.subr.mxu1 %v10737_v2 }
0x169e   : > { %v10665_v38 = vpop.eup %10664 }
0x169f   : > { %v10667_v39 = vpop.eup %10666  ;;  %v7905_v41 = vmul.f32 %v10665_v38, %v10657_v20 }
0x16a0   : > { %v7904_v40 = vmul.f32 %v10667_v39, %v10659_v21  ;;  %v9325_v21 = vld [vmem:[%s12608_s8 + $0x28] sm:$0xff]  ;;  %v9333_v39 = vld [vmem:[%s12610_s10 + $0x50] sm:$0xff] }
0x16a1   : > { %10492 = vmatmul.mubr.msk.f32.vlgmr.msra.gmra.mxu1 %vm1481_vm2, %v7905_v41  ;;  %v9329_v41 = vld [vmem:[%s12609_s9 + $0x1] ss:$0 sm:$0xff] }
0x16a2   : > { %10487 = vmatmul.mubr.msk.f32.vlgmr.msra.gmra.mxu0 %vm1481_vm2, %v7904_v40  ;;  %10501 = vmatprep.mubr.msk.f32.mxu1 %vm10738_vm1, %v10737_v2 }
0x16a3   : > { %10496 = vmatprep.mubr.msk.f32.mxu0 %vm10738_vm1, %v10737_v2  ;;  %10495 = vmatpush3.msra.mxu0 %v9280_v45 }
0x16a4   : > { %10500 = vmatpush3.msra.mxu1 %v9281_v46  ;;  %10504 = vmatprep.subr.mxu0 %v10737_v2 }
0x16a5   : > { %10509 = vmatprep.subr.mxu1 %v10737_v2 }
0x1757   : > { %v8048_v49 = vpop.f32.mrf.mxu1 }
0x1758   : > { %v7975_v52 = vpop.f32.mrf.mxu0  ;;  %10502 = vmatmul.mubr.msk.f32.vlgmr.msra.gmra.mxu1 %vm1481_vm2, %v8048_v49  ;;  %v8625_v49 = vrot.slane %v12084_v33, %v4507_v61  ;;  %v8725_v61 = vld [vmem:[%s12611_s11 + $0x10] sm:$0xff] }
0x1759   : > { %10497 = vmatmul.mubr.msk.f32.vlgmr.msra.gmra.mxu0 %vm1481_vm2, %v7975_v52  ;;  %v10483_v53 = vpop.f32.mrf.mxu1  ;;  %10510 = vmatpush3.msra.mxu1 %v9283_v48 }
0x175a   : > { %v10478_v47 = vpop.f32.mrf.mxu0  ;;  %10505 = vmatpush3.msra.mxu0 %v9282_v51  ;;  %10506 = vmatprep.mubr.msk.f32.mxu0 %vm10738_vm1, %v10737_v2 }
0x175b   : > { %10511 = vmatprep.mubr.msk.f32.mxu1 %vm10738_vm1, %v10737_v2  ;;  %10514 = vmatprep.subr.mxu0 %v10737_v2 }
0x175c   : > { %10525 = vmatprep.subr.mxu1 %v10737_v2 }
0x1761   : > { %v8194_v54 = vpop.f32.mrf.mxu1 }
0x1762   : > { %v8121_v31 = vpop.f32.mrf.mxu0  ;;  %10512 = vmatmul.mubr.msk.f32.vlgmr.msra.gmra.mxu1 %vm1481_vm2, %v8194_v54 }
0x1763   : > { %10507 = vmatmul.mubr.msk.f32.vlgmr.msra.gmra.mxu0 %vm1481_vm2, %v8121_v31  ;;  %v10493_v55 = vpop.f32.mrf.mxu1  ;;  %10541 = vmatprep.mubr.msk.f32.mxu1 %vm10738_vm1, %v10737_v2 }
0x1764   : > { %v10488_v56 = vpop.f32.mrf.mxu0  ;;  %10522 = vmatprep.mubr.msk.f32.mxu0 %vm10738_vm1, %v10737_v2  ;;  %10515 = vmatpush3.msra.mxu0 %v9327_v8 }
0x1765   : > { %10516 = vmatprep.subr.mxu0 %v10737_v2  ;;  %10526 = vmatpush3.msra.mxu1 %v9338_v24 }
0x1766   : > { %10527 = vmatprep.subr.mxu1 %v10737_v2 }
0x1767   : > { %10528 = vmatpush3.msra.mxu1 %v9337_v26 }
0x1768   : > { %10529 = vmatprep.subr.mxu1 %v10737_v2 }
0x1769   : > { %10530 = vmatpush3.msra.mxu1 %v9336_v27 }
0x176a   : > { %10531 = vmatprep.subr.mxu1 %v10737_v2 }
0x176b   : > { %10532 = vmatpush3.msra.mxu1 %v9335_v28 }
0x176c   : > { %10533 = vmatprep.subr.mxu1 %v10737_v2 }
0x176d   : > { %10534 = vmatpush3.msra.mxu1 %v9334_v29 }
0x176e   : > { %10535 = vmatprep.subr.mxu1 %v10737_v2 }
0x176f   : > { %10536 = vmatpush3.msra.mxu1 %v9333_v39 }
0x1770   : > { %10537 = vmatprep.subr.mxu1 %v10737_v2 }
0x1771   : > { %10538 = vmatpush3.msra.mxu1 %v9332_v42 }
0x1772   : > { %10539 = vmatprep.subr.mxu1 %v10737_v2 }
0x1773   : > { %10540 = vmatpush3.msra.mxu1 %v9331_v43 }
0x1818   : > { %v8340_v57 = vpop.f32.mrf.mxu1 }
0x1819   : > { %v8267_v58 = vpop.f32.mrf.mxu0  ;;  %v8491_v0 = vsel %vm585_vm0, %v8340_v57, 0.0 }
0x181a   : > { %v10503_v59 = vpop.f32.mrf.mxu1  ;;  %v8490_v63 = vsel %vm585_vm0, %v8267_v58, 0.0 }
0x181b   : > { %v10498_v62 = vpop.f32.mrf.mxu0  ;;  %v8492_v60 = vadd.f32 %v8491_v0, %v8490_v63  ;;  %v8726_v59 = vld [vmem:[%s12611_s11 + $0x18] sm:$0xff]  ;;  %v8723_v63 = vld [vmem:[%s12611_s11] sm:$0xff] }
0x181c   : > { %v8724_v62 = vld [vmem:[%s12611_s11 + $0x8] sm:$0xff] }
0x1822   : > { %v8486_v1 = vpop.f32.mrf.mxu1 }
0x1823   : > { %v8413_v3 = vpop.f32.mrf.mxu0  ;;  %v8495_v16 = vsel %vm585_vm0, %v8486_v1, 0.0 }
0x1824   : > { %v8493_v4 = vsel %vm585_vm0, %v8413_v3, 0.0  ;;  %v10513_v5 = vpop.f32.mrf.mxu1  ;;  %v8716_v3 = vrot.slane %v12084_v33, %v4599_v25 }
0x1825   : > { %v8494_v7 = vadd.f32 %v8493_v4, %v8492_v60  ;;  %v10508_v15 = vpop.f32.mrf.mxu0 }
0x1827   : > { %v8496_v9 = vadd.f32 %v8495_v16, %v8494_v7  ;;  %v9340_v7 = vld [vmem:[%s12607_s7 + $0x18] ss:$0 sm:$0xff] }
0x1829   : > { %v8501_v11 = vadd.f32 %v8500_v10, %v8496_v9 }
0x182b   : > { %v8502_v12 = vadd.f32 %v8501_v11, %v12132_v6  ;;  %v9326_v6 = vld [vmem:[%s12608_s8 + $0x30] sm:$0xff] }
0x182c   : > { %10517 = vmatpush3.msra.mxu0 %v9326_v6 }
0x182d   : > { %v8503_v13 = vsel %vm585_vm0, %v8502_v12, 0.0  ;;  %10518 = vmatprep.subr.mxu0 %v10737_v2 }
0x182e   : > { %8504 = vadd.xlane.f32.xlu0 %v8503_v13  ;;  %10519 = vmatpush3.msra.mxu0 %v9325_v21 }
0x182f   : > { %10520 = vmatprep.subr.mxu0 %v10737_v2 }
0x1830   : > { %10521 = vmatpush3.msra.mxu0 %v9324_v23 }
0x1831   : > { %10544 = vmatprep.subr.mxu0 %v10737_v2 }
0x18b7   : > { %v8505_v14 = vpop.xlane.xlu0 %8504 }
0x18b8   : > { %v8506_v17 = vmul.f32 0.03125, %v8505_v14 }
0x18ba   : > { %v8507_v18 = vsub.f32 %v8502_v12, %v8506_v17 }
0x18bc   : > { %v8508_v19 = vmul.f32 %v8507_v18, %v8507_v18 }
0x18be   : > { %v8509_v20 = vsel %vm585_vm0, %v8508_v19, 0.0 }
0x18bf   : > { %8510 = vadd.xlane.f32.xlu1 %v8509_v20 }
0x1948   : > { %v8511_v30 = vpop.xlane.xlu1 %8510 }
0x1949   : > { %v8512_v22 = vmul.f32 0.03125, %v8511_v30 }
0x194b   : > { %v8513_v32 = vadd.f32 1e-05, %v8512_v22 }
0x194d   : > { %10668 = vrsqrt.f32 %v8513_v32 }
0x195a   : > { %v10669_v34 = vpop.eup %10668 }
0x195b   : > { %v8515_v35 = vmul.f32 %v10669_v34, %v8507_v18 }
0x195d   : > { %v8520_v37 = vmul.f32 %v8519_v50, %v8515_v35 }
0x195f   : > { %v8525_v38 = vadd.f32 %v8524_v36, %v8520_v37 }
0x1961   : > { %10523 = vmatmul.mubr.msk.f32.vlgmr.msra.gmra.mxu0 %vm585_vm0, %v8525_v38 }
0x1962   : > { %10552 = vmatprep.mubr.msk.f32.mxu0 %vm10738_vm1, %v10737_v2  ;;  %10545 = vmatpush3.msra.mxu0 %v8726_v59 }
0x1963   : > { %10546 = vmatprep.subr.mxu0 %v10737_v2 }
0x1964   : > { %10547 = vmatpush3.msra.mxu0 %v8725_v61 }
0x1965   : > { %10548 = vmatprep.subr.mxu0 %v10737_v2 }
0x1966   : > { %10549 = vmatpush3.msra.mxu0 %v8724_v62 }
0x1967   : > { %10550 = vmatprep.subr.mxu0 %v10737_v2  ;;  %v9341_v2 = vld [vmem:[%s12612_s12] ss:$0 sm:$0xff] }
0x1968   : > { %10551 = vmatpush3.msra.mxu0 %v8723_v63 }
0x1a21   : > { %v8608_v40 = vpop.f32.mrf.mxu0 }
0x1a22   : > { %v8609_v45 = vadd.f32 %v9329_v41, %v8608_v40 }
0x1a23   : > { %v10524_v46 = vpop.f32.mrf.mxu0 }
0x1a24   : > { %v8612_v48 = vmax.f32 %v8609_v45, 0.0 }
0x1a26   : > { %10542 = vmatmul.mubr.msk.f32.vlgmr.msra.gmra.mxu1 %vm4509_vm3, %v8612_v48 }
0x1ae6   : > { %v8695_v51 = vpop.f32.mrf.mxu1 }
0x1ae7   : > { %v8696_v52 = vadd.f32 %v8695_v51, %v8625_v49 }
0x1ae8   : > { %v10543_v53 = vpop.f32.mrf.mxu1 }
0x1ae9   : > { %v8699_v47 = vadd.f32 %v8696_v52, %v8525_v38 }
0x1aeb   : > { %v8700_v54 = vsel %vm585_vm0, %v8699_v47, 0.0 }
0x1aec   : > { %8701 = vadd.xlane.f32.xlu0 %v8700_v54 }
0x1b75   : > { %v8702_v31 = vpop.xlane.xlu0 %8701 }
0x1b76   : > { %v8703_v55 = vmul.f32 0.03125, %v8702_v31 }
0x1b78   : > { %v8704_v56 = vsub.f32 %v8699_v47, %v8703_v55 }
0x1b7a   : > { %v8705_v57 = vmul.f32 %v8704_v56, %v8704_v56 }
0x1b7c   : > { %v8706_v58 = vsel %vm585_vm0, %v8705_v57, 0.0 }
0x1b7d   : > { %8707 = vadd.xlane.f32.xlu1 %v8706_v58 }
0x1c06   : > { %v8708_v0 = vpop.xlane.xlu1 %8707 }
0x1c07   : > { %v8709_v1 = vmul.f32 0.03125, %v8708_v0 }
0x1c09   : > { %v8710_v60 = vadd.f32 1e-05, %v8709_v1 }
0x1c0b   : > { %10670 = vrsqrt.f32 %v8710_v60 }
0x1c18   : > { %v10671_v4 = vpop.eup %10670 }
0x1c19   : > { %v8712_v5 = vmul.f32 %v10671_v4, %v8704_v56 }
0x1c1b   : > { %v8717_v10 = vmul.f32 %v8716_v3, %v8712_v5 }
0x1c1d   : > { %v8722_v15 = vadd.f32 %v9340_v7, %v8717_v10 }
0x1c1f   : > { %10553 = vmatmul.mubr.msk.f32.vlgmr.msra.gmra.mxu0 %vm585_vm0, %v8722_v15 }
0x1cdf   : > { %v8803_v44 = vpop.f32.mrf.mxu0 }
0x1ce0   : > { %v8804_v25 = vadd.f32 %v9341_v2, %v8803_v44 }
0x1ce1   : > { %v10554_v33 = vpop.f32.mrf.mxu0 }
0x1ce2   : > { %8807 = vst [vmem:[%s470_s24] sm:$0xff] %v8804_v25 }
0x1ce3   : > { %10688 = shalt.err (!%p10685_p3)
}
0x1ce4   : > { %s10689_s0 = scalar_lea.hbm %s12565_s30, 128  ;;  %s10693_s24 = scalar_lea.hbm %s12613_s13, 256 }
0x1ce5   : > { %p10690_p4 = scmp.ne.s32.totalorder %s12565_s30, %s10689_s0  ;;  %p10694_p9 = scmp.lt.s32.totalorder %s12565_s30, %s12613_s13 }
0x1ce6   : > { %p10695_p10 = scmp.lt.s32.totalorder %s10693_s24, %s10689_s0 }
0x1ce7   : > { %p10691_p7 = pnand %p10690_p4, %p10848_p5 }
0x1ce8   : > { %p10696_p11 = por %p10695_p10, %p10694_p9 }
0x1ce9   : > { %p10692_p8 = pneg %p10691_p7 }
0x1ceb   : > { %p10697_p12 = pnand %p10696_p11, %p10692_p8 }
0x1ced   : > { %10700 = shalt.err (!%p10697_p12)
}
0x1cee   : > { %10555 = dma.vmem_to_hbm [thread:$0]  (%p10848_p5), %s8823_s20, 128, %s12565_s30, %s8809_s15  }
0x1cef PF: > { %p10561_p13 = scmp.ge.s32.totalorder %s10735_s28, 2  ;;  %s8834_s1 = sand.u32 1, %s10723_s25  }
0x1cf0   : > { %s8835_s21 = scalar_lea.sflag [#allocation3], %s8834_s1 }
0x1cf1   : > { %p10558_p0 = pnand %p10561_p13, %p10852_p6 }
0x1cf3   : > { %p10559_p1 = pneg %p10558_p0 }
0x1cf5   : > { %10718 = dma.done.wait (%p10559_p1), %s8835_s21, 128  }
0x1cf6   : > { %10720 = vsyncadd (%p10559_p1), %s8835_s21, 4294967168  ;;  %s12623_s29 = sld [smem:[#allocation5_spill]]  ;;  %p23_p2 = scmp.ge.s32.totalorder %s10835_s14, 4  }
0x1cf7   : > { %s12624_s25 = smov %s10727_s26  ;;  %s12625_s26 = smov %s10731_s27 }
0x1cf8   : > { %s12627_s28 = smov %s10835_s14  ;;  %25 = sbr.rel (!%p23_p2) target bundleno = 7 (0x7), region = 145 }
0x1cfc   : > { %s12626_s27 = smov %s12623_s29 }
0x1cfd   :  { %8840 = vsyncpa [#allocation3], 1 }
0x1cfe   :  { %8842 = vsyncpa [#allocation3 + $0x1], 1 }

</bundles_post_ra>
